<compile_context>
chip_gen: v7x
topology: tpu7x:2x2x1
jax: 0.10.0
libtpu: 0.0.40
codegen_flags: <defaults>
</compile_context>

<pallas_src>
import functools

import jax
import jax.numpy as jnp
from jax import lax
from jax.experimental import pallas as pl
from jax.experimental.pallas import tpu as pltpu

KS = (5, 9, 13)   # SPP pool sizes; implemented as chained 5x5 pools (exact)
PB = 8            # width (sublane) border: multiple of 8 -> aligned interior stores
R = 2             # radius of the chained 5x5 pool; also the row-axis border


def _silu(x):
    # sigmoid lowers onto the EUP slot; keeps the VPU free in the epilogue.
    return x * jax.nn.sigmoid(x)


def _spp_kernel(H, W, x_ref, w1_ref, s1_ref, b1_ref, w2_ref, s2_ref, b2_ref,
                o_ref, pad_ref, vert_ref):
    C_ = pad_ref.shape[-1]
    neg_inf = jnp.float32(-jnp.inf)

    # ---- cv1: 1x1 conv as bf16 MXU matmul (f32 accum) + folded BN + SiLU ----
    y1 = jnp.dot(x_ref[0], w1_ref[...], preferred_element_type=jnp.float32)
    y1 = _silu(y1 * s1_ref[...] + b1_ref[...])                 # (H*W, C_), f32

    # ---- -inf frame: rewritten every grid step (parallel-safe), all stores ----
    # sublane-aligned (full-width row strips, 8-wide column strips).
    row_strip = jnp.full((R, W + 2 * PB, C_), neg_inf, jnp.float32)
    col_strip = jnp.full((H, PB, C_), neg_inf, jnp.float32)
    pad_ref[0:R, :, :] = row_strip
    pad_ref[R + H:2 * R + H, :, :] = row_strip
    pad_ref[R:R + H, 0:PB, :] = col_strip
    pad_ref[R:R + H, PB + W:W + 2 * PB, :] = col_strip

    # ---- bulk aligned store of cv1 output into the padded spatial buffer ----
    pad_ref[R:R + H, PB:PB + W, :] = y1.reshape(H, W, C_)

    # ---- cv2 accumulation: identity (un-pooled) branch (bf16 ops, f32 acc) ----
    acc = jnp.dot(y1.astype(jnp.bfloat16), w2_ref[0],
                  preferred_element_type=jnp.float32)          # (H*W, C2)

    # ---- pooled branches: k=5,9,13 via chained 5x5 stride-1 pools (exact) ----
    # All pooling math stays in f32 (v5e: no bf16 VPU); cast only at the MXU.
    for idx in range(len(KS)):
        # vertical 5-wide running max, seeded from the first slab
        vert = pad_ref[0:H, PB - R:PB + W + R, :]
        for dy in range(1, 2 * R + 1):
            vert = jnp.maximum(vert, pad_ref[dy:dy + H, PB - R:PB + W + R, :])
        vert_ref[...] = vert                                   # (H, W+4, C_)

        # horizontal 5-wide running max; shifted windows come from VMEM loads
        res = vert_ref[:, 0:W, :]
        for dx in range(1, 2 * R + 1):
            res = jnp.maximum(res, vert_ref[:, dx:dx + W, :])  # (H, W, C_)

        # cv2 contribution of this pooled branch, straight from registers
        acc = acc + jnp.dot(res.reshape(H * W, C_).astype(jnp.bfloat16),
                            w2_ref[idx + 1], preferred_element_type=jnp.float32)

        # write pooled map back for the next chained pool (p9 = 5x5(p5), ...)
        if idx + 1 < len(KS):
            pad_ref[R:R + H, PB:PB + W, :] = res

    # ---- cv2 folded BN + SiLU -------------------------------------------------
    o_ref[0] = _silu(acc * s2_ref[...] + b2_ref[...])


def spp_pallas(x_nchw, params):
    w1, s1, b1, w2, s2, b2 = params
    N, C1, H, W = x_nchw.shape
    C_ = w1.shape[1]
    C2 = w2.shape[1]
    HW = H * W

    # bf16 operands for the MXU (halves input/weight DMA too); f32 accumulation
    # is kept inside the kernel via preferred_element_type.
    x_flat = jnp.transpose(x_nchw, (0, 2, 3, 1)).reshape(N, HW, C1)
    x_flat = x_flat.astype(jnp.bfloat16)
    w1b = w1.astype(jnp.bfloat16)
    w2b = w2.reshape(len(KS) + 1, C_, C2).astype(jnp.bfloat16)
    s1r, b1r = s1.reshape(1, C_), b1.reshape(1, C_)
    s2r, b2r = s2.reshape(1, C2), b2.reshape(1, C2)

    # Explicit scoped-VMEM budget from the actual working set (+25% headroom),
    # floored at the common 32 MiB default, capped below physical on all parts.
    vmem_need = (
        2 * HW * C1 * 2 +                              # x block (bf16), double-buffered
        2 * HW * C2 * 4 +                              # out block (f32), double-buffered
        C1 * C_ * 2 + (len(KS) + 1) * C_ * C2 * 2 +    # weights (bf16), single copy
        2 * (C_ + C2) * 4 +                            # scales / biases (f32)
        (H + 2 * R) * (W + 2 * PB) * C_ * 4 +          # pad_ref scratch
        H * (W + 2 * R) * C_ * 4)                      # vert_ref scratch
    vmem_limit = int(min(100 * 2**20, max(32 * 2**20, 1.25 * vmem_need + 2**20)))

    # Grid-invariant operands: whole-array resident in VMEM (single copy, no
    # per-step DMA, no double buffering).
    weight_spec = pl.BlockSpec(memory_space=pltpu.MemorySpace.VMEM)

    kernel = functools.partial(_spp_kernel, H, W)
    out_flat = pl.pallas_call(
        kernel,
        out_shape=jax.ShapeDtypeStruct((N, HW, C2), jnp.float32),
        grid_spec=pltpu.PrefetchScalarGridSpec(
            num_scalar_prefetch=0,
            grid=(N,),
            in_specs=[
                pl.BlockSpec((1, HW, C1), lambda n: (n, 0, 0)),
                weight_spec,   # w1
                weight_spec,   # s1
                weight_spec,   # b1
                weight_spec,   # w2 (4, C_, C2)
                weight_spec,   # s2
                weight_spec,   # b2
            ],
            out_specs=pl.BlockSpec((1, HW, C2), lambda n: (n, 0, 0)),
            scratch_shapes=[
                pltpu.VMEM((H + 2 * R, W + 2 * PB, C_), jnp.float32),  # pad_ref
                pltpu.VMEM((H, W + 2 * R, C_), jnp.float32),           # vert_ref
            ]),
        compiler_params=pltpu.CompilerParams(
            dimension_semantics=("parallel",),
            vmem_limit_bytes=vmem_limit),
    )(x_flat, w1b, s1r, b1r, w2b, s2r, b2r)

    return jnp.transpose(out_flat.reshape(N, H, W, C2), (0, 3, 1, 2))


# ---------------- deterministic parameter construction -----------------------

def _fold_bn(gamma, beta, mean, var, eps=1e-5):
    scale = gamma / jnp.sqrt(var + eps)
    bias = beta - mean * scale
    return scale, bias


def init_params(key, c1, c2):
    c_ = c1 // 2
    cc = c_ * (len(KS) + 1)
    ks = jax.random.split(key, 10)
    w1 = 0.5 * jax.random.normal(ks[0], (c1, c_), jnp.float32)
    g1 = 1.0 + 0.1 * jax.random.normal(ks[1], (c_,), jnp.float32)
    be1 = 0.1 * jax.random.normal(ks[2], (c_,), jnp.float32)
    m1 = 0.1 * jax.random.normal(ks[3], (c_,), jnp.float32)
    v1 = jax.random.uniform(ks[4], (c_,), jnp.float32, 0.5, 1.5)
    w2 = 0.5 * jax.random.normal(ks[5], (cc, c2), jnp.float32)
    g2 = 1.0 + 0.1 * jax.random.normal(ks[6], (c2,), jnp.float32)
    be2 = 0.1 * jax.random.normal(ks[7], (c2,), jnp.float32)
    m2 = 0.1 * jax.random.normal(ks[8], (c2,), jnp.float32)
    v2 = jax.random.uniform(ks[9], (c2,), jnp.float32, 0.5, 1.5)
    s1, b1 = _fold_bn(g1, be1, m1, v1)
    s2, b2 = _fold_bn(g2, be2, m2, v2)
    return w1, s1, b1, w2, s2, b2


# ---------------- pure-JAX references (PyTorch SPP semantics) -----------------

def spp_reference(x_nchw, params, *, mxu_bf16):
    """mxu_bf16=True mimics the kernel's bf16-operand / f32-accum matmuls;
    mxu_bf16=False is the full-f32 (HIGHEST) semantic reference."""
    w1, s1, b1, w2, s2, b2 = params
    N, C1, H, W = x_nchw.shape
    x = jnp.transpose(x_nchw, (0, 2, 3, 1))
    if mxu_bf16:
        xm, w1m, w2m = (x.astype(jnp.bfloat16), w1.astype(jnp.bfloat16),
                        w2.astype(jnp.bfloat16))
        prec = None
    else:
        xm, w1m, w2m = x, w1, w2
        prec = lax.Precision.HIGHEST
    y1 = jnp.dot(xm.reshape(-1, C1), w1m,
                 preferred_element_type=jnp.float32, precision=prec)
    y1 = y1 * s1 + b1
    y1 = y1 * jax.nn.sigmoid(y1)
    y1 = y1.reshape(N, H, W, -1)
    feats = [y1]
    for k in KS:
        p = k // 2
        feats.append(lax.reduce_window(
            y1, -jnp.inf, lax.max, (1, k, k, 1), (1, 1, 1, 1),
            ((0, 0), (p, p), (p, p), (0, 0))))
    cat = jnp.concatenate(feats, axis=-1)
    if mxu_bf16:
        cat = cat.astype(jnp.bfloat16)
    y2 = jnp.dot(cat.reshape(N * H * W, -1), w2m,
                 preferred_element_type=jnp.float32, precision=prec)
    y2 = y2 * s2 + b2
    y2 = y2 * jax.nn.sigmoid(y2)
    return jnp.transpose(y2.reshape(N, H, W, -1), (0, 3, 1, 2))


if __name__ == "__main__":
    key = jax.random.PRNGKey(0)
    kx, kp = jax.random.split(key)
    # Small test shapes.  NOTE: perf conclusions require realistic SPP widths
    # (C1~1024, C_~512, C2~1024); with toy channel counts the lanes are ~idle.
    N, C1, H, W = 2, 4, 16, 16
    C2 = 8
    x = jax.random.normal(kx, (N, C1, H, W), jnp.float32)
    params = init_params(kp, C1, C2)

    out = jax.block_until_ready(spp_pallas(x, params))
    assert out.shape == (N, C2, H, W)

    # Structural check: matches a reference that uses the same bf16 MXU operands.
    ref_struct = spp_reference(x, params, mxu_bf16=True)
    err_struct = float(jnp.max(jnp.abs(out - ref_struct)))
    assert err_struct < 1e-2, f"structural max abs err {err_struct}"

    # Semantic check: close to the full-f32 PyTorch-equivalent reference
    # (looser bound accounts for the bf16 matmul operands).
    ref_f32 = spp_reference(x, params, mxu_bf16=False)
    err_sem = float(jnp.max(jnp.abs(out - ref_f32)))
    assert err_sem < 1e-1, f"semantic (f32) max abs err {err_sem}"

    print("KERNEL_OK")
</pallas_src>

<mosaic_0001>
module attributes {stable_mosaic.version = 11 : i64} {
  func.func @_spp_kernel(%arg0: i32, %arg1: memref<1x256x4xbf16, #tpu.memory_space<vmem>>, %arg2: memref<4x2xbf16, #tpu.memory_space<vmem>>, %arg3: memref<1x2xf32, #tpu.memory_space<vmem>>, %arg4: memref<1x2xf32, #tpu.memory_space<vmem>>, %arg5: memref<4x2x8xbf16, #tpu.memory_space<vmem>>, %arg6: memref<1x8xf32, #tpu.memory_space<vmem>>, %arg7: memref<1x8xf32, #tpu.memory_space<vmem>>, %arg8: memref<1x256x8xf32, #tpu.memory_space<vmem>>, %arg9: memref<20x32x2xf32, #tpu.memory_space<vmem>>, %arg10: memref<16x20x2xf32, #tpu.memory_space<vmem>>) attributes {dimension_semantics = [#tpu.dimension_semantics<parallel>], iteration_bounds = array<i64: 2>, scalar_prefetch = 0 : i64, scratch_operands = 2 : i64, tpu.core_type = #tpu.core_type<tc>, window_params = [{transform_indices = @transform_0, window_bounds = array<i64: 1, 256, 4>}, {pipeline_mode = #tpu.pipeline_mode<synchronous>, transform_indices = @transform_1, window_bounds = array<i64: 4, 2>}, {pipeline_mode = #tpu.pipeline_mode<synchronous>, transform_indices = @transform_2, window_bounds = array<i64: 1, 2>}, {pipeline_mode = #tpu.pipeline_mode<synchronous>, transform_indices = @transform_3, window_bounds = array<i64: 1, 2>}, {pipeline_mode = #tpu.pipeline_mode<synchronous>, transform_indices = @transform_4, window_bounds = array<i64: 4, 2, 8>}, {pipeline_mode = #tpu.pipeline_mode<synchronous>, transform_indices = @transform_5, window_bounds = array<i64: 1, 8>}, {pipeline_mode = #tpu.pipeline_mode<synchronous>, transform_indices = @transform_6, window_bounds = array<i64: 1, 8>}, {transform_indices = @transform_7, window_bounds = array<i64: 1, 256, 8>}]} {
    %c0 = arith.constant 0 : index
    %c0_0 = arith.constant 0 : index
    %c0_1 = arith.constant 0 : index
    %0 = vector.load %arg1[%c0, %c0_0, %c0_1] : memref<1x256x4xbf16, #tpu.memory_space<vmem>>, vector<1x256x4xbf16>
    %1 = vector.shape_cast %0 : vector<1x256x4xbf16> to vector<256x4xbf16>
    %c0_2 = arith.constant 0 : index
    %c0_3 = arith.constant 0 : index
    %2 = vector.load %arg2[%c0_2, %c0_3] : memref<4x2xbf16, #tpu.memory_space<vmem>>, vector<4x2xbf16>
    %cst = arith.constant dense<0.000000e+00> : vector<256x2xf32>
    %3 = tpu.matmul %1, %2, %cst {dimension_numbers = #tpu.dot_dimension_numbers<[1], [0], [0], [1], [0, 0, 1, 1], [], []>} : vector<256x4xbf16>, vector<4x2xbf16>, vector<256x2xf32> -> vector<256x2xf32>
    %c0_4 = arith.constant 0 : index
    %c0_5 = arith.constant 0 : index
    %4 = vector.load %arg3[%c0_4, %c0_5] : memref<1x2xf32, #tpu.memory_space<vmem>>, vector<1x2xf32>
    %5 = vector.broadcast %4 : vector<1x2xf32> to vector<256x2xf32>
    %6 = arith.mulf %3, %5 : vector<256x2xf32>
    %c0_6 = arith.constant 0 : index
    %c0_7 = arith.constant 0 : index
    %7 = vector.load %arg4[%c0_6, %c0_7] : memref<1x2xf32, #tpu.memory_space<vmem>>, vector<1x2xf32>
    %8 = vector.broadcast %7 : vector<1x2xf32> to vector<256x2xf32>
    %9 = arith.addf %6, %8 : vector<256x2xf32>
    %10 = arith.negf %9 : vector<256x2xf32>
    %11 = math.exp %10 : vector<256x2xf32>
    %cst_8 = arith.constant 1.000000e+00 : f32
    %12 = vector.broadcast %cst_8 : f32 to vector<256x2xf32>
    %13 = arith.addf %12, %11 : vector<256x2xf32>
    %14 = arith.divf %12, %13 : vector<256x2xf32>
    %15 = arith.mulf %9, %14 : vector<256x2xf32>
    %cst_9 = arith.constant 0xFF800000 : f32
    %16 = vector.broadcast %cst_9 : f32 to vector<2x32x2xf32>
    %cst_10 = arith.constant 0xFF800000 : f32
    %17 = vector.broadcast %cst_10 : f32 to vector<16x8x2xf32>
    %c0_11 = arith.constant 0 : index
    %c0_12 = arith.constant 0 : index
    %c0_13 = arith.constant 0 : index
    %18 = vector.load %arg9[%c0_11, %c0_12, %c0_13] : memref<20x32x2xf32, #tpu.memory_space<vmem>>, vector<2x32x2xf32>
    tpu.vector_store %arg9[%c0_11, %c0_12, %c0_13], %16 {strides = array<i32>} : memref<20x32x2xf32, #tpu.memory_space<vmem>>, vector<2x32x2xf32>,
    %c18 = arith.constant 18 : index
    %c0_14 = arith.constant 0 : index
    %c0_15 = arith.constant 0 : index
    %19 = vector.load %arg9[%c18, %c0_14, %c0_15] : memref<20x32x2xf32, #tpu.memory_space<vmem>>, vector<2x32x2xf32>
    tpu.vector_store %arg9[%c18, %c0_14, %c0_15], %16 {strides = array<i32>} : memref<20x32x2xf32, #tpu.memory_space<vmem>>, vector<2x32x2xf32>,
    %c2 = arith.constant 2 : index
    %c0_16 = arith.constant 0 : index
    %c0_17 = arith.constant 0 : index
    %20 = vector.load %arg9[%c2, %c0_16, %c0_17] : memref<20x32x2xf32, #tpu.memory_space<vmem>>, vector<16x8x2xf32>
    tpu.vector_store %arg9[%c2, %c0_16, %c0_17], %17 {strides = array<i32>} : memref<20x32x2xf32, #tpu.memory_space<vmem>>, vector<16x8x2xf32>,
    %c2_18 = arith.constant 2 : index
    %c24 = arith.constant 24 : index
    %c0_19 = arith.constant 0 : index
    %21 = vector.load %arg9[%c2_18, %c24, %c0_19] : memref<20x32x2xf32, #tpu.memory_space<vmem>>, vector<16x8x2xf32>
    tpu.vector_store %arg9[%c2_18, %c24, %c0_19], %17 {strides = array<i32>} : memref<20x32x2xf32, #tpu.memory_space<vmem>>, vector<16x8x2xf32>,
    %22 = vector.shape_cast %15 : vector<256x2xf32> to vector<16x16x2xf32>
    %c2_20 = arith.constant 2 : index
    %c8 = arith.constant 8 : index
    %c0_21 = arith.constant 0 : index
    %23 = vector.load %arg9[%c2_20, %c8, %c0_21] : memref<20x32x2xf32, #tpu.memory_space<vmem>>, vector<16x16x2xf32>
    tpu.vector_store %arg9[%c2_20, %c8, %c0_21], %22 {strides = array<i32>} : memref<20x32x2xf32, #tpu.memory_space<vmem>>, vector<16x16x2xf32>,
    %24 = arith.truncf %15 : vector<256x2xf32> to vector<256x2xbf16>
    %c0_22 = arith.constant 0 : index
    %c0_23 = arith.constant 0 : index
    %c0_24 = arith.constant 0 : index
    %25 = vector.load %arg5[%c0_22, %c0_23, %c0_24] : memref<4x2x8xbf16, #tpu.memory_space<vmem>>, vector<1x2x8xbf16>
    %26 = vector.shape_cast %25 : vector<1x2x8xbf16> to vector<2x8xbf16>
    %cst_25 = arith.constant dense<0.000000e+00> : vector<256x8xf32>
    %27 = tpu.matmul %24, %26, %cst_25 {dimension_numbers = #tpu.dot_dimension_numbers<[1], [0], [0], [1], [0, 0, 1, 1], [], []>} : vector<256x2xbf16>, vector<2x8xbf16>, vector<256x8xf32> -> vector<256x8xf32>
    %c0_26 = arith.constant 0 : index
    %c6 = arith.constant 6 : index
    %c0_27 = arith.constant 0 : index
    %28 = vector.load %arg9[%c0_26, %c6, %c0_27] : memref<20x32x2xf32, #tpu.memory_space<vmem>>, vector<16x20x2xf32>
    %c1 = arith.constant 1 : index
    %c6_28 = arith.constant 6 : index
    %c0_29 = arith.constant 0 : index
    %29 = vector.load %arg9[%c1, %c6_28, %c0_29] : memref<20x32x2xf32, #tpu.memory_space<vmem>>, vector<16x20x2xf32>
    %30 = arith.maximumf %28, %29 : vector<16x20x2xf32>
    %c2_30 = arith.constant 2 : index
    %c6_31 = arith.constant 6 : index
    %c0_32 = arith.constant 0 : index
    %31 = vector.load %arg9[%c2_30, %c6_31, %c0_32] : memref<20x32x2xf32, #tpu.memory_space<vmem>>, vector<16x20x2xf32>
    %32 = arith.maximumf %30, %31 : vector<16x20x2xf32>
    %c3 = arith.constant 3 : index
    %c6_33 = arith.constant 6 : index
    %c0_34 = arith.constant 0 : index
    %33 = vector.load %arg9[%c3, %c6_33, %c0_34] : memref<20x32x2xf32, #tpu.memory_space<vmem>>, vector<16x20x2xf32>
    %34 = arith.maximumf %32, %33 : vector<16x20x2xf32>
    %c4 = arith.constant 4 : index
    %c6_35 = arith.constant 6 : index
    %c0_36 = arith.constant 0 : index
    %35 = vector.load %arg9[%c4, %c6_35, %c0_36] : memref<20x32x2xf32, #tpu.memory_space<vmem>>, vector<16x20x2xf32>
    %36 = arith.maximumf %34, %35 : vector<16x20x2xf32>
    %c0_37 = arith.constant 0 : index
    %c0_38 = arith.constant 0 : index
    %c0_39 = arith.constant 0 : index
    %37 = vector.load %arg10[%c0_37, %c0_38, %c0_39] : memref<16x20x2xf32, #tpu.memory_space<vmem>>, vector<16x20x2xf32>
    tpu.vector_store %arg10[%c0_37, %c0_38, %c0_39], %36 {strides = array<i32>} : memref<16x20x2xf32, #tpu.memory_space<vmem>>, vector<16x20x2xf32>,
    %c0_40 = arith.constant 0 : index
    %c0_41 = arith.constant 0 : index
    %c0_42 = arith.constant 0 : index
    %38 = vector.load %arg10[%c0_40, %c0_41, %c0_42] : memref<16x20x2xf32, #tpu.memory_space<vmem>>, vector<16x16x2xf32>
    %c0_43 = arith.constant 0 : index
    %c1_44 = arith.constant 1 : index
    %c0_45 = arith.constant 0 : index
    %39 = vector.load %arg10[%c0_43, %c1_44, %c0_45] : memref<16x20x2xf32, #tpu.memory_space<vmem>>, vector<16x16x2xf32>
    %40 = arith.maximumf %38, %39 : vector<16x16x2xf32>
    %c0_46 = arith.constant 0 : index
    %c2_47 = arith.constant 2 : index
    %c0_48 = arith.constant 0 : index
    %41 = vector.load %arg10[%c0_46, %c2_47, %c0_48] : memref<16x20x2xf32, #tpu.memory_space<vmem>>, vector<16x16x2xf32>
    %42 = arith.maximumf %40, %41 : vector<16x16x2xf32>
    %c0_49 = arith.constant 0 : index
    %c3_50 = arith.constant 3 : index
    %c0_51 = arith.constant 0 : index
    %43 = vector.load %arg10[%c0_49, %c3_50, %c0_51] : memref<16x20x2xf32, #tpu.memory_space<vmem>>, vector<16x16x2xf32>
    %44 = arith.maximumf %42, %43 : vector<16x16x2xf32>
    %c0_52 = arith.constant 0 : index
    %c4_53 = arith.constant 4 : index
    %c0_54 = arith.constant 0 : index
    %45 = vector.load %arg10[%c0_52, %c4_53, %c0_54] : memref<16x20x2xf32, #tpu.memory_space<vmem>>, vector<16x16x2xf32>
    %46 = arith.maximumf %44, %45 : vector<16x16x2xf32>
    %47 = vector.shape_cast %46 : vector<16x16x2xf32> to vector<256x2xf32>
    %48 = arith.truncf %47 : vector<256x2xf32> to vector<256x2xbf16>
    %c1_55 = arith.constant 1 : index
    %c0_56 = arith.constant 0 : index
    %c0_57 = arith.constant 0 : index
    %49 = vector.load %arg5[%c1_55, %c0_56, %c0_57] : memref<4x2x8xbf16, #tpu.memory_space<vmem>>, vector<1x2x8xbf16>
    %50 = vector.shape_cast %49 : vector<1x2x8xbf16> to vector<2x8xbf16>
    %cst_58 = arith.constant dense<0.000000e+00> : vector<256x8xf32>
    %51 = tpu.matmul %48, %50, %cst_58 {dimension_numbers = #tpu.dot_dimension_numbers<[1], [0], [0], [1], [0, 0, 1, 1], [], []>} : vector<256x2xbf16>, vector<2x8xbf16>, vector<256x8xf32> -> vector<256x8xf32>
    %52 = arith.addf %27, %51 : vector<256x8xf32>
    %c2_59 = arith.constant 2 : index
    %c8_60 = arith.constant 8 : index
    %c0_61 = arith.constant 0 : index
    %53 = vector.load %arg9[%c2_59, %c8_60, %c0_61] : memref<20x32x2xf32, #tpu.memory_space<vmem>>, vector<16x16x2xf32>
    tpu.vector_store %arg9[%c2_59, %c8_60, %c0_61], %46 {strides = array<i32>} : memref<20x32x2xf32, #tpu.memory_space<vmem>>, vector<16x16x2xf32>,
    %c0_62 = arith.constant 0 : index
    %c6_63 = arith.constant 6 : index
    %c0_64 = arith.constant 0 : index
    %54 = vector.load %arg9[%c0_62, %c6_63, %c0_64] : memref<20x32x2xf32, #tpu.memory_space<vmem>>, vector<16x20x2xf32>
    %c1_65 = arith.constant 1 : index
    %c6_66 = arith.constant 6 : index
    %c0_67 = arith.constant 0 : index
    %55 = vector.load %arg9[%c1_65, %c6_66, %c0_67] : memref<20x32x2xf32, #tpu.memory_space<vmem>>, vector<16x20x2xf32>
    %56 = arith.maximumf %54, %55 : vector<16x20x2xf32>
    %c2_68 = arith.constant 2 : index
    %c6_69 = arith.constant 6 : index
    %c0_70 = arith.constant 0 : index
    %57 = vector.load %arg9[%c2_68, %c6_69, %c0_70] : memref<20x32x2xf32, #tpu.memory_space<vmem>>, vector<16x20x2xf32>
    %58 = arith.maximumf %56, %57 : vector<16x20x2xf32>
    %c3_71 = arith.constant 3 : index
    %c6_72 = arith.constant 6 : index
    %c0_73 = arith.constant 0 : index
    %59 = vector.load %arg9[%c3_71, %c6_72, %c0_73] : memref<20x32x2xf32, #tpu.memory_space<vmem>>, vector<16x20x2xf32>
    %60 = arith.maximumf %58, %59 : vector<16x20x2xf32>
    %c4_74 = arith.constant 4 : index
    %c6_75 = arith.constant 6 : index
    %c0_76 = arith.constant 0 : index
    %61 = vector.load %arg9[%c4_74, %c6_75, %c0_76] : memref<20x32x2xf32, #tpu.memory_space<vmem>>, vector<16x20x2xf32>
    %62 = arith.maximumf %60, %61 : vector<16x20x2xf32>
    %c0_77 = arith.constant 0 : index
    %c0_78 = arith.constant 0 : index
    %c0_79 = arith.constant 0 : index
    %63 = vector.load %arg10[%c0_77, %c0_78, %c0_79] : memref<16x20x2xf32, #tpu.memory_space<vmem>>, vector<16x20x2xf32>
    tpu.vector_store %arg10[%c0_77, %c0_78, %c0_79], %62 {strides = array<i32>} : memref<16x20x2xf32, #tpu.memory_space<vmem>>, vector<16x20x2xf32>,
    %c0_80 = arith.constant 0 : index
    %c0_81 = arith.constant 0 : index
    %c0_82 = arith.constant 0 : index
    %64 = vector.load %arg10[%c0_80, %c0_81, %c0_82] : memref<16x20x2xf32, #tpu.memory_space<vmem>>, vector<16x16x2xf32>
    %c0_83 = arith.constant 0 : index
    %c1_84 = arith.constant 1 : index
    %c0_85 = arith.constant 0 : index
    %65 = vector.load %arg10[%c0_83, %c1_84, %c0_85] : memref<16x20x2xf32, #tpu.memory_space<vmem>>, vector<16x16x2xf32>
    %66 = arith.maximumf %64, %65 : vector<16x16x2xf32>
    %c0_86 = arith.constant 0 : index
    %c2_87 = arith.constant 2 : index
    %c0_88 = arith.constant 0 : index
    %67 = vector.load %arg10[%c0_86, %c2_87, %c0_88] : memref<16x20x2xf32, #tpu.memory_space<vmem>>, vector<16x16x2xf32>
    %68 = arith.maximumf %66, %67 : vector<16x16x2xf32>
    %c0_89 = arith.constant 0 : index
    %c3_90 = arith.constant 3 : index
    %c0_91 = arith.constant 0 : index
    %69 = vector.load %arg10[%c0_89, %c3_90, %c0_91] : memref<16x20x2xf32, #tpu.memory_space<vmem>>, vector<16x16x2xf32>
    %70 = arith.maximumf %68, %69 : vector<16x16x2xf32>
    %c0_92 = arith.constant 0 : index
    %c4_93 = arith.constant 4 : index
    %c0_94 = arith.constant 0 : index
    %71 = vector.load %arg10[%c0_92, %c4_93, %c0_94] : memref<16x20x2xf32, #tpu.memory_space<vmem>>, vector<16x16x2xf32>
    %72 = arith.maximumf %70, %71 : vector<16x16x2xf32>
    %73 = vector.shape_cast %72 : vector<16x16x2xf32> to vector<256x2xf32>
    %74 = arith.truncf %73 : vector<256x2xf32> to vector<256x2xbf16>
    %c2_95 = arith.constant 2 : index
    %c0_96 = arith.constant 0 : index
    %c0_97 = arith.constant 0 : index
    %75 = vector.load %arg5[%c2_95, %c0_96, %c0_97] : memref<4x2x8xbf16, #tpu.memory_space<vmem>>, vector<1x2x8xbf16>
    %76 = vector.shape_cast %75 : vector<1x2x8xbf16> to vector<2x8xbf16>
    %cst_98 = arith.constant dense<0.000000e+00> : vector<256x8xf32>
    %77 = tpu.matmul %74, %76, %cst_98 {dimension_numbers = #tpu.dot_dimension_numbers<[1], [0], [0], [1], [0, 0, 1, 1], [], []>} : vector<256x2xbf16>, vector<2x8xbf16>, vector<256x8xf32> -> vector<256x8xf32>
    %78 = arith.addf %52, %77 : vector<256x8xf32>
    %c2_99 = arith.constant 2 : index
    %c8_100 = arith.constant 8 : index
    %c0_101 = arith.constant 0 : index
    %79 = vector.load %arg9[%c2_99, %c8_100, %c0_101] : memref<20x32x2xf32, #tpu.memory_space<vmem>>, vector<16x16x2xf32>
    tpu.vector_store %arg9[%c2_99, %c8_100, %c0_101], %72 {strides = array<i32>} : memref<20x32x2xf32, #tpu.memory_space<vmem>>, vector<16x16x2xf32>,
    %c0_102 = arith.constant 0 : index
    %c6_103 = arith.constant 6 : index
    %c0_104 = arith.constant 0 : index
    %80 = vector.load %arg9[%c0_102, %c6_103, %c0_104] : memref<20x32x2xf32, #tpu.memory_space<vmem>>, vector<16x20x2xf32>
    %c1_105 = arith.constant 1 : index
    %c6_106 = arith.constant 6 : index
    %c0_107 = arith.constant 0 : index
    %81 = vector.load %arg9[%c1_105, %c6_106, %c0_107] : memref<20x32x2xf32, #tpu.memory_space<vmem>>, vector<16x20x2xf32>
    %82 = arith.maximumf %80, %81 : vector<16x20x2xf32>
    %c2_108 = arith.constant 2 : index
    %c6_109 = arith.constant 6 : index
    %c0_110 = arith.constant 0 : index
    %83 = vector.load %arg9[%c2_108, %c6_109, %c0_110] : memref<20x32x2xf32, #tpu.memory_space<vmem>>, vector<16x20x2xf32>
    %84 = arith.maximumf %82, %83 : vector<16x20x2xf32>
    %c3_111 = arith.constant 3 : index
    %c6_112 = arith.constant 6 : index
    %c0_113 = arith.constant 0 : index
    %85 = vector.load %arg9[%c3_111, %c6_112, %c0_113] : memref<20x32x2xf32, #tpu.memory_space<vmem>>, vector<16x20x2xf32>
    %86 = arith.maximumf %84, %85 : vector<16x20x2xf32>
    %c4_114 = arith.constant 4 : index
    %c6_115 = arith.constant 6 : index
    %c0_116 = arith.constant 0 : index
    %87 = vector.load %arg9[%c4_114, %c6_115, %c0_116] : memref<20x32x2xf32, #tpu.memory_space<vmem>>, vector<16x20x2xf32>
    %88 = arith.maximumf %86, %87 : vector<16x20x2xf32>
    %c0_117 = arith.constant 0 : index
    %c0_118 = arith.constant 0 : index
    %c0_119 = arith.constant 0 : index
    %89 = vector.load %arg10[%c0_117, %c0_118, %c0_119] : memref<16x20x2xf32, #tpu.memory_space<vmem>>, vector<16x20x2xf32>
    tpu.vector_store %arg10[%c0_117, %c0_118, %c0_119], %88 {strides = array<i32>} : memref<16x20x2xf32, #tpu.memory_space<vmem>>, vector<16x20x2xf32>,
    %c0_120 = arith.constant 0 : index
    %c0_121 = arith.constant 0 : index
    %c0_122 = arith.constant 0 : index
    %90 = vector.load %arg10[%c0_120, %c0_121, %c0_122] : memref<16x20x2xf32, #tpu.memory_space<vmem>>, vector<16x16x2xf32>
    %c0_123 = arith.constant 0 : index
    %c1_124 = arith.constant 1 : index
    %c0_125 = arith.constant 0 : index
    %91 = vector.load %arg10[%c0_123, %c1_124, %c0_125] : memref<16x20x2xf32, #tpu.memory_space<vmem>>, vector<16x16x2xf32>
    %92 = arith.maximumf %90, %91 : vector<16x16x2xf32>
    %c0_126 = arith.constant 0 : index
    %c2_127 = arith.constant 2 : index
    %c0_128 = arith.constant 0 : index
    %93 = vector.load %arg10[%c0_126, %c2_127, %c0_128] : memref<16x20x2xf32, #tpu.memory_space<vmem>>, vector<16x16x2xf32>
    %94 = arith.maximumf %92, %93 : vector<16x16x2xf32>
    %c0_129 = arith.constant 0 : index
    %c3_130 = arith.constant 3 : index
    %c0_131 = arith.constant 0 : index
    %95 = vector.load %arg10[%c0_129, %c3_130, %c0_131] : memref<16x20x2xf32, #tpu.memory_space<vmem>>, vector<16x16x2xf32>
    %96 = arith.maximumf %94, %95 : vector<16x16x2xf32>
    %c0_132 = arith.constant 0 : index
    %c4_133 = arith.constant 4 : index
    %c0_134 = arith.constant 0 : index
    %97 = vector.load %arg10[%c0_132, %c4_133, %c0_134] : memref<16x20x2xf32, #tpu.memory_space<vmem>>, vector<16x16x2xf32>
    %98 = arith.maximumf %96, %97 : vector<16x16x2xf32>
    %99 = vector.shape_cast %98 : vector<16x16x2xf32> to vector<256x2xf32>
    %100 = arith.truncf %99 : vector<256x2xf32> to vector<256x2xbf16>
    %c3_135 = arith.constant 3 : index
    %c0_136 = arith.constant 0 : index
    %c0_137 = arith.constant 0 : index
    %101 = vector.load %arg5[%c3_135, %c0_136, %c0_137] : memref<4x2x8xbf16, #tpu.memory_space<vmem>>, vector<1x2x8xbf16>
    %102 = vector.shape_cast %101 : vector<1x2x8xbf16> to vector<2x8xbf16>
    %cst_138 = arith.constant dense<0.000000e+00> : vector<256x8xf32>
    %103 = tpu.matmul %100, %102, %cst_138 {dimension_numbers = #tpu.dot_dimension_numbers<[1], [0], [0], [1], [0, 0, 1, 1], [], []>} : vector<256x2xbf16>, vector<2x8xbf16>, vector<256x8xf32> -> vector<256x8xf32>
    %104 = arith.addf %78, %103 : vector<256x8xf32>
    %c0_139 = arith.constant 0 : index
    %c0_140 = arith.constant 0 : index
    %105 = vector.load %arg6[%c0_139, %c0_140] : memref<1x8xf32, #tpu.memory_space<vmem>>, vector<1x8xf32>
    %106 = vector.broadcast %105 : vector<1x8xf32> to vector<256x8xf32>
    %107 = arith.mulf %104, %106 : vector<256x8xf32>
    %c0_141 = arith.constant 0 : index
    %c0_142 = arith.constant 0 : index
    %108 = vector.load %arg7[%c0_141, %c0_142] : memref<1x8xf32, #tpu.memory_space<vmem>>, vector<1x8xf32>
    %109 = vector.broadcast %108 : vector<1x8xf32> to vector<256x8xf32>
    %110 = arith.addf %107, %109 : vector<256x8xf32>
    %111 = arith.negf %110 : vector<256x8xf32>
    %112 = math.exp %111 : vector<256x8xf32>
    %cst_143 = arith.constant 1.000000e+00 : f32
    %113 = vector.broadcast %cst_143 : f32 to vector<256x8xf32>
    %114 = arith.addf %113, %112 : vector<256x8xf32>
    %115 = arith.divf %113, %114 : vector<256x8xf32>
    %116 = arith.mulf %110, %115 : vector<256x8xf32>
    %c0_144 = arith.constant 0 : index
    %c0_145 = arith.constant 0 : index
    %c0_146 = arith.constant 0 : index
    %117 = vector.load %arg8[%c0_144, %c0_145, %c0_146] : memref<1x256x8xf32, #tpu.memory_space<vmem>>, vector<1x256x8xf32>
    %118 = vector.shape_cast %117 : vector<1x256x8xf32> to vector<256x8xf32>
    %119 = vector.shape_cast %116 : vector<256x8xf32> to vector<1x256x8xf32>
    tpu.vector_store %arg8[%c0_144, %c0_145, %c0_146], %119 {strides = array<i32>} : memref<1x256x8xf32, #tpu.memory_space<vmem>>, vector<1x256x8xf32>,
    return
  }
  func.func @transform_0(%arg0: i32) -> (i32, i32, i32) {
    %c0_i32 = arith.constant 0 : i32
    %c0_i32_0 = arith.constant 0 : i32
    %c0_i32_1 = arith.constant 0 : i32
    return %arg0, %c0_i32, %c0_i32_0 : i32, i32, i32
  }
  func.func @transform_1(%arg0: i32) -> (i32, i32) {
    %c0_i32 = arith.constant 0 : i32
    %c0_i32_0 = arith.constant 0 : i32
    %c0_i32_1 = arith.constant 0 : i32
    return %c0_i32, %c0_i32_0 : i32, i32
  }
  func.func @transform_2(%arg0: i32) -> (i32, i32) {
    %c0_i32 = arith.constant 0 : i32
    %c0_i32_0 = arith.constant 0 : i32
    %c0_i32_1 = arith.constant 0 : i32
    return %c0_i32, %c0_i32_0 : i32, i32
  }
  func.func @transform_3(%arg0: i32) -> (i32, i32) {
    %c0_i32 = arith.constant 0 : i32
    %c0_i32_0 = arith.constant 0 : i32
    %c0_i32_1 = arith.constant 0 : i32
    return %c0_i32, %c0_i32_0 : i32, i32
  }
  func.func @transform_4(%arg0: i32) -> (i32, i32, i32) {
    %c0_i32 = arith.constant 0 : i32
    %c0_i32_0 = arith.constant 0 : i32
    %c0_i32_1 = arith.constant 0 : i32
    %c0_i32_2 = arith.constant 0 : i32
    return %c0_i32, %c0_i32_0, %c0_i32_1 : i32, i32, i32
  }
  func.func @transform_5(%arg0: i32) -> (i32, i32) {
    %c0_i32 = arith.constant 0 : i32
    %c0_i32_0 = arith.constant 0 : i32
    %c0_i32_1 = arith.constant 0 : i32
    return %c0_i32, %c0_i32_0 : i32, i32
  }
  func.func @transform_6(%arg0: i32) -> (i32, i32) {
    %c0_i32 = arith.constant 0 : i32
    %c0_i32_0 = arith.constant 0 : i32
    %c0_i32_1 = arith.constant 0 : i32
    return %c0_i32, %c0_i32_0 : i32, i32
  }
  func.func @transform_7(%arg0: i32) -> (i32, i32, i32) {
    %c0_i32 = arith.constant 0 : i32
    %c0_i32_0 = arith.constant 0 : i32
    %c0_i32_1 = arith.constant 0 : i32
    return %arg0, %c0_i32, %c0_i32_0 : i32, i32, i32
  }
}

</mosaic_0001>

<bundles_post_ra>
// kernel: tpu_custom_call.1
= control target key start
LH: loop header
LB: loop body
LE: loop exit
PB: predicated region body
PF: predicated region fallthrough
CT: control target
= control target key end

     0   :  { %s5613_s24 = smov 0   ;;  %s8361_s0 = inlined_call_operand.vmem [shape: bf16[2,256,4], index: 0, kind: input, shape index: {}]   ;;  %s8362_s1 = inlined_call_operand.vmem [shape: bf16[4,2], index: 1, kind: input, shape index: {}]   ;;  %s8363_s2 = inlined_call_operand.vmem [shape: f32[1,2], index: 2, kind: input, shape index: {}]   ;;  %s8364_s3 = inlined_call_operand.vmem [shape: f32[1,2], index: 3, kind: input, shape index: {}]   ;;  %s8365_s4 = inlined_call_operand.vmem [shape: bf16[4,2,8], index: 4, kind: input, shape index: {}]   ;;  %s8366_s5 = inlined_call_operand.vmem [shape: f32[1,8], index: 5, kind: input, shape index: {}]   ;;  %s8367_s6 = inlined_call_operand.vmem [shape: f32[1,8], index: 6, kind: input, shape index: {}]   ;;  %s8368_s7 = inlined_call_operand.vmem [shape: f32[2,256,8], index: 7, kind: output, shape index: {}]  }
   0x1 LB: > { %s4738_s25 = sadd.s32 4294967295, %s5570_s24   ;;  %p4742_p0 = scmp.ge.s32.totalorder %s5570_s24, 1  ;;  %s5570_s24 = sphi %s5613_s24, %s17_s24  }
   0x2   : > { %p237_p1 = scmp.lt.s32.totalorder %s5570_s24, 3 }
   0x4   : > { %p238_p2 = pnand %p4742_p0, %p237_p1 }
   0x6   : > { %241 = sbr.rel (%p238_p2) target bundleno = 962 (0x3c2), region = 48 }
   0xd   : > { %v312_v0 = vld [vmem:[%s8362_s1] sm:$0x3]  ;;  %vm442_vm0 = vcmask 1041408   ;;  %p269_p3 = scmp.lt.s32.totalorder %s4738_s25, 1  ;;  %vm393_vm1 = vcmask 31744   ;;  %vm909_vm2 = vcmask 15360  }
   0xe   : > { %5271 = vmatprep.subr.msk.bf16.mxu0 %vm442_vm0, %v312_v0  ;;  %v444_v1 = vsel %vm442_vm0, %v312_v0, 0  ;;  %v5572_v18 = vmov -inf   ;;  %v5715_v19 = vld [vmem:[%s8365_s4] sm:$0x1]  ;;  %vm1847_vm3 = vcmask 1040384   ;;  %vm1446_vm4 = vcmask 11264  }
   0xf   : > { %5004 = vmatpush3.bf16.msra.mxu0 %v444_v1  ;;  %s8633_s25 = smov (!%p269_p3, %s4738_s25), 1  ;;  %929 = vst.msk [vmem:[#allocation2 + $0x60] sm:$0xff] %vm909_vm2, %v5572_v18  ;;  %910 = vst.msk [vmem:[#allocation2] sm:$0xff] %vm909_vm2, %v5572_v18  ;;  %5274 = vmatprep.subr.msk.bf16.mxu1 %vm1847_vm3, %v5715_v19  ;;  %v5721_v20 = vsel %vm1847_vm3, %v5715_v19, 0  ;;  %v5727_v21 = vld [vmem:[%s8365_s4 + $0x1] sm:$0x1] }
  0x10   : > { %s4916_s28 = sshll.u32 %s8633_s25, 7  ;;  %911 = vst.msk [vmem:[#allocation2 + $0x8] sm:$0xff] %vm909_vm2, %v5572_v18  ;;  %912 = vst.msk [vmem:[#allocation2 + $0x10] sm:$0xff] %vm909_vm2, %v5572_v18  ;;  %5174 = vmatpush3.bf16.msra.mxu1 %v5721_v20  ;;  %5272 = vmatprep.subr.msk.bf16.mxu0 %vm1847_vm3, %v5727_v21  ;;  %v5734_v22 = vld [vmem:[%s8363_s2] ss:$0 sm:$0xff]  ;;  %s4917_s27 = sshll.u32 %s8633_s25, 8 }
  0x11   : > { %s5630_s8 = scalar_lea.vmem %s8361_s0, %s4916_s28  ;;  %913 = vst.msk [vmem:[#allocation2 + $0x18] sm:$0xff] %vm909_vm2, %v5572_v18  ;;  %914 = vst.msk [vmem:[#allocation2 + $0x20] sm:$0xff] %vm909_vm2, %v5572_v18  ;;  %v5739_v24 = vld [vmem:[%s8364_s3] ss:$0 sm:$0xff]  ;;  %s8146_s29 = scalar_lea.vmem %s8368_s7, %s4917_s27  ;;  %vm4650_vm5 = vcmask 64512  }
  0x12   : > { %v5286_v2 = vld [vmem:[%s5630_s8] sm:$0xff]   ;;  %v5287_v3 = vld [vmem:[%s5630_s8 + $0x8] sm:$0xff]   ;;  %v5288_v4 = vld [vmem:[%s5630_s8 + $0x10] sm:$0xff]   ;;  %915 = vst.msk [vmem:[#allocation2 + $0x28] sm:$0xff] %vm909_vm2, %v5572_v18 }
  0x13   : > { %5005 = vmatprep.mubr.msk.bf16.mxu0 %vm393_vm1, %v5286_v2  ;;  %v5289_v5 = vld [vmem:[%s5630_s8 + $0x18] sm:$0xff]   ;;  %v5290_v6 = vld [vmem:[%s5630_s8 + $0x20] sm:$0xff]   ;;  %v5291_v7 = vld [vmem:[%s5630_s8 + $0x28] sm:$0xff]   ;;  %916 = vst.msk [vmem:[#allocation2 + $0x30] sm:$0xff] %vm909_vm2, %v5572_v18 }
  0x14   : > { %5006 = vmatmul.mubr.msk.bf16.vlgmr.msra.gmra.mrb[0].mxu0 %vm393_vm1, %v5287_v3  ;;  %v5292_v8 = vld [vmem:[%s5630_s8 + $0x30] sm:$0xff]   ;;  %v5293_v9 = vld [vmem:[%s5630_s8 + $0x38] sm:$0xff]   ;;  %v5294_v10 = vld [vmem:[%s5630_s8 + $0x40] sm:$0xff]   ;;  %917 = vst.msk [vmem:[#allocation2 + $0x38] sm:$0xff] %vm909_vm2, %v5572_v18 }
  0x15   : > { %5009 = vmatprep.mubr.msk.bf16.mxu0 %vm393_vm1, %v5288_v4  ;;  %v5295_v11 = vld [vmem:[%s5630_s8 + $0x48] sm:$0xff]   ;;  %v5296_v12 = vld [vmem:[%s5630_s8 + $0x50] sm:$0xff]   ;;  %v5297_v13 = vld [vmem:[%s5630_s8 + $0x58] sm:$0xff]   ;;  %919 = vst.msk [vmem:[#allocation2 + $0x240] sm:$0xff] %vm909_vm2, %v5572_v18 }
  0x16   : > { %v5298_v14 = vld [vmem:[%s5630_s8 + $0x60] sm:$0xff]   ;;  %v5299_v15 = vld [vmem:[%s5630_s8 + $0x68] sm:$0xff]   ;;  %v5300_v16 = vld [vmem:[%s5630_s8 + $0x70] sm:$0xff]   ;;  %920 = vst.msk [vmem:[#allocation2 + $0x248] sm:$0xff] %vm909_vm2, %v5572_v18 }
  0x17   : > { %v5301_v17 = vld [vmem:[%s5630_s8 + $0x78] sm:$0xff]   ;;  %921 = vst.msk [vmem:[#allocation2 + $0x250] sm:$0xff] %vm909_vm2, %v5572_v18  ;;  %922 = vst.msk [vmem:[#allocation2 + $0x258] sm:$0xff] %vm909_vm2, %v5572_v18 }
  0x18   : > { %923 = vst.msk [vmem:[#allocation2 + $0x260] sm:$0xff] %vm909_vm2, %v5572_v18  ;;  %924 = vst.msk [vmem:[#allocation2 + $0x268] sm:$0xff] %vm909_vm2, %v5572_v18 }
  0x19   : > { %925 = vst.msk [vmem:[#allocation2 + $0x270] sm:$0xff] %vm909_vm2, %v5572_v18  ;;  %926 = vst.msk [vmem:[#allocation2 + $0x278] sm:$0xff] %vm909_vm2, %v5572_v18 }
  0x1a   : > { %928 = vst.msk [vmem:[#allocation2 + $0x40] sm:$0xff] %vm909_vm2, %v5572_v18  ;;  %930 = vst.msk [vmem:[#allocation2 + $0x80] sm:$0xff] %vm909_vm2, %v5572_v18 }
  0x1b   : > { %931 = vst.msk [vmem:[#allocation2 + $0xa0] sm:$0xff] %vm909_vm2, %v5572_v18  ;;  %932 = vst.msk [vmem:[#allocation2 + $0xc0] sm:$0xff] %vm909_vm2, %v5572_v18 }
  0x1c   : > { %5010 = vmatmul.mubr.msk.bf16.gmra.mrb[4].mxu0 %vm393_vm1, %v5289_v5  ;;  %933 = vst.msk [vmem:[#allocation2 + $0xe0] sm:$0xff] %vm909_vm2, %v5572_v18  ;;  %934 = vst.msk [vmem:[#allocation2 + $0x100] sm:$0xff] %vm909_vm2, %v5572_v18 }
  0x1d   : > { %5013 = vmatprep.mubr.msk.bf16.mxu0 %vm393_vm1, %v5290_v6  ;;  %935 = vst.msk [vmem:[#allocation2 + $0x120] sm:$0xff] %vm909_vm2, %v5572_v18  ;;  %936 = vst.msk [vmem:[#allocation2 + $0x140] sm:$0xff] %vm909_vm2, %v5572_v18 }
  0x1e   : > { %937 = vst.msk [vmem:[#allocation2 + $0x160] sm:$0xff] %vm909_vm2, %v5572_v18  ;;  %938 = vst.msk [vmem:[#allocation2 + $0x180] sm:$0xff] %vm909_vm2, %v5572_v18 }
  0x1f   : > { %939 = vst.msk [vmem:[#allocation2 + $0x1a0] sm:$0xff] %vm909_vm2, %v5572_v18  ;;  %940 = vst.msk [vmem:[#allocation2 + $0x1c0] sm:$0xff] %vm909_vm2, %v5572_v18 }
  0x20   : > { %941 = vst.msk [vmem:[#allocation2 + $0x1e0] sm:$0xff] %vm909_vm2, %v5572_v18  ;;  %942 = vst.msk [vmem:[#allocation2 + $0x200] sm:$0xff] %vm909_vm2, %v5572_v18 }
  0x21   : > { %943 = vst.msk [vmem:[#allocation2 + $0x220] sm:$0xff] %vm909_vm2, %v5572_v18  ;;  %944 = vst.msk [vmem:[#allocation2 + $0x58] sm:$0xff] %vm909_vm2, %v5572_v18 }
  0x22   : > { %945 = vst.msk [vmem:[#allocation2 + $0x78] sm:$0xff] %vm909_vm2, %v5572_v18  ;;  %946 = vst.msk [vmem:[#allocation2 + $0x98] sm:$0xff] %vm909_vm2, %v5572_v18 }
  0x23   : > { %947 = vst.msk [vmem:[#allocation2 + $0xb8] sm:$0xff] %vm909_vm2, %v5572_v18  ;;  %948 = vst.msk [vmem:[#allocation2 + $0xd8] sm:$0xff] %vm909_vm2, %v5572_v18 }
  0x24   : > { %5014 = vmatmul.mubr.msk.bf16.gmra.mrb[8].mxu0 %vm393_vm1, %v5291_v7  ;;  %949 = vst.msk [vmem:[#allocation2 + $0xf8] sm:$0xff] %vm909_vm2, %v5572_v18  ;;  %950 = vst.msk [vmem:[#allocation2 + $0x118] sm:$0xff] %vm909_vm2, %v5572_v18 }
  0x25   : > { %5017 = vmatprep.mubr.msk.bf16.mxu0 %vm393_vm1, %v5292_v8  ;;  %951 = vst.msk [vmem:[#allocation2 + $0x138] sm:$0xff] %vm909_vm2, %v5572_v18  ;;  %952 = vst.msk [vmem:[#allocation2 + $0x158] sm:$0xff] %vm909_vm2, %v5572_v18 }
  0x26   : > { %953 = vst.msk [vmem:[#allocation2 + $0x178] sm:$0xff] %vm909_vm2, %v5572_v18  ;;  %954 = vst.msk [vmem:[#allocation2 + $0x198] sm:$0xff] %vm909_vm2, %v5572_v18 }
  0x27   : > { %955 = vst.msk [vmem:[#allocation2 + $0x1b8] sm:$0xff] %vm909_vm2, %v5572_v18  ;;  %956 = vst.msk [vmem:[#allocation2 + $0x1d8] sm:$0xff] %vm909_vm2, %v5572_v18 }
  0x28   : > { %957 = vst.msk [vmem:[#allocation2 + $0x1f8] sm:$0xff] %vm909_vm2, %v5572_v18  ;;  %958 = vst.msk [vmem:[#allocation2 + $0x218] sm:$0xff] %vm909_vm2, %v5572_v18 }
  0x29   : > { %959 = vst.msk [vmem:[#allocation2 + $0x238] sm:$0xff] %vm909_vm2, %v5572_v18  ;;  %8450 = vst [vmem:[#allocation4_spill] sm:$0xff] %v5721_v20 }
  0x2c   : > { %5018 = vmatmul.mubr.msk.bf16.gmra.mrb[12].mxu0 %vm393_vm1, %v5293_v9 }
  0x2d   : > { %5021 = vmatprep.mubr.msk.bf16.mxu0 %vm393_vm1, %v5294_v10 }
  0x34   : > { %5022 = vmatmul.mubr.msk.bf16.gmra.mrb[16].mxu0 %vm393_vm1, %v5295_v11 }
  0x35   : > { %5025 = vmatprep.mubr.msk.bf16.mxu0 %vm393_vm1, %v5296_v12 }
  0x3c   : > { %5026 = vmatmul.mubr.msk.bf16.gmra.mrb[20].mxu0 %vm393_vm1, %v5297_v13 }
  0x3d   : > { %5029 = vmatprep.mubr.msk.bf16.mxu0 %vm393_vm1, %v5298_v14 }
  0x44   : > { %5030 = vmatmul.mubr.msk.bf16.gmra.mrb[24].mxu0 %vm393_vm1, %v5299_v15 }
  0x45   : > { %5033 = vmatprep.mubr.msk.bf16.mxu0 %vm393_vm1, %v5300_v16 }
  0x4c   : > { %5034 = vmatmul.mubr.msk.bf16.gmra.mrb[28].mxu0 %vm393_vm1, %v5301_v17 }
  0xe7   : > { %v5007_v23 = vpop.f32.mrb[0].mxu0 }
  0xe8   : > { %v616_v25 = vmul.f32 %v5007_v23, %v5734_v22  ;;  %v480_v26 = vpop.f32.mrb[1].mxu0 }
  0xe9   : > { %v614_v27 = vmul.f32 %v5734_v22, %v480_v26  ;;  %v5008_v28 = vpop.f32.mrb[2].mxu0 }
  0xea   : > { %v5744_v29 = vadd.f32 %v5739_v24, %v616_v25  ;;  %v617_v30 = vmul.f32 %v5008_v28, %v5734_v22  ;;  %v483_v31 = vpop.f32.mrb[3].mxu0 }
  0xeb   : > { %v5748_v32 = vadd.f32 %v5739_v24, %v614_v27  ;;  %v615_v33 = vmul.f32 %v5734_v22, %v483_v31 }
  0xec   : > { %v4783_v34 = vmul.f32 -1.442695, %v5744_v29  ;;  %v5753_v35 = vadd.f32 %v5739_v24, %v617_v30 }
  0xed   : > { %v4781_v36 = vmul.f32 -1.442695, %v5748_v32  ;;  %v5757_v37 = vadd.f32 %v5739_v24, %v615_v33 }
  0xee   : > { %5302 = vpow2.f32 %v4783_v34  ;;  %v4784_v38 = vmul.f32 -1.442695, %v5753_v35 }
  0xef   : > { %5304 = vpow2.f32 %v4781_v36  ;;  %v4782_v39 = vmul.f32 -1.442695, %v5757_v37  ;;  %v5011_v40 = vpop.f32.mrb[4].mxu0 }
  0xf0   : > { %5306 = vpow2.f32 %v4784_v38  ;;  %v620_v41 = vmul.f32 %v5011_v40, %v5734_v22  ;;  %v496_v42 = vpop.f32.mrb[5].mxu0 }
  0xf1   : > { %5308 = vpow2.f32 %v4782_v39  ;;  %v618_v43 = vmul.f32 %v5734_v22, %v496_v42  ;;  %v5012_v44 = vpop.f32.mrb[6].mxu0 }
  0xf2   : > { %v5764_v45 = vadd.f32 %v5739_v24, %v620_v41  ;;  %v621_v46 = vmul.f32 %v5012_v44, %v5734_v22  ;;  %v499_v47 = vpop.f32.mrb[7].mxu0 }
  0xf3   : > { %v5768_v48 = vadd.f32 %v5739_v24, %v618_v43  ;;  %v619_v49 = vmul.f32 %v5734_v22, %v499_v47 }
  0xf4   : > { %v4787_v50 = vmul.f32 -1.442695, %v5764_v45  ;;  %v5773_v51 = vadd.f32 %v5739_v24, %v621_v46 }
  0xf5   : > { %v4785_v52 = vmul.f32 -1.442695, %v5768_v48  ;;  %v5777_v53 = vadd.f32 %v5739_v24, %v619_v49 }
  0xf6   : > { %5310 = vpow2.f32 %v4787_v50  ;;  %v4788_v54 = vmul.f32 -1.442695, %v5773_v51 }
  0xf7   : > { %5312 = vpow2.f32 %v4785_v52  ;;  %v4786_v55 = vmul.f32 -1.442695, %v5777_v53  ;;  %v5015_v56 = vpop.f32.mrb[8].mxu0 }
  0xf8   : > { %v5303_v57 = vpop.eup %5302  ;;  %5314 = vpow2.f32 %v4788_v54  ;;  %v624_v58 = vmul.f32 %v5015_v56, %v5734_v22  ;;  %v512_v59 = vpop.f32.mrb[9].mxu0 }
  0xf9   : > { %v5305_v60 = vpop.eup %5304  ;;  %v783_v61 = vadd.f32 1.0, %v5303_v57  ;;  %5316 = vpow2.f32 %v4786_v55  ;;  %v622_v62 = vmul.f32 %v5734_v22, %v512_v59  ;;  %v5016_v63 = vpop.f32.mrb[10].mxu0  ;;  %v1849_v59 = vsel %vm1847_vm3, %v5727_v21, 0 }
  0xfa   : > { %v5307_v0 = vpop.eup %5306  ;;  %v781_v1 = vadd.f32 1.0, %v5305_v60  ;;  %v5784_v2 = vadd.f32 %v5739_v24, %v624_v58  ;;  %v625_v3 = vmul.f32 %v5016_v63, %v5734_v22  ;;  %v515_v4 = vpop.f32.mrb[11].mxu0  ;;  %5038 = vmatpush3.bf16.msra.mxu0 %v1849_v59 }
  0xfb   : > { %v5309_v5 = vpop.eup %5308  ;;  %5318 = vrcp.f32 %v783_v61  ;;  %v784_v6 = vadd.f32 1.0, %v5307_v0  ;;  %v5788_v7 = vadd.f32 %v5739_v24, %v622_v62  ;;  %v623_v8 = vmul.f32 %v5734_v22, %v515_v4  ;;  %5273 = vmatprep.subr.msk.bf16.mxu0 %vm1847_vm3, %v5715_v19 }
  0xfc   : > { %5320 = vrcp.f32 %v781_v1  ;;  %v782_v9 = vadd.f32 1.0, %v5309_v5  ;;  %v4791_v10 = vmul.f32 -1.442695, %v5784_v2  ;;  %v5793_v11 = vadd.f32 %v5739_v24, %v625_v3 }
  0xfd   : > { %5322 = vrcp.f32 %v784_v6  ;;  %v4789_v12 = vmul.f32 -1.442695, %v5788_v7  ;;  %v5797_v13 = vadd.f32 %v5739_v24, %v623_v8 }
  0xfe   : > { %5324 = vrcp.f32 %v782_v9  ;;  %v4792_v14 = vmul.f32 -1.442695, %v5793_v11 }
  0xff   : > { %5326 = vpow2.f32 %v4791_v10  ;;  %v4790_v15 = vmul.f32 -1.442695, %v5797_v13  ;;  %v5019_v16 = vpop.f32.mrb[12].mxu0  ;;  %v1009_v10 = vld [vmem:[#allocation2 + $0x6] sm:$0xff] }
 0x100   : > { %v5311_v17 = vpop.eup %5310  ;;  %5328 = vpow2.f32 %v4789_v12  ;;  %v628_v18 = vmul.f32 %v5019_v16, %v5734_v22  ;;  %v528_v23 = vpop.f32.mrb[13].mxu0  ;;  %v5855_v12 = vld [vmem:[#allocation2 + $0x26] sm:$0xff] }
 0x101   : > { %v5313_v25 = vpop.eup %5312  ;;  %v787_v26 = vadd.f32 1.0, %v5311_v17  ;;  %5330 = vpow2.f32 %v4792_v14  ;;  %v626_v27 = vmul.f32 %v5734_v22, %v528_v23  ;;  %v5020_v28 = vpop.f32.mrb[14].mxu0  ;;  %v5861_v23 = vld [vmem:[#allocation2 + $0x2e] sm:$0xff] }
 0x102   : > { %v5315_v30 = vpop.eup %5314  ;;  %v785_v31 = vadd.f32 1.0, %v5313_v25  ;;  %5332 = vpow2.f32 %v4790_v15  ;;  %v5804_v33 = vadd.f32 %v5739_v24, %v628_v18  ;;  %v629_v34 = vmul.f32 %v5020_v28, %v5734_v22  ;;  %v531_v36 = vpop.f32.mrb[15].mxu0  ;;  %v1010_v18 = vld [vmem:[#allocation2 + $0xe] sm:$0xff]  ;;  %v1011_v28 = vld [vmem:[#allocation2 + $0x16] sm:$0xf] }
 0x103   : > { %v5317_v38 = vpop.eup %5316  ;;  %5334 = vrcp.f32 %v787_v26  ;;  %v788_v39 = vadd.f32 1.0, %v5315_v30  ;;  %v5808_v40 = vadd.f32 %v5739_v24, %v626_v27  ;;  %v627_v41 = vmul.f32 %v5734_v22, %v531_v36  ;;  %v1060_v30 = vld [vmem:[#allocation2 + $0x36] sm:$0xf] }
 0x104   : > { %5336 = vrcp.f32 %v785_v31  ;;  %v786_v42 = vadd.f32 1.0, %v5317_v38  ;;  %v4795_v43 = vmul.f32 -1.442695, %v5804_v33  ;;  %v5813_v44 = vadd.f32 %v5739_v24, %v629_v34 }
 0x105   : > { %v5319_v46 = vpop.eup %5318  ;;  %5338 = vrcp.f32 %v788_v39  ;;  %v4793_v47 = vmul.f32 -1.442695, %v5808_v40  ;;  %v5817_v49 = vadd.f32 %v5739_v24, %v627_v41  ;;  %v5873_v38 = vmax.f32 %v1009_v10, %v5855_v12 }
 0x106   : > { %v5321_v50 = vpop.eup %5320  ;;  %v5820_v52 = vmul.f32 %v5319_v46, %v5744_v29  ;;  %5340 = vrcp.f32 %v786_v42  ;;  %v4796_v54 = vmul.f32 -1.442695, %v5813_v44 }
 0x107   : > { %v5323_v55 = vpop.eup %5322  ;;  %v5824_v56 = vmul.f32 %v5321_v50, %v5748_v32  ;;  %5342 = vpow2.f32 %v4795_v43  ;;  %v4794_v57 = vmul.f32 -1.442695, %v5817_v49  ;;  %v5023_v58 = vpop.f32.mrb[16].mxu0  ;;  %8456 = vst [vmem:[#allocation10_spill] sm:$0xff] %v5873_v38 }
 0x108   : > { %8451 = vst [vmem:[#allocation5_spill] sm:$0xff] %v5820_v52  ;;  %v5325_v60 = vpop.eup %5324  ;;  %962 = vst.msk [vmem:[#allocation2 + $0x68] sm:$0xff] %vm909_vm2, %v5820_v52  ;;  %v5832_v29 = vmul.f32 %v5323_v55, %v5753_v35  ;;  %5344 = vpow2.f32 %v4793_v47  ;;  %v632_v61 = vmul.f32 %v5023_v58, %v5734_v22  ;;  %v544_v62 = vpop.f32.mrb[17].mxu0  ;;  %v5884_v47 = vmax.f32 %v1010_v18, %v5861_v23 }
 0x109   : > { %8452 = vst [vmem:[#allocation6_spill] sm:$0xff] %v5824_v56  ;;  %v5327_v32 = vpop.eup %5326  ;;  %960 = vst.msk [vmem:[#allocation2 + $0x48] sm:$0xff] %vm909_vm2, %v5824_v56  ;;  %v5838_v63 = vmul.f32 %v5325_v60, %v5757_v37  ;;  %5346 = vpow2.f32 %v4796_v54  ;;  %v630_v21 = vmul.f32 %v5734_v22, %v544_v62  ;;  %v5024_v0 = vpop.f32.mrb[18].mxu0  ;;  %v1108_v58 = vmax.f32 %v1011_v28, %v1060_v30 }
 0x10a   : > { %8453 = vst [vmem:[#allocation7_spill] sm:$0xff] %v5832_v29  ;;  %v5329_v35 = vpop.eup %5328  ;;  %963 = vst.msk [vmem:[#allocation2 + $0x70] sm:$0xff] %vm909_vm2, %v5832_v29  ;;  %v791_v3 = vadd.f32 1.0, %v5327_v32  ;;  %5348 = vpow2.f32 %v4794_v57  ;;  %v547_v4 = vpop.f32.mrb[19].mxu0  ;;  %v5852_v19 = vadd.f32 %v5739_v24, %v632_v61  ;;  %v633_v8 = vmul.f32 %v5024_v0, %v5734_v22  ;;  %v1014_v32 = vld [vmem:[#allocation2 + $0x36] sm:$0xf] }
 0x10b   : > { %8454 = vst [vmem:[#allocation8_spill] sm:$0xff] %v5838_v63  ;;  %v5331_v5 = vpop.eup %5330  ;;  %961 = vst.msk [vmem:[#allocation2 + $0x50] sm:$0xff] %vm909_vm2, %v5838_v63  ;;  %v789_v6 = vadd.f32 1.0, %v5329_v35  ;;  %v5858_v15 = vadd.f32 %v5739_v24, %v630_v21  ;;  %v631_v16 = vmul.f32 %v5734_v22, %v547_v4 }
 0x10c   : > { %v5333_v9 = vpop.eup %5332  ;;  %5350 = vrcp.f32 %v791_v3  ;;  %v792_v14 = vadd.f32 1.0, %v5331_v5  ;;  %v5864_v26 = vadd.f32 %v5739_v24, %v633_v8  ;;  %v4799_v41 = vmul.f32 -1.442695, %v5852_v19  ;;  %8458 = vst [vmem:[#allocation12_spill] sm:$0xff] %v5884_v47 }
 0x10d   : > { %v5335_v17 = vpop.eup %5334  ;;  %5352 = vrcp.f32 %v789_v6  ;;  %v790_v25 = vadd.f32 1.0, %v5333_v9  ;;  %v5870_v34 = vadd.f32 %v5739_v24, %v631_v16 }
 0x10e   : > { %v5337_v27 = vpop.eup %5336  ;;  %v5867_v31 = vmul.f32 %v5335_v17, %v5764_v45  ;;  %5354 = vrcp.f32 %v792_v14  ;;  %v4800_v60 = vmul.f32 -1.442695, %v5864_v26 }
 0x10f   : > { %v5339_v36 = vpop.eup %5338  ;;  %v5876_v39 = vmul.f32 %v5337_v27, %v5768_v48  ;;  %5356 = vrcp.f32 %v790_v25  ;;  %v5027_v42 = vpop.f32.mrb[20].mxu0  ;;  %v5879_v46 = vld [vmem:[#allocation2 + $0x66] sm:$0xff]  ;;  %v4797_v48 = vmul.f32 -1.442695, %v5858_v15 }
 0x110   : > { %8455 = vst [vmem:[#allocation9_spill] sm:$0xff] %v5867_v31  ;;  %v5341_v43 = vpop.eup %5340  ;;  %v5881_v45 = vld [vmem:[#allocation2 + $0x46] sm:$0xff]  ;;  %966 = vst.msk [vmem:[#allocation2 + $0xa8] sm:$0xff] %vm909_vm2, %v5867_v31  ;;  %v5889_v50 = vmul.f32 %v5339_v36, %v5773_v51  ;;  %v636_v54 = vmul.f32 %v5027_v42, %v5734_v22  ;;  %v5893_v55 = vpop.f32.mrb[21].mxu0  ;;  %5358 = vpow2.f32 %v4799_v41 }
 0x111   : > { %8457 = vst [vmem:[#allocation11_spill] sm:$0xff] %v5876_v39  ;;  %v5343_v57 = vpop.eup %5342  ;;  %964 = vst.msk [vmem:[#allocation2 + $0x88] sm:$0xff] %vm909_vm2, %v5876_v39  ;;  %v5898_v59 = vmul.f32 %v5341_v43, %v5777_v53  ;;  %v5901_v61 = vpop.f32.mrb[22].mxu0  ;;  %v1109_v62 = vmax.f32 %v5855_v12, %v5881_v45  ;;  %v5912_v53 = vmul.f32 -1.442695, %v5870_v34  ;;  %v1112_v4 = vmax.f32 %v5881_v45, %v5879_v46  ;;  %v5918_v6 = vld [vmem:[#allocation2 + $0x6e] sm:$0xff] }
 0x112   : > { %8459 = vst [vmem:[#allocation13_spill] sm:$0xff] %v5889_v50  ;;  %v5345_v51 = vpop.eup %5344  ;;  %v5905_v21 = vld [vmem:[#allocation2 + $0x4e] sm:$0xff]  ;;  %967 = vst.msk [vmem:[#allocation2 + $0xb0] sm:$0xff] %vm909_vm2, %v5889_v50  ;;  %v795_v35 = vadd.f32 1.0, %v5343_v57  ;;  %v1202_v5 = vmax.f32 %v5873_v38, %v5881_v45  ;;  %v1063_v8 = vld [vmem:[#allocation2 + $0x56] sm:$0xf]  ;;  %5360 = vpow2.f32 %v4797_v48  ;;  %v5931_v18 = vadd.f32 %v5739_v24, %v636_v54 }
 0x113   : > { %8460 = vst [vmem:[#allocation14_spill] sm:$0xff] %v5898_v59  ;;  %v5347_v3 = vpop.eup %5346  ;;  %v1156_v9 = vld [vmem:[#allocation2 + $0x56] sm:$0xf]  ;;  %965 = vst.msk [vmem:[#allocation2 + $0x90] sm:$0xff] %vm909_vm2, %v5898_v59  ;;  %v1110_v16 = vmax.f32 %v5861_v23, %v5905_v21  ;;  %v1203_v17 = vmax.f32 %v5884_v47, %v5905_v21  ;;  %v5933_v25 = vpop.f32.mrb[23].mxu0  ;;  %v1111_v27 = vmax.f32 %v1014_v32, %v1063_v8  ;;  %v793_v42 = vadd.f32 1.0, %v5345_v51 }
 0x114   : > { %v5349_v10 = vpop.eup %5348  ;;  %v5922_v12 = vld [vmem:[#allocation2 + $0x76] sm:$0xf]  ;;  %v5935_v28 = vmax.f32 %v1108_v58, %v1156_v9  ;;  %5362 = vrcp.f32 %v795_v35  ;;  %v1205_v41 = vmax.f32 %v1109_v62, %v5879_v46  ;;  %v796_v43 = vadd.f32 1.0, %v5347_v3 }
 0x115   : > { %v5924_v14 = vld [vmem:[#allocation2 + $0x56] sm:$0xf]  ;;  %v794_v57 = vadd.f32 1.0, %v5349_v10  ;;  %5364 = vpow2.f32 %v4800_v60  ;;  %v1299_v62 = vmax.f32 %v1202_v5, %v5879_v46  ;;  %v1206_v51 = vmax.f32 %v1110_v16, %v5918_v6 }
 0x116   : > { %v5351_v36 = vpop.eup %5350  ;;  %v1159_v35 = vld [vmem:[#allocation2 + $0x76] sm:$0xf]  ;;  %5366 = vrcp.f32 %v793_v42  ;;  %v1300_v30 = vmax.f32 %v1203_v17, %v5918_v6 }
 0x117   : > { %v5353_v45 = vpop.eup %5352  ;;  %v5945_v54 = vmul.f32 %v5351_v36, %v5784_v2  ;;  %v5947_v58 = vpop.f32.mrb[24].mxu0  ;;  %v1253_v8 = vld [vmem:[#allocation2 + $0x76] sm:$0xf]  ;;  %v5958_v10 = vld [vmem:[#allocation2 + $0xa6] sm:$0xff]  ;;  %v1207_v36 = vmax.f32 %v1111_v27, %v1159_v35  ;;  %5368 = vrcp.f32 %v796_v43 }
 0x118   : > { %v5355_v32 = vpop.eup %5354  ;;  %v5949_v9 = vld [vmem:[#allocation2 + $0x86] sm:$0xff]  ;;  %v5954_v3 = vmul.f32 %v5353_v45, %v5788_v7  ;;  %v5956_v0 = vpop.f32.mrb[25].mxu0  ;;  %v1301_v1 = vmax.f32 %v5935_v28, %v1253_v8  ;;  %v1020_v17 = vld [vmem:[#allocation2 + $0x76] sm:$0xf]  ;;  %5370 = vrcp.f32 %v794_v57  ;;  %v6002_v57 = vmul.f32 %v5901_v61, %v5734_v22 }
 0x119   : > { %8461 = vst [vmem:[#allocation15_spill] sm:$0xff] %v5945_v54  ;;  %v5357_v2 = vpop.eup %5356  ;;  %v1302_v60 = vmax.f32 %v1205_v41, %v5949_v9  ;;  %970 = vst.msk [vmem:[#allocation2 + $0xe8] sm:$0xff] %vm909_vm2, %v5945_v54  ;;  %v5965_v5 = vpop.f32.mrb[26].mxu0  ;;  %v1396_v7 = vmax.f32 %v1299_v62, %v5949_v9  ;;  %v5971_v16 = vmul.f32 %v5355_v32, %v5793_v11  ;;  %v1353_v23 = vld [vmem:[#allocation2 + $0xb6] sm:$0xf]  ;;  %5372 = vpow2.f32 %v5912_v53 }
 0x11a   : > { %8462 = vst [vmem:[#allocation16_spill] sm:$0xff] %v5954_v3  ;;  %968 = vst.msk [vmem:[#allocation2 + $0xc8] sm:$0xff] %vm909_vm2, %v5954_v3  ;;  %v5974_v41 = vmul.f32 %v5357_v2, %v5797_v13  ;;  %v1115_v27 = vmax.f32 %v5879_v46, %v5949_v9  ;;  %v5979_v28 = vmax.f32 %v1112_v4, %v5949_v9  ;;  %v5982_v45 = vld [vmem:[#allocation2 + $0x8e] sm:$0xff]  ;;  %v1069_v35 = vld [vmem:[#allocation2 + $0x96] sm:$0xf]  ;;  %v5984_v8 = vpop.f32.mrb[27].mxu0  ;;  %v5359_v32 = vpop.eup %5358 }
 0x11b   : > { %8463 = vst [vmem:[#allocation17_spill] sm:$0xff] %v5971_v16  ;;  %v1399_v42 = vmax.f32 %v1302_v60, %v5958_v10  ;;  %v1118_v11 = vmax.f32 %v5949_v9, %v5958_v10  ;;  %1444 = vst.msk [vmem:[#allocation3] sm:$0xff] %vm909_vm2, %v1396_v7  ;;  %v1256_v13 = vld [vmem:[#allocation2 + $0x96] sm:$0xf]  ;;  %v5994_v46 = vmul.f32 -1.442695, %v5931_v18  ;;  %v5998_v4 = vmul.f32 %v5734_v22, %v5893_v55 }
 0x11c   : > { %8464 = vst [vmem:[#allocation18_spill] sm:$0xff] %v5974_v41  ;;  %v1350_v43 = vld [vmem:[#allocation2 + $0x96] sm:$0xf]  ;;  %971 = vst.msk [vmem:[#allocation2 + $0xf0] sm:$0xff] %vm909_vm2, %v5971_v16  ;;  %v6005_v9 = vld [vmem:[#allocation2 + $0xae] sm:$0xff]  ;;  %v1116_v62 = vmax.f32 %v5918_v6, %v5982_v45  ;;  %v1117_v2 = vmax.f32 %v1020_v17, %v1069_v35  ;;  %v1303_v7 = vmax.f32 %v1206_v51, %v5982_v45  ;;  %v5361_v48 = vpop.eup %5360 }
 0x11d   : > { %969 = vst.msk [vmem:[#allocation2 + $0xd0] sm:$0xff] %vm909_vm2, %v5974_v41  ;;  %1448 = vst.msk [vmem:[#allocation3 + $0x18] sm:$0xff] %vm909_vm2, %v1399_v42  ;;  %v1162_v60 = vld [vmem:[#allocation2 + $0x96] sm:$0xf]  ;;  %v1304_v37 = vmax.f32 %v1207_v36, %v1256_v13  ;;  %v1397_v61 = vmax.f32 %v1300_v30, %v5982_v45  ;;  %v1398_v50 = vmax.f32 %v1301_v1, %v1350_v43 }
 0x11e   : > { %v6010_v55 = vld [vmem:[#allocation2 + $0xb6] sm:$0xf]  ;;  %v5363_v17 = vpop.eup %5362  ;;  %v1400_v35 = vmax.f32 %v1303_v7, %v6005_v9  ;;  %v1211_v36 = vmax.f32 %v1115_v27, %v5958_v10  ;;  %v1305_v13 = vmax.f32 %v5979_v28, %v5958_v10  ;;  %v8465_v1 = vmax.f32 %v5905_v21, %v5918_v6 }
 0x11f   : > { %v6012_v31 = vld [vmem:[#allocation2 + $0x96] sm:$0xf]  ;;  %v1401_v51 = vmax.f32 %v1304_v37, %v1353_v23  ;;  %v6023_v39 = vpop.f32.mrb[28].mxu0  ;;  %v8466_v43 = vmax.f32 %v5924_v14, %v5922_v12  ;;  %1445 = vst.msk [vmem:[#allocation3 + $0x8] sm:$0xff] %vm909_vm2, %v1397_v61  ;;  %v6039_v37 = vmul.f32 %v5363_v17, %v5804_v33  ;;  %v799_v23 = vadd.f32 1.0, %v5359_v32  ;;  %v5365_v28 = vpop.eup %5364 }
 0x120   : > { %v6029_v30 = vmax.f32 %v8465_v1, %v5982_v45  ;;  %1447 = vst.msk [vmem:[#allocation3 + $0x10] sm:$0xf] %vm1446_vm4, %v1398_v50  ;;  %v6041_v27 = vpop.f32.mrb[29].mxu0  ;;  %v1165_v7 = vld [vmem:[#allocation2 + $0xb6] sm:$0xf]  ;;  %v1212_v33 = vmax.f32 %v1116_v62, %v6005_v9  ;;  %v5367_v14 = vpop.eup %5366 }
 0x121   : > { %v6034_v42 = vmax.f32 %v8466_v43, %v1162_v60  ;;  %8467 = vst [vmem:[#allocation19_spill] sm:$0xff] %v6039_v37  ;;  %1449 = vst.msk [vmem:[#allocation3 + $0x20] sm:$0xff] %vm909_vm2, %v1400_v35  ;;  %v6049_v12 = vld [vmem:[#allocation2 + $0xc6] sm:$0xff]  ;;  %v6053_v50 = vpop.f32.mrb[30].mxu0  ;;  %v1213_v17 = vmax.f32 %v1117_v2, %v1165_v7  ;;  %v1259_v62 = vld [vmem:[#allocation2 + $0xb6] sm:$0xf]  ;;  %v6069_v1 = vmul.f32 %v5367_v14, %v5808_v40  ;;  %5374 = vrcp.f32 %v799_v23 }
 0x122   : > { %1450 = vst.msk [vmem:[#allocation3 + $0x28] sm:$0xf] %vm1446_vm4, %v1401_v51  ;;  %v1121_v32 = vmax.f32 %v5958_v10, %v6049_v12  ;;  %v6058_v60 = vmax.f32 %v1118_v11, %v6049_v12  ;;  %v1308_v61 = vmax.f32 %v1211_v36, %v6049_v12  ;;  %v6063_v35 = vpop.f32.mrb[31].mxu0  ;;  %v6065_v51 = vld [vmem:[#allocation2 + $0xe6] sm:$0xff]  ;;  %v1402_v53 = vmax.f32 %v1305_v13, %v6049_v12  ;;  %v5369_v11 = vpop.eup %5368 }
 0x123   : > { %974 = vst.msk [vmem:[#allocation2 + $0x128] sm:$0xff] %vm909_vm2, %v6039_v37  ;;  %8468 = vst [vmem:[#allocation20_spill] sm:$0xff] %v6069_v1  ;;  %v800_v10 = vadd.f32 1.0, %v5365_v28  ;;  %v1306_v2 = vmax.f32 %v6029_v30, %v6005_v9  ;;  %v1307_v36 = vmax.f32 %v6034_v42, %v1259_v62  ;;  %v797_v7 = vadd.f32 1.0, %v5361_v48  ;;  %v5371_v38 = vpop.eup %5370  ;;  %v1026_v42 = vld [vmem:[#allocation2 + $0xb6] sm:$0xf] }
 0x124   : > { %v1405_v43 = vmax.f32 %v1308_v61, %v6065_v51  ;;  %1451 = vst.msk [vmem:[#allocation3 + $0x30] sm:$0xff] %vm909_vm2, %v1402_v53  ;;  %v6076_v6 = vld [vmem:[#allocation2 + $0xce] sm:$0xff]  ;;  %v1075_v13 = vld [vmem:[#allocation2 + $0xd6] sm:$0xf]  ;;  %972 = vst.msk [vmem:[#allocation2 + $0x108] sm:$0xff] %vm909_vm2, %v6069_v1  ;;  %v6081_v40 = vmul.f32 %v5369_v11, %v5813_v44  ;;  %v6085_v23 = vadd.f32 %v5739_v24, %v5998_v4 }
 0x125   : > { %5376 = vrcp.f32 %v800_v10  ;;  %v6089_v48 = vadd.f32 %v5739_v24, %v6002_v57  ;;  %v1262_v28 = vld [vmem:[#allocation2 + $0xd6] sm:$0xf]  ;;  %v1217_v44 = vmax.f32 %v1121_v32, %v6065_v51  ;;  %v1311_v61 = vmax.f32 %v6058_v60, %v6065_v51  ;;  %v6099_v62 = vld [vmem:[#allocation2 + $0xee] sm:$0xff] }
 0x126   : > { %8469 = vst [vmem:[#allocation21_spill] sm:$0xff] %v6081_v40  ;;  %1454 = vst.msk [vmem:[#allocation3 + $0x48] sm:$0xff] %vm909_vm2, %v1405_v43  ;;  %v1356_v14 = vld [vmem:[#allocation2 + $0xd6] sm:$0xf]  ;;  %v635_v4 = vmul.f32 %v5734_v22, %v5933_v25  ;;  %v1122_v10 = vmax.f32 %v6005_v9, %v6076_v6  ;;  %v1123_v11 = vmax.f32 %v1026_v42, %v1075_v13  ;;  %5378 = vrcp.f32 %v797_v7  ;;  %v1653_v20 = vld [vmem:[#allocation3 + $0x3] sm:$0xff] }
 0x127   : > { %v6101_v57 = vld [vmem:[#allocation2 + $0xf6] sm:$0xf]  ;;  %v1309_v43 = vmax.f32 %v1212_v33, %v6076_v6  ;;  %v1310_v30 = vmax.f32 %v1213_v17, %v1262_v28  ;;  %975 = vst.msk [vmem:[#allocation2 + $0x130] sm:$0xff] %vm909_vm2, %v6081_v40  ;;  %v1403_v25 = vmax.f32 %v1306_v2, %v6076_v6  ;;  %v1404_v21 = vmax.f32 %v1307_v36, %v1356_v14 }
 0x128   : > { %v6103_v53 = vld [vmem:[#allocation2 + $0xd6] sm:$0xf]  ;;  %v6114_v16 = vmul.f32 %v5371_v38, %v5817_v49  ;;  %v640_v33 = vmul.f32 %v5947_v58, %v5734_v22  ;;  %v1125_v17 = vmax.f32 %v6076_v6, %v6099_v62  ;;  %5380 = vpow2.f32 %v5994_v46  ;;  %v5373_v38 = vpop.eup %5372 }
 0x129   : > { %v1359_v32 = vld [vmem:[#allocation2 + $0xf6] sm:$0xf]  ;;  %v1406_v3 = vmax.f32 %v1309_v43, %v6099_v62  ;;  %v1126_v2 = vmax.f32 %v6103_v53, %v6101_v57  ;;  %1452 = vst.msk [vmem:[#allocation3 + $0x38] sm:$0xff] %vm909_vm2, %v1403_v25  ;;  %v8471_v36 = vmax.f32 %v5982_v45, %v6005_v9  ;;  %v8472_v42 = vmax.f32 %v6012_v31, %v6010_v55 }
 0x12a   : > { %v1168_v60 = vld [vmem:[#allocation2 + $0xd6] sm:$0xf]  ;;  %8470 = vst [vmem:[#allocation22_spill] sm:$0xff] %v6114_v16  ;;  %v1407_v13 = vmax.f32 %v1310_v30, %v1359_v32  ;;  %1453 = vst.msk [vmem:[#allocation3 + $0x40] sm:$0xf] %vm1446_vm4, %v1404_v21  ;;  %v1218_v21 = vmax.f32 %v1122_v10, %v6099_v62  ;;  %v798_v43 = vadd.f32 1.0, %v5373_v38  ;;  %v6145_v45 = vadd.f32 %v5739_v24, %v635_v4 }
 0x12b   : > { %973 = vst.msk [vmem:[#allocation2 + $0x110] sm:$0xff] %vm909_vm2, %v6114_v16  ;;  %v1171_v58 = vld [vmem:[#allocation2 + $0xf6] sm:$0xf]  ;;  %v1215_v7 = vmax.f32 %v8471_v36, %v6076_v6  ;;  %v1216_v30 = vmax.f32 %v8472_v42, %v1168_v60  ;;  %1455 = vst.msk [vmem:[#allocation3 + $0x50] sm:$0xff] %vm909_vm2, %v1406_v3  ;;  %v4801_v28 = vmul.f32 -1.442695, %v6085_v23  ;;  %v5375_v9 = vpop.eup %5374  ;;  %v6149_v55 = vadd.f32 %v5739_v24, %v640_v33 }
 0x12c   : > { %1456 = vst.msk [vmem:[#allocation3 + $0x58] sm:$0xf] %vm1446_vm4, %v1407_v13  ;;  %v6141_v46 = vld [vmem:[#allocation2 + $0x106] sm:$0xff]  ;;  %v1219_v14 = vmax.f32 %v1123_v11, %v1171_v58  ;;  %v4804_v32 = vmul.f32 -1.442695, %v6089_v48  ;;  %v638_v3 = vmul.f32 %v5734_v22, %v5956_v0  ;;  %v641_v10 = vmul.f32 %v5965_v5, %v5734_v22 }
 0x12d   : > { %v1314_v31 = vmax.f32 %v1217_v44, %v6141_v46  ;;  %v1265_v60 = vld [vmem:[#allocation2 + $0xf6] sm:$0xf]  ;;  %v6155_v11 = vld [vmem:[#allocation2 + $0x126] sm:$0xff]  ;;  %v1408_v25 = vmax.f32 %v1311_v61, %v6141_v46  ;;  %v6159_v4 = vmul.f32 %v5375_v9, %v5852_v19  ;;  %5382 = vrcp.f32 %v798_v43 }
 0x12e   : > { %v639_v44 = vmul.f32 %v5734_v22, %v5984_v8  ;;  %v1312_v0 = vmax.f32 %v1215_v7, %v6099_v62  ;;  %v1313_v38 = vmax.f32 %v1216_v30, %v1265_v60  ;;  %5384 = vpow2.f32 %v4801_v28 }
 0x12f   : > { %v5377_v13 = vpop.eup %5376  ;;  %v1411_v33 = vmax.f32 %v1314_v31, %v6155_v11  ;;  %v1127_v5 = vmax.f32 %v6065_v51, %v6141_v46  ;;  %1457 = vst.msk [vmem:[#allocation3 + $0x60] sm:$0xff] %vm909_vm2, %v1408_v25  ;;  %978 = vst.msk [vmem:[#allocation2 + $0x168] sm:$0xff] %vm909_vm2, %v6159_v4  ;;  %5386 = vpow2.f32 %v4804_v32  ;;  %v4802_v8 = vmul.f32 -1.442695, %v6145_v45 }
 0x130   : > { %v6171_v19 = vmul.f32 %v5377_v13, %v5864_v26  ;;  %v8473_v58 = vmax.f32 %v6049_v12, %v6065_v51  ;;  %v4807_v42 = vmul.f32 -1.442695, %v6149_v55  ;;  %v6187_v26 = vadd.f32 %v5739_v24, %v638_v3  ;;  %v5379_v31 = vpop.eup %5378 }
 0x131   : > { %1460 = vst.msk [vmem:[#allocation3 + $0x78] sm:$0xff] %vm909_vm2, %v1411_v33  ;;  %v6192_v43 = vadd.f32 %v5739_v24, %v641_v10  ;;  %v6195_v12 = vadd.f32 %v5739_v24, %v639_v44  ;;  %v644_v32 = vmul.f32 %v6023_v39, %v5734_v22  ;;  %v642_v9 = vmul.f32 %v5734_v22, %v6041_v27  ;;  %v1032_v33 = vld [vmem:[#allocation2 + $0xf6] sm:$0xf]  ;;  %v6206_v44 = vld [vmem:[#allocation2 + $0x12e] sm:$0xff] }
 0x132   : > { %v6180_v36 = vmax.f32 %v8473_v58, %v6141_v46  ;;  %v6183_v7 = vld [vmem:[#allocation2 + $0x10e] sm:$0xff]  ;;  %v1268_v30 = vld [vmem:[#allocation2 + $0x116] sm:$0xf]  ;;  %979 = vst.msk [vmem:[#allocation2 + $0x170] sm:$0xff] %vm909_vm2, %v6171_v19  ;;  %v645_v25 = vmul.f32 %v6053_v50, %v5734_v22  ;;  %v643_v10 = vmul.f32 %v5734_v22, %v6063_v35  ;;  %v5381_v13 = vpop.eup %5380  ;;  %v1001_v27 = vpack.c.bf16 %v6171_v19, %v6159_v4  ;;  %v1594_v19 = vld [vmem:[#allocation3 + $0x3a] sm:$0xff] }
 0x133   : > { %v1362_v28 = vld [vmem:[#allocation2 + $0x116] sm:$0xf]  ;;  %v1315_v3 = vmax.f32 %v1218_v21, %v6183_v7  ;;  %v1316_v60 = vmax.f32 %v1219_v14, %v1268_v30  ;;  %v1409_v39 = vmax.f32 %v1312_v0, %v6183_v7  ;;  %5388 = vpow2.f32 %v4802_v8 }
 0x134   : > { %v1365_v58 = vld [vmem:[#allocation2 + $0x136] sm:$0xf]  ;;  %v1410_v49 = vmax.f32 %v1313_v38, %v1362_v28  ;;  %v803_v35 = vadd.f32 1.0, %v5381_v13  ;;  %5390 = vpow2.f32 %v4807_v42  ;;  %v4805_v0 = vmul.f32 -1.442695, %v6187_v26 }
 0x135   : > { %v1081_v54 = vld [vmem:[#allocation2 + $0x116] sm:$0xf]  ;;  %v1412_v50 = vmax.f32 %v1315_v3, %v6206_v44  ;;  %v1413_v22 = vmax.f32 %v1316_v60, %v1365_v58  ;;  %1458 = vst.msk [vmem:[#allocation3 + $0x68] sm:$0xff] %vm909_vm2, %v1409_v39  ;;  %v4808_v38 = vmul.f32 -1.442695, %v6192_v43  ;;  %v6222_v8 = vadd.f32 %v5739_v24, %v644_v32 }
 0x136   : > { %v6211_v21 = vld [vmem:[#allocation2 + $0x136] sm:$0xf]  ;;  %1459 = vst.msk [vmem:[#allocation3 + $0x70] sm:$0xf] %vm1446_vm4, %v1410_v49  ;;  %v4806_v30 = vmul.f32 -1.442695, %v6195_v12  ;;  %v1128_v28 = vmax.f32 %v6099_v62, %v6183_v7  ;;  %v1129_v3 = vmax.f32 %v1032_v33, %v1081_v54  ;;  %5392 = vrcp.f32 %v803_v35 }
 0x137   : > { %v6213_v14 = vld [vmem:[#allocation2 + $0x116] sm:$0xf]  ;;  %1462 = vst.msk [vmem:[#allocation3 + $0x88] sm:$0xf] %vm1446_vm4, %v1413_v22  ;;  %v6229_v49 = vadd.f32 %v5739_v24, %v642_v9  ;;  %v5383_v42 = vpop.eup %5382  ;;  %5394 = vpow2.f32 %v4805_v0  ;;  %v4811_v13 = vmul.f32 -1.442695, %v6222_v8  ;;  %v6233_v32 = vadd.f32 %v5739_v24, %v645_v25 }
 0x138   : > { %v1174_v60 = vld [vmem:[#allocation2 + $0x116] sm:$0xf]  ;;  %1461 = vst.msk [vmem:[#allocation3 + $0x80] sm:$0xff] %vm909_vm2, %v1412_v50  ;;  %v893_v58 = vmul.f32 %v5379_v31, %v5858_v15  ;;  %v5385_v39 = vpop.eup %5384  ;;  %5396 = vpow2.f32 %v4808_v38  ;;  %v894_v9 = vmul.f32 %v5383_v42, %v5870_v34  ;;  %v6245_v25 = vmax.f32 %v1125_v17, %v6183_v7 }
 0x139   : > { %v5387_v50 = vpop.eup %5386  ;;  %v1177_v22 = vld [vmem:[#allocation2 + $0x136] sm:$0xf]  ;;  %v6250_v15 = vmax.f32 %v1126_v2, %v1174_v60  ;;  %5398 = vpow2.f32 %v4806_v30  ;;  %v6253_v31 = vadd.f32 %v5739_v24, %v643_v10  ;;  %v801_v0 = vadd.f32 1.0, %v5385_v39  ;;  %v1531_v30 = vld [vmem:[#allocation3 + $0x49] sm:$0xff] }
 0x13a   : > { %976 = vst.msk [vmem:[#allocation2 + $0x148] sm:$0xff] %vm909_vm2, %v893_v58  ;;  %v1497_v34 = vld [vmem:[#allocation3 + $0x30] sm:$0xff]  ;;  %v804_v38 = vadd.f32 1.0, %v5387_v50  ;;  %5400 = vpow2.f32 %v4811_v13  ;;  %v4809_v6 = vmul.f32 -1.442695, %v6229_v49  ;;  %977 = vst.msk [vmem:[#allocation2 + $0x150] sm:$0xff] %vm909_vm2, %v894_v9  ;;  %v1000_v53 = vpack.c.bf16 %v894_v9, %v893_v58 }
 0x13b   : > { %v1529_v35 = vld [vmem:[#allocation3 + $0x31] sm:$0xff]  ;;  %v1530_v17 = vld [vmem:[#allocation3 + $0x39] sm:$0xff]  ;;  %v4812_v57 = vmul.f32 -1.442695, %v6233_v32  ;;  %v6263_v24 = vmax.f32 %v1127_v5, %v6155_v11  ;;  %v6266_v2 = vmax.f32 %v1128_v28, %v6206_v44  ;;  %5402 = vrcp.f32 %v801_v0  ;;  %v1499_v28 = vld [vmem:[#allocation3 + $0x48] sm:$0xff] }
 0x13c   : > { %v1498_v62 = vld [vmem:[#allocation3 + $0x38] sm:$0xff]  ;;  %v1500_v10 = vld [vmem:[#allocation3 + $0x50] sm:$0xff]  ;;  %v6268_v42 = vmax.f32 %v1129_v3, %v1177_v22  ;;  %v1502_v39 = vld [vmem:[#allocation3 + $0x68] sm:$0xff]  ;;  %v1561_v50 = vmax.f32 %v1497_v34, %v1529_v35  ;;  %5404 = vrcp.f32 %v804_v38  ;;  %v4810_v51 = vmul.f32 -1.442695, %v6253_v31  ;;  %5089 = vmatprep.mubr.msk.bf16.mxu1 %vm909_vm2, %v1000_v53 }
 0x13d   : > { %v1532_v60 = vld [vmem:[#allocation3 + $0x51] sm:$0xff]  ;;  %v1533_v58 = vld [vmem:[#allocation3 + $0x61] sm:$0xff]  ;;  %v1534_v9 = vld [vmem:[#allocation3 + $0x69] sm:$0xff]  ;;  %v5389_v33 = vpop.eup %5388  ;;  %v1562_v0 = vmax.f32 %v1498_v62, %v1530_v17  ;;  %5406 = vpow2.f32 %v4809_v6  ;;  %v1563_v35 = vmax.f32 %v1499_v28, %v1531_v30  ;;  %5090 = vmatmul.mubr.msk.bf16.vlgmr.msra.gmra.mrb[0].mxu1 %vm909_vm2, %v1001_v27 }
 0x13e   : > { %v5391_v3 = vpop.eup %5390  ;;  %v802_v22 = vadd.f32 1.0, %v5389_v33  ;;  %v1501_v13 = vld [vmem:[#allocation3 + $0x60] sm:$0xff]  ;;  %v1564_v38 = vmax.f32 %v1500_v10, %v1532_v60  ;;  %v6286_v5 = vld [vmem:[#allocation2 + $0x136] sm:$0xf]  ;;  %5408 = vpow2.f32 %v4812_v57  ;;  %v1566_v6 = vmax.f32 %v1502_v39, %v1534_v9  ;;  %v1595_v27 = vld [vmem:[#allocation3 + $0x4a] sm:$0xff] }
 0x13f   : > { %v6275_v54 = vld [vmem:[#allocation3 + $0x79] sm:$0xff]  ;;  %v6280_v34 = vld [vmem:[#allocation3 + $0x81] sm:$0xff]  ;;  %v807_v62 = vadd.f32 1.0, %v5391_v3  ;;  %v1565_v33 = vmax.f32 %v1501_v13, %v1533_v58  ;;  %v1319_v10 = vmax.f32 %v6250_v15, %v6286_v5  ;;  %v6305_v15 = vmax.f32 %v1562_v0, %v1594_v19 }
 0x140   : > { %v6278_v61 = vld [vmem:[#allocation3 + $0x80] sm:$0xff]  ;;  %v6288_v17 = vld [vmem:[#allocation3 + $0x78] sm:$0xff]  ;;  %v5393_v37 = vpop.eup %5392  ;;  %5410 = vrcp.f32 %v802_v22  ;;  %v1598_v22 = vld [vmem:[#allocation3 + $0x6a] sm:$0xff] }
 0x141   : > { %v1593_v53 = vld [vmem:[#allocation3 + $0x32] sm:$0xff]  ;;  %v6290_v40 = vld [vmem:[#allocation2 + $0x146] sm:$0xff]  ;;  %v5395_v57 = vpop.eup %5394  ;;  %v6301_v13 = vmul.f32 %v5393_v37, %v5931_v18  ;;  %5412 = vrcp.f32 %v807_v62 }
 0x142   : > { %v6296_v30 = vmax.f32 %v1561_v50, %v1593_v53  ;;  %v6298_v60 = vld [vmem:[#allocation2 + $0x166] sm:$0xff]  ;;  %v1596_v58 = vld [vmem:[#allocation3 + $0x52] sm:$0xff]  ;;  %v5397_v5 = vpop.eup %5396  ;;  %v805_v28 = vadd.f32 1.0, %v5395_v57  ;;  %5414 = vpow2.f32 %v4810_v51  ;;  %v6311_v53 = vmax.f32 %v1563_v35, %v1595_v27 }
 0x143   : > { %v1597_v9 = vld [vmem:[#allocation3 + $0x62] sm:$0xff]  ;;  %v6307_v3 = vld [vmem:[#allocation2 + $0x14e] sm:$0xff]  ;;  %v6309_v50 = vld [vmem:[#allocation2 + $0x156] sm:$0xf]  ;;  %v6313_v18 = vmax.f32 %v1564_v38, %v1596_v58  ;;  %v5399_v37 = vpop.eup %5398  ;;  %982 = vst.msk [vmem:[#allocation2 + $0x1a8] sm:$0xff] %vm909_vm2, %v6301_v13  ;;  %v808_v0 = vadd.f32 1.0, %v5397_v5  ;;  %v1133_v19 = vmax.f32 %v6155_v11, %v6290_v40  ;;  %v6323_v57 = vmax.f32 %v1566_v6, %v1598_v22 }
 0x144   : > { %v6315_v62 = vld [vmem:[#allocation2 + $0x16e] sm:$0xff]  ;;  %v6321_v51 = vmax.f32 %v1565_v33, %v1597_v9  ;;  %v5401_v39 = vpop.eup %5400  ;;  %v6325_v4 = vld [vmem:[#allocation2 + $0x136] sm:$0xf]  ;;  %5416 = vrcp.f32 %v805_v28  ;;  %v806_v35 = vadd.f32 1.0, %v5399_v37  ;;  %v8474_v27 = vmax.f32 %v6141_v46, %v6155_v11  ;;  %v1600_v16 = vld [vmem:[#allocation3 + $0x82] sm:$0xff] }
 0x145   : > { %v1274_v5 = vld [vmem:[#allocation2 + $0x156] sm:$0xf]  ;;  %5418 = vrcp.f32 %v808_v0  ;;  %v811_v33 = vadd.f32 1.0, %v5401_v39  ;;  %v5403_v28 = vpop.eup %5402  ;;  %v1320_v37 = vmax.f32 %v6263_v24, %v6290_v40  ;;  %v1321_v46 = vmax.f32 %v6266_v2, %v6307_v3  ;;  %v6348_v39 = vld [vmem:[%s8365_s4 + $0x2] sm:$0x1] }
 0x146   : > { %v6333_v58 = vmax.f32 %v8474_v27, %v6290_v40  ;;  %5420 = vrcp.f32 %v806_v35  ;;  %v1368_v27 = vld [vmem:[#allocation2 + $0x156] sm:$0xf]  ;;  %v5405_v0 = vpop.eup %5404  ;;  %v6351_v9 = vmul.f32 %v5403_v28, %v6085_v23  ;;  %v8475_v35 = vmax.f32 %v6183_v7, %v6206_v44  ;;  %5275 = vmatprep.subr.msk.bf16.mxu1 %vm1847_vm3, %v6348_v39 }
 0x147   : > { %5422 = vrcp.f32 %v811_v33  ;;  %v1322_v24 = vmax.f32 %v6268_v42, %v1274_v5  ;;  %v5407_v2 = vpop.eup %5406  ;;  %v6363_v6 = vmul.f32 %v5405_v0, %v6089_v48  ;;  %v6366_v38 = vmax.f32 %v1133_v19, %v6298_v60  ;;  %v1371_v42 = vld [vmem:[#allocation2 + $0x176] sm:$0xf] }
 0x148   : > { %v6357_v22 = vmax.f32 %v8475_v35, %v6307_v3  ;;  %v8476_v7 = vmax.f32 %v6180_v36, %v6155_v11  ;;  %v5409_v28 = vpop.eup %5408  ;;  %980 = vst.msk [vmem:[#allocation2 + $0x188] sm:$0xff] %vm909_vm2, %v6351_v9  ;;  %v809_v5 = vadd.f32 1.0, %v5407_v2  ;;  %v8477_v48 = vmax.f32 %v6245_v25, %v6206_v44  ;;  %v1599_v2 = vld [vmem:[#allocation3 + $0x7a] sm:$0xff] }
 0x149   : > { %v1416_v0 = vmax.f32 %v1319_v10, %v1368_v27  ;;  %v1417_v35 = vmax.f32 %v1320_v37, %v6298_v60  ;;  %983 = vst.msk [vmem:[#allocation2 + $0x1b0] sm:$0xff] %vm909_vm2, %v6363_v6  ;;  %v1003_v11 = vpack.c.bf16 %v6363_v6, %v6301_v13  ;;  %v812_v36 = vadd.f32 1.0, %v5409_v28  ;;  %v1657_v27 = vld [vmem:[#allocation3 + $0x33] sm:$0xff] }
 0x14a   : > { %v1414_v33 = vmax.f32 %v8476_v7, %v6290_v40  ;;  %v1415_v19 = vmax.f32 %v8477_v48, %v6307_v3  ;;  %v5411_v23 = vpop.eup %5410  ;;  %v1418_v7 = vmax.f32 %v1321_v46, %v6315_v62  ;;  %v1419_v1 = vmax.f32 %v1322_v24, %v1371_v42  ;;  %v1658_v24 = vld [vmem:[#allocation3 + $0x3b] sm:$0xff]  ;;  %v1662_v42 = vld [vmem:[#allocation3 + $0x6b] sm:$0xff] }
 0x14b   : > { %v5413_v25 = vpop.eup %5412  ;;  %v898_v10 = vmul.f32 %v5411_v23, %v6145_v45  ;;  %5424 = vrcp.f32 %v809_v5  ;;  %1465 = vst.msk [vmem:[#allocation3 + $0xa0] sm:$0xf] %vm1446_vm4, %v1416_v0  ;;  %v8478_v13 = vmax.f32 %v6288_v17, %v6275_v54  ;;  %v8479_v37 = vmax.f32 %v6278_v61, %v6280_v34  ;;  %v1660_v54 = vld [vmem:[#allocation3 + $0x53] sm:$0xff]  ;;  %v1661_v17 = vld [vmem:[#allocation3 + $0x63] sm:$0xff] }
 0x14c   : > { %1463 = vst.msk [vmem:[#allocation3 + $0x90] sm:$0xff] %vm909_vm2, %v1414_v33  ;;  %1464 = vst.msk [vmem:[#allocation3 + $0x98] sm:$0xff] %vm909_vm2, %v1415_v19  ;;  %v5415_v45 = vpop.eup %5414  ;;  %v6402_v23 = vmul.f32 %v5413_v25, %v6149_v55  ;;  %5426 = vrcp.f32 %v812_v36  ;;  %v1659_v33 = vld [vmem:[#allocation3 + $0x4b] sm:$0xff]  ;;  %v1689_v28 = vmax.f32 %v6296_v30, %v1657_v27  ;;  %v1690_v61 = vmax.f32 %v6305_v15, %v1658_v24  ;;  %v6410_v55 = vld [vmem:[#allocation3 + $0x7b] sm:$0xff] }
 0x14d   : > { %1466 = vst.msk [vmem:[#allocation3 + $0xa8] sm:$0xff] %vm909_vm2, %v1417_v35  ;;  %v6394_v6 = vmax.f32 %v8478_v13, %v1599_v2  ;;  %v6399_v46 = vmax.f32 %v8479_v37, %v1600_v16  ;;  %1467 = vst.msk [vmem:[#allocation3 + $0xb0] sm:$0xff] %vm909_vm2, %v1418_v7  ;;  %v1002_v16 = vpack.c.bf16 %v898_v10, %v6351_v9  ;;  %v810_v34 = vadd.f32 1.0, %v5415_v45  ;;  %v6412_v5 = vld [vmem:[#allocation3 + $0x83] sm:$0xff]  ;;  %v1180_v30 = vld [vmem:[#allocation2 + $0x156] sm:$0xf] }
 0x14e   : > { %1468 = vst.msk [vmem:[#allocation3 + $0xb8] sm:$0xf] %vm1446_vm4, %v1419_v1  ;;  %v1691_v48 = vmax.f32 %v6311_v53, %v1659_v33  ;;  %v1692_v1 = vmax.f32 %v6313_v18, %v1660_v54  ;;  %v5417_v19 = vpop.eup %5416  ;;  %v1693_v15 = vmax.f32 %v6321_v51, %v1661_v17  ;;  %v1694_v0 = vmax.f32 %v6323_v57, %v1662_v42  ;;  %v1721_v36 = vld [vmem:[#allocation3 + $0x34] sm:$0xff]  ;;  %v1722_v7 = vld [vmem:[#allocation3 + $0x3c] sm:$0xff]  ;;  %v1723_v2 = vld [vmem:[#allocation3 + $0x4c] sm:$0xff] }
 0x14f   : > { %981 = vst.msk [vmem:[#allocation2 + $0x190] sm:$0xff] %vm909_vm2, %v898_v10  ;;  %986 = vst.msk [vmem:[#allocation2 + $0x1e8] sm:$0xff] %vm909_vm2, %v6402_v23  ;;  %v1695_v9 = vmax.f32 %v6394_v6, %v6410_v55  ;;  %v1696_v35 = vmax.f32 %v6399_v46, %v6412_v5  ;;  %v5419_v53 = vpop.eup %5418  ;;  %v6425_v18 = vmul.f32 %v5417_v19, %v6187_v26  ;;  %5428 = vrcp.f32 %v810_v34  ;;  %v1724_v25 = vld [vmem:[#allocation3 + $0x54] sm:$0xff]  ;;  %v1725_v10 = vld [vmem:[#allocation3 + $0x64] sm:$0xff] }
 0x150   : > { %v6427_v13 = vmax.f32 %v1689_v28, %v1721_v36  ;;  %v6429_v51 = vmax.f32 %v1690_v61, %v1722_v7  ;;  %5093 = vmatprep.mubr.msk.bf16.mxu1 %vm909_vm2, %v1002_v16  ;;  %v5421_v57 = vpop.eup %5420  ;;  %v6432_v6 = vld [vmem:[#allocation2 + $0x176] sm:$0xf]  ;;  %v6434_v37 = vld [vmem:[#allocation2 + $0x186] sm:$0xff]  ;;  %v6437_v46 = vmul.f32 %v5419_v53, %v6192_v43  ;;  %v6441_v27 = vmax.f32 %v1691_v48, %v1723_v2  ;;  %v1727_v5 = vld [vmem:[#allocation3 + $0x7c] sm:$0xff] }
 0x151   : > { %v6439_v26 = vld [vmem:[#allocation2 + $0x156] sm:$0xf]  ;;  %v6443_v24 = vmax.f32 %v1692_v1, %v1724_v25  ;;  %v6445_v45 = vmax.f32 %v1693_v15, %v1725_v10  ;;  %5094 = vmatmul.mubr.msk.bf16.gmra.mrb[4].mxu1 %vm909_vm2, %v1003_v11  ;;  %v5423_v33 = vpop.eup %5422  ;;  %v1139_v54 = vmax.f32 %v6298_v60, %v6434_v37  ;;  %984 = vst.msk [vmem:[#allocation2 + $0x1c8] sm:$0xff] %vm909_vm2, %v6425_v18  ;;  %v6468_v34 = vld [vmem:[#allocation2 + $0x1a6] sm:$0xff]  ;;  %v6499_v19 = vld [vmem:[#allocation2 + $0x1ae] sm:$0xff] }
 0x152   : > { %8480 = vst [vmem:[#allocation23_spill] sm:$0xff] %v6427_v13  ;;  %8481 = vst [vmem:[#allocation24_spill] sm:$0xff] %v6429_v51  ;;  %v902_v43 = vmul.f32 %v5421_v57, %v6195_v12  ;;  %v8485_v17 = vmax.f32 %v6213_v14, %v6211_v21  ;;  %v8486_v61 = vmax.f32 %v6290_v40, %v6298_v60  ;;  %v1183_v11 = vld [vmem:[#allocation2 + $0x176] sm:$0xf]  ;;  %v1726_v55 = vld [vmem:[#allocation3 + $0x6c] sm:$0xff] }
 0x153   : > { %8482 = vst [vmem:[#allocation25_spill] sm:$0xff] %v6441_v27  ;;  %8483 = vst [vmem:[#allocation26_spill] sm:$0xff] %v6443_v24  ;;  %v1005_v12 = vpack.c.bf16 %v6437_v46, %v6402_v23  ;;  %v6475_v21 = vmul.f32 %v5423_v33, %v6222_v8  ;;  %v1326_v40 = vmax.f32 %v6366_v38, %v6434_v37  ;;  %v1277_v8 = vld [vmem:[#allocation2 + $0x176] sm:$0xf]  ;;  %v1728_v48 = vld [vmem:[#allocation3 + $0x84] sm:$0xff] }
 0x154   : > { %8484 = vst [vmem:[#allocation27_spill] sm:$0xff] %v6445_v45  ;;  %v6456_v28 = vmax.f32 %v8485_v17, %v1180_v30  ;;  %v6462_v16 = vmax.f32 %v8486_v61, %v6434_v37  ;;  %2228 = vst.msk [vmem:[#allocation2 + $0x88] sm:$0xff] %vm909_vm2, %v6427_v13  ;;  %v8487_v14 = vmax.f32 %v6333_v58, %v6298_v60 }
 0x155   : > { %2229 = vst.msk [vmem:[#allocation2 + $0x90] sm:$0xff] %vm909_vm2, %v6429_v51  ;;  %987 = vst.msk [vmem:[#allocation2 + $0x1f0] sm:$0xff] %vm909_vm2, %v6437_v46  ;;  %v1004_v38 = vpack.c.bf16 %v902_v43, %v6425_v18  ;;  %v1138_v23 = vmax.f32 %v6439_v26, %v6432_v6  ;;  %v8488_v60 = vmax.f32 %v6206_v44, %v6307_v3  ;;  %v5425_v18 = vpop.eup %5424  ;;  %v6523_v46 = vld [vmem:[#allocation2 + $0x1b6] sm:$0xf] }
 0x156   : > { %v1420_v42 = vmax.f32 %v8487_v14, %v6434_v37  ;;  %2230 = vst.msk [vmem:[#allocation2 + $0xa8] sm:$0xff] %vm909_vm2, %v6441_v27  ;;  %2231 = vst.msk [vmem:[#allocation2 + $0xb0] sm:$0xff] %vm909_vm2, %v6443_v24  ;;  %v6497_v1 = vmax.f32 %v1694_v0, %v1726_v55  ;;  %v6501_v30 = vld [vmem:[#allocation2 + $0x18e] sm:$0xff]  ;;  %v1093_v15 = vld [vmem:[#allocation2 + $0x196] sm:$0xf]  ;;  %v8490_v36 = vmax.f32 %v6325_v4, %v6309_v50 }
 0x157   : > { %2232 = vst.msk [vmem:[#allocation2 + $0xc8] sm:$0xff] %vm909_vm2, %v6445_v45  ;;  %985 = vst.msk [vmem:[#allocation2 + $0x1d0] sm:$0xff] %vm909_vm2, %v902_v43  ;;  %v1230_v58 = vmax.f32 %v8488_v60, %v6315_v62  ;;  %v1423_v53 = vmax.f32 %v1326_v40, %v6468_v34  ;;  %v6510_v44 = vmax.f32 %v1695_v9, %v1727_v5  ;;  %v1186_v25 = vld [vmem:[#allocation2 + $0x196] sm:$0xf]  ;;  %5097 = vmatprep.mubr.msk.bf16.mxu1 %vm909_vm2, %v1004_v38  ;;  %v5427_v9 = vpop.eup %5426  ;;  %v6559_v38 = vld [vmem:[#allocation2 + $0x1e6] sm:$0xff] }
 0x158   : > { %8489 = vst [vmem:[#allocation28_spill] sm:$0xff] %v6497_v1  ;;  %990 = vst.msk [vmem:[#allocation2 + $0x228] sm:$0xff] %vm909_vm2, %v6475_v21  ;;  %v1231_v7 = vmax.f32 %v8490_v36, %v1183_v11  ;;  %v6512_v0 = vmax.f32 %v1696_v35, %v1728_v48  ;;  %v1142_v2 = vmax.f32 %v6434_v37, %v6468_v34  ;;  %v1280_v10 = vld [vmem:[#allocation2 + $0x196] sm:$0xf]  ;;  %v6545_v61 = vld [vmem:[#allocation2 + $0x1c6] sm:$0xff] }
 0x159   : > { %1469 = vst.msk [vmem:[#allocation3 + $0xc0] sm:$0xff] %vm909_vm2, %v1420_v42  ;;  %8491 = vst [vmem:[#allocation29_spill] sm:$0xff] %v6510_v44  ;;  %v1374_v57 = vld [vmem:[#allocation2 + $0x196] sm:$0xf]  ;;  %v1235_v6 = vmax.f32 %v1139_v54, %v6468_v34  ;;  %v1324_v4 = vmax.f32 %v6357_v22, %v6315_v62  ;;  %v1325_v50 = vmax.f32 %v6456_v28, %v1277_v8  ;;  %5098 = vmatmul.mubr.msk.bf16.gmra.mrb[8].mxu1 %vm909_vm2, %v1005_v12 }
 0x15a   : > { %8492 = vst [vmem:[#allocation30_spill] sm:$0xff] %v6512_v0  ;;  %2233 = vst.msk [vmem:[#allocation2 + $0xd0] sm:$0xff] %vm909_vm2, %v6497_v1  ;;  %v1044_v35 = vld [vmem:[#allocation2 + $0x176] sm:$0xf]  ;;  %v1140_v26 = vmax.f32 %v6315_v62, %v6501_v30  ;;  %v6530_v33 = vmul.f32 %v5425_v18, %v6229_v49  ;;  %v1327_v22 = vmax.f32 %v1230_v58, %v6501_v30 }
 0x15b   : > { %v6525_v37 = vld [vmem:[#allocation2 + $0x196] sm:$0xf]  ;;  %v1329_v54 = vmax.f32 %v6462_v16, %v6468_v34  ;;  %1472 = vst.msk [vmem:[#allocation3 + $0xd8] sm:$0xff] %vm909_vm2, %v1423_v53  ;;  %2234 = vst.msk [vmem:[#allocation2 + $0xe8] sm:$0xff] %vm909_vm2, %v6510_v44  ;;  %v1141_v43 = vmax.f32 %v1044_v35, %v1093_v15  ;;  %v1143_v17 = vmax.f32 %v6501_v30, %v6499_v19 }
 0x15c   : > { %2235 = vst.msk [vmem:[#allocation2 + $0xf0] sm:$0xff] %vm909_vm2, %v6512_v0  ;;  %v6543_v49 = vmul.f32 %v5427_v9, %v6233_v32  ;;  %v1328_v28 = vmax.f32 %v1231_v7, %v1280_v10  ;;  %988 = vst.msk [vmem:[#allocation2 + $0x208] sm:$0xff] %vm909_vm2, %v6530_v33  ;;  %v8493_v16 = vmax.f32 %v6307_v3, %v6315_v62  ;;  %v5429_v32 = vpop.eup %5428  ;;  %v1377_v55 = vld [vmem:[#allocation2 + $0x1b6] sm:$0xf]  ;;  %v6576_v15 = vld [vmem:[#allocation2 + $0x1ee] sm:$0xff] }
 0x15d   : > { %v6553_v40 = vmax.f32 %v1138_v23, %v1186_v25  ;;  %v1421_v14 = vmax.f32 %v1324_v4, %v6501_v30  ;;  %v1422_v42 = vmax.f32 %v1325_v50, %v1374_v57  ;;  %v1144_v8 = vmax.f32 %v6525_v37, %v6523_v46  ;;  %v1189_v23 = vld [vmem:[#allocation2 + $0x1b6] sm:$0xf]  ;;  %8494 = vst [vmem:[#allocation31_spill] sm:$0xff] %v6576_v15 }
 0x15e   : > { %v1233_v11 = vmax.f32 %v8493_v16, %v6501_v30  ;;  %v1145_v60 = vmax.f32 %v6468_v34, %v6545_v61  ;;  %v1238_v3 = vmax.f32 %v1142_v2, %v6545_v61  ;;  %v1332_v62 = vmax.f32 %v1235_v6, %v6545_v61  ;;  %991 = vst.msk [vmem:[#allocation2 + $0x230] sm:$0xff] %vm909_vm2, %v6543_v49  ;;  %v6567_v58 = vld [vmem:[#allocation2 + $0x1b6] sm:$0xf]  ;;  %v6578_v36 = vld [vmem:[#allocation2 + $0x1ce] sm:$0xff] }
 0x15f   : > { %v1007_v12 = vpack.c.bf16 %v6543_v49, %v6475_v21  ;;  %v906_v5 = vmul.f32 %v5429_v32, %v6253_v31  ;;  %v1424_v48 = vmax.f32 %v1327_v22, %v6499_v19  ;;  %v1425_v30 = vmax.f32 %v1328_v28, %v1377_v55  ;;  %1470 = vst.msk [vmem:[#allocation3 + $0xc8] sm:$0xff] %vm909_vm2, %v1421_v14  ;;  %v1099_v7 = vld [vmem:[#allocation2 + $0x1d6] sm:$0xf] }
 0x160   : > { %1471 = vst.msk [vmem:[#allocation3 + $0xd0] sm:$0xf] %vm1446_vm4, %v1422_v42  ;;  %v1429_v34 = vmax.f32 %v1332_v62, %v6559_v38  ;;  %v1236_v53 = vmax.f32 %v1140_v26, %v6499_v19  ;;  %v1237_v18 = vmax.f32 %v1141_v43, %v1189_v23  ;;  %v1426_v2 = vmax.f32 %v1329_v54, %v6545_v61  ;;  %v1050_v31 = vld [vmem:[#allocation2 + $0x1b6] sm:$0xf] }
 0x161   : > { %v1148_v25 = vmax.f32 %v6545_v61, %v6559_v38  ;;  %v1192_v10 = vld [vmem:[#allocation2 + $0x1d6] sm:$0xf]  ;;  %v1241_v6 = vmax.f32 %v1145_v60, %v6559_v38  ;;  %989 = vst.msk [vmem:[#allocation2 + $0x210] sm:$0xff] %vm909_vm2, %v906_v5  ;;  %v1330_v4 = vmax.f32 %v1233_v11, %v6499_v19  ;;  %v1331_v50 = vmax.f32 %v6553_v40, %v6567_v58  ;;  %v1296_v60 = vld [vmem:[#allocation2 + $0x246] sm:$0xff] }
 0x162   : > { %v1286_v57 = vld [vmem:[#allocation2 + $0x1d6] sm:$0xf]  ;;  %1473 = vst.msk [vmem:[#allocation3 + $0xe0] sm:$0xff] %vm909_vm2, %v1424_v48  ;;  %1478 = vst.msk [vmem:[#allocation3 + $0x108] sm:$0xff] %vm909_vm2, %v1429_v34  ;;  %v1146_v35 = vmax.f32 %v6499_v19, %v6578_v36  ;;  %v1147_v46 = vmax.f32 %v1050_v31, %v1099_v7  ;;  %v1333_v37 = vmax.f32 %v1236_v53, %v6578_v36  ;;  %v6625_v34 = vld [vmem:[#allocation3 + $0xa9] sm:$0xff] }
 0x163   : > { %1474 = vst.msk [vmem:[#allocation3 + $0xe8] sm:$0xf] %vm1446_vm4, %v1425_v30  ;;  %v6592_v9 = vld [vmem:[#allocation2 + $0x1f6] sm:$0xf]  ;;  %v1334_v26 = vmax.f32 %v1237_v18, %v1286_v57  ;;  %v1149_v43 = vmax.f32 %v6578_v36, %v6576_v15  ;;  %v1335_v61 = vmax.f32 %v1238_v3, %v6559_v38  ;;  %v1006_v16 = vpack.c.bf16 %v906_v5, %v6530_v33  ;;  %v1103_v55 = vld [vmem:[#allocation2 + $0x206] sm:$0xff] }
 0x164   : > { %1475 = vst.msk [vmem:[#allocation3 + $0xf0] sm:$0xff] %vm909_vm2, %v1426_v2  ;;  %v1383_v22 = vld [vmem:[#allocation2 + $0x1f6] sm:$0xf]  ;;  %v1427_v11 = vmax.f32 %v1330_v4, %v6578_v36  ;;  %v6608_v40 = vmax.f32 %v1143_v17, %v6578_v36  ;;  %v6610_v14 = vmax.f32 %v1144_v8, %v1192_v10  ;;  %v1430_v42 = vmax.f32 %v1333_v37, %v6576_v15  ;;  %v6621_v8 = vld [vmem:[#allocation3 + $0xa8] sm:$0xff]  ;;  %v6642_v37 = vld [vmem:[#allocation3 + $0xc0] sm:$0xff] }
 0x165   : > { %v6598_v54 = vld [vmem:[#allocation2 + $0x1d6] sm:$0xf]  ;;  %v1431_v32 = vmax.f32 %v1334_v26, %v1383_v22  ;;  %v1151_v58 = vmax.f32 %v6559_v38, %v1103_v55  ;;  %v1244_v5 = vmax.f32 %v1148_v25, %v1103_v55  ;;  %v1338_v48 = vmax.f32 %v1241_v6, %v1103_v55  ;;  %5101 = vmatprep.mubr.msk.bf16.mxu1 %vm909_vm2, %v1006_v16  ;;  %v1199_v38 = vld [vmem:[#allocation2 + $0x226] sm:$0xff] }
 0x166   : > { %v1380_v28 = vld [vmem:[#allocation2 + $0x1d6] sm:$0xf]  ;;  %v1432_v17 = vmax.f32 %v1335_v61, %v1103_v55  ;;  %1476 = vst.msk [vmem:[#allocation3 + $0xf8] sm:$0xff] %vm909_vm2, %v1427_v11  ;;  %v1150_v7 = vmax.f32 %v6598_v54, %v6592_v9  ;;  %1479 = vst.msk [vmem:[#allocation3 + $0x110] sm:$0xff] %vm909_vm2, %v1430_v42  ;;  %v1393_v53 = vld [vmem:[#allocation2 + $0x266] sm:$0xff]  ;;  %v1242_v18 = vmax.f32 %v1146_v35, %v6576_v15  ;;  %5102 = vmatmul.mubr.msk.bf16.gmra.mrb[12].mxu1 %vm909_vm2, %v1007_v12 }
 0x167   : > { %v6605_v19 = vld [vmem:[#allocation3 + $0x98] sm:$0xff]  ;;  %v6613_v62 = vld [vmem:[#allocation3 + $0x90] sm:$0xff]  ;;  %1480 = vst.msk [vmem:[#allocation3 + $0x118] sm:$0xf] %vm1446_vm4, %v1431_v32  ;;  %v1428_v31 = vmax.f32 %v1331_v50, %v1380_v28  ;;  %v6635_v10 = vld [vmem:[#allocation3 + $0xc1] sm:$0xff]  ;;  %v1247_v6 = vmax.f32 %v1151_v58, %v1199_v38  ;;  %v1341_v4 = vmax.f32 %v1244_v5, %v1199_v38  ;;  %v1435_v9 = vmax.f32 %v1338_v48, %v1199_v38 }
 0x168   : > { %v6615_v23 = vld [vmem:[#allocation3 + $0xb0] sm:$0xff]  ;;  %v6623_v30 = vld [vmem:[#allocation3 + $0x99] sm:$0xff]  ;;  %1481 = vst.msk [vmem:[#allocation3 + $0x120] sm:$0xff] %vm909_vm2, %v1432_v17  ;;  %v6644_v35 = vld [vmem:[#allocation3 + $0xc8] sm:$0xff]  ;;  %v1336_v21 = vmax.f32 %v6608_v40, %v6576_v15  ;;  %v1571_v54 = vmax.f32 %v6621_v8, %v6625_v34 }
 0x169   : > { %v6617_v3 = vld [vmem:[#allocation3 + $0x91] sm:$0xff]  ;;  %1477 = vst.msk [vmem:[#allocation3 + $0x100] sm:$0xf] %vm1446_vm4, %v1428_v31  ;;  %v6654_v12 = vld [vmem:[#allocation3 + $0xc9] sm:$0xff]  ;;  %v1570_v22 = vmax.f32 %v6605_v19, %v6623_v30  ;;  %v1344_v61 = vmax.f32 %v1247_v6, %v1296_v60  ;;  %v1438_v16 = vmax.f32 %v1341_v4, %v1296_v60  ;;  %v1573_v19 = vmax.f32 %v6642_v37, %v6635_v10  ;;  %v1512_v48 = vld [vmem:[#allocation3 + $0xe0] sm:$0xff] }
 0x16a   : > { %v1195_v33 = vld [vmem:[#allocation2 + $0x1f6] sm:$0xf]  ;;  %v1569_v50 = vmax.f32 %v6613_v62, %v6617_v3  ;;  %1484 = vst.msk [vmem:[#allocation3 + $0x138] sm:$0xff] %vm909_vm2, %v1435_v9  ;;  %v6661_v11 = vld [vmem:[#allocation2 + $0x22e] sm:$0xff]  ;;  %v1602_v30 = vld [vmem:[#allocation3 + $0x9a] sm:$0xff]  ;;  %v1574_v36 = vmax.f32 %v6644_v35, %v6654_v12 }
 0x16b   : > { %v1243_v2 = vmax.f32 %v1147_v46, %v1195_v33  ;;  %v6633_v25 = vld [vmem:[#allocation3 + $0xb1] sm:$0xff]  ;;  %8496 = vst [vmem:[#allocation33_spill] sm:$0xff] %v6661_v11  ;;  %v1543_v17 = vld [vmem:[#allocation3 + $0xd9] sm:$0xff]  ;;  %v1441_v38 = vmax.f32 %v1344_v61, %v1393_v53  ;;  %1487 = vst.msk [vmem:[#allocation3 + $0x150] sm:$0xff] %vm909_vm2, %v1438_v16 }
 0x16c   : > { %v1289_v57 = vld [vmem:[#allocation2 + $0x1f6] sm:$0xf]  ;;  %v6648_v46 = vld [vmem:[#allocation2 + $0x20e] sm:$0xff]  ;;  %v1572_v55 = vmax.f32 %v6615_v23, %v6633_v25  ;;  %v1544_v10 = vld [vmem:[#allocation3 + $0xe1] sm:$0xff] }
 0x16d   : > { %8495 = vst [vmem:[#allocation32_spill] sm:$0xff] %v6648_v46  ;;  %v1198_v26 = vld [vmem:[#allocation2 + $0x216] sm:$0xf]  ;;  %v1337_v49 = vmax.f32 %v6610_v14, %v1289_v57  ;;  %v6663_v42 = vld [vmem:[#allocation2 + $0x24e] sm:$0xff]  ;;  %v1245_v60 = vmax.f32 %v1149_v43, %v6648_v46  ;;  %v1339_v33 = vmax.f32 %v1242_v18, %v6648_v46  ;;  %v1433_v31 = vmax.f32 %v1336_v21, %v6648_v46  ;;  %v6682_v21 = vld [vmem:[#allocation3 + $0x1] sm:$0xff] }
 0x16e   : > { %v1601_v28 = vld [vmem:[#allocation3 + $0x92] sm:$0xff]  ;;  %8497 = vst [vmem:[#allocation34_spill] sm:$0xff] %v6663_v42  ;;  %v1246_v3 = vmax.f32 %v1150_v7, %v1198_v26  ;;  %v1515_v53 = vld [vmem:[#allocation3 + $0x108] sm:$0xff]  ;;  %1490 = vst.msk [vmem:[#allocation3 + $0x168] sm:$0xff] %vm909_vm2, %v1441_v38 }
 0x16f   : > { %v1292_v40 = vld [vmem:[#allocation2 + $0x216] sm:$0xf]  ;;  %v6678_v43 = vmax.f32 %v1569_v50, %v1601_v28  ;;  %v1342_v7 = vmax.f32 %v1245_v60, %v6661_v11  ;;  %v1436_v57 = vmax.f32 %v1339_v33, %v6661_v11  ;;  %v1603_v9 = vld [vmem:[#allocation3 + $0xaa] sm:$0xff]  ;;  %v1605_v26 = vld [vmem:[#allocation3 + $0xc2] sm:$0xff]  ;;  %1482 = vst.msk [vmem:[#allocation3 + $0x128] sm:$0xff] %vm909_vm2, %v1433_v31 }
 0x170   : > { %v1386_v14 = vld [vmem:[#allocation2 + $0x216] sm:$0xf]  ;;  %v1340_v58 = vmax.f32 %v1243_v2, %v1292_v40  ;;  %v1547_v50 = vld [vmem:[#allocation3 + $0x109] sm:$0xff]  ;;  %v6686_v40 = vmax.f32 %v1570_v22, %v1602_v30  ;;  %v1607_v33 = vld [vmem:[#allocation3 + $0xda] sm:$0xff] }
 0x171   : > { %v1392_v32 = vld [vmem:[#allocation2 + $0x256] sm:$0xf]  ;;  %v1434_v2 = vmax.f32 %v1337_v49, %v1386_v14  ;;  %v1576_v49 = vmax.f32 %v1512_v48, %v1544_v10  ;;  %v1606_v16 = vld [vmem:[#allocation3 + $0xca] sm:$0xff]  ;;  %v1439_v14 = vmax.f32 %v1342_v7, %v6663_v42  ;;  %1485 = vst.msk [vmem:[#allocation3 + $0x140] sm:$0xff] %vm909_vm2, %v1436_v57  ;;  %v6693_v31 = vld [vmem:[#allocation3] sm:$0xff] }
 0x172   : > { %v1295_v62 = vld [vmem:[#allocation2 + $0x236] sm:$0xf]  ;;  %v1611_v48 = vld [vmem:[#allocation3 + $0x10a] sm:$0xff]  ;;  %v1666_v10 = vld [vmem:[#allocation3 + $0x9b] sm:$0xff]  ;;  %v6709_v57 = vmax.f32 %v1574_v36, %v1606_v16 }
 0x173   : > { %v1511_v5 = vld [vmem:[#allocation3 + $0xd8] sm:$0xff]  ;;  %v1513_v25 = vld [vmem:[#allocation3 + $0xf0] sm:$0xff]  ;;  %v1343_v18 = vmax.f32 %v1246_v3, %v1295_v62  ;;  %1483 = vst.msk [vmem:[#allocation3 + $0x130] sm:$0xf] %vm1446_vm4, %v1434_v2  ;;  %v1579_v3 = vmax.f32 %v1515_v53, %v1547_v50  ;;  %v6729_v36 = vld [vmem:[#allocation3 + $0xe3] sm:$0xff] }
 0x174   : > { %v1389_v23 = vld [vmem:[#allocation2 + $0x236] sm:$0xf]  ;;  %v1575_v28 = vmax.f32 %v1511_v5, %v1543_v17  ;;  %v6705_v7 = vld [vmem:[#allocation3 + $0xab] sm:$0xff]  ;;  %1488 = vst.msk [vmem:[#allocation3 + $0x158] sm:$0xff] %vm909_vm2, %v1439_v14  ;;  %v1610_v2 = vld [vmem:[#allocation3 + $0xfa] sm:$0xff]  ;;  %v1698_v14 = vmax.f32 %v6686_v40, %v1666_v10 }
 0x175   : > { %v1514_v6 = vld [vmem:[#allocation3 + $0xf8] sm:$0xff]  ;;  %v1437_v61 = vmax.f32 %v1340_v58, %v1389_v23  ;;  %v1516_v35 = vld [vmem:[#allocation3 + $0x110] sm:$0xff]  ;;  %v1440_v62 = vmax.f32 %v1343_v18, %v1392_v32  ;;  %v1608_v58 = vld [vmem:[#allocation3 + $0xe2] sm:$0xff]  ;;  %v6699_v32 = vmax.f32 %v1571_v54, %v1603_v9  ;;  %v6723_v9 = vmax.f32 %v1579_v3, %v1611_v48 }
 0x176   : > { %v1545_v4 = vld [vmem:[#allocation3 + $0xf1] sm:$0xff]  ;;  %v1546_v22 = vld [vmem:[#allocation3 + $0xf9] sm:$0xff]  ;;  %v6711_v53 = vmax.f32 %v1575_v28, %v1607_v33  ;;  %v6713_v8 = vmax.f32 %v1576_v49, %v1608_v58  ;;  %v6717_v54 = vld [vmem:[#allocation3 + $0xc3] sm:$0xff] }
 0x177   : > { %v1604_v37 = vld [vmem:[#allocation3 + $0xb2] sm:$0xff]  ;;  %v1577_v60 = vmax.f32 %v1513_v25, %v1545_v4  ;;  %1486 = vst.msk [vmem:[#allocation3 + $0x148] sm:$0xf] %vm1446_vm4, %v1437_v61  ;;  %v6703_v25 = vmax.f32 %v1573_v19, %v1605_v26  ;;  %1489 = vst.msk [vmem:[#allocation3 + $0x160] sm:$0xf] %vm1446_vm4, %v1440_v62  ;;  %v1578_v18 = vmax.f32 %v1514_v6, %v1546_v22  ;;  %v1526_v19 = vld [vmem:[#allocation3 + $0x9] sm:$0xff] }
 0x178   : > { %v1548_v12 = vld [vmem:[#allocation3 + $0x111] sm:$0xff]  ;;  %v6701_v30 = vmax.f32 %v1572_v55, %v1604_v37  ;;  %v6719_v55 = vld [vmem:[#allocation3 + $0x8] sm:$0xff]  ;;  %v6727_v6 = vld [vmem:[#allocation3 + $0xdb] sm:$0xff]  ;;  %v1557_v61 = vmax.f32 %v6693_v31, %v6682_v21 }
 0x179   : > { %v1609_v38 = vld [vmem:[#allocation3 + $0xf2] sm:$0xff]  ;;  %v1580_v5 = vmax.f32 %v1516_v35, %v1548_v12  ;;  %v1517_v35 = vld [vmem:[#allocation3 + $0x120] sm:$0xff]  ;;  %v6735_v50 = vmax.f32 %v1578_v18, %v1610_v2  ;;  %v1518_v22 = vld [vmem:[#allocation3 + $0x128] sm:$0xff]  ;;  %v1558_v18 = vmax.f32 %v6719_v55, %v1526_v19 }
 0x17a   : > { %v6691_v23 = vld [vmem:[#allocation3 + $0x93] sm:$0xff]  ;;  %v6721_v4 = vmax.f32 %v1577_v60, %v1609_v38  ;;  %v6725_v37 = vld [vmem:[#allocation3 + $0xcb] sm:$0xff]  ;;  %v6741_v49 = vld [vmem:[#allocation3 + $0xfb] sm:$0xff] }
 0x17b   : > { %v1612_v17 = vld [vmem:[#allocation3 + $0x112] sm:$0xff]  ;;  %v1697_v26 = vmax.f32 %v6678_v43, %v6691_v23  ;;  %v1730_v23 = vld [vmem:[#allocation3 + $0x9c] sm:$0xff]  ;;  %v1590_v58 = vld [vmem:[#allocation3 + $0xa] sm:$0xff] }
 0x17c   : > { %v6715_v34 = vld [vmem:[#allocation3 + $0xb3] sm:$0xff]  ;;  %v6737_v12 = vmax.f32 %v1580_v5, %v1612_v17  ;;  %v6743_v16 = vld [vmem:[#allocation3 + $0x10b] sm:$0xff]  ;;  %v1589_v31 = vld [vmem:[#allocation3 + $0x2] sm:$0xff]  ;;  %v6776_v10 = vmax.f32 %v1698_v14, %v1730_v23 }
 0x17d   : > { %v6739_v28 = vld [vmem:[#allocation3 + $0xf3] sm:$0xff]  ;;  %v1549_v5 = vld [vmem:[#allocation3 + $0x121] sm:$0xff]  ;;  %v1550_v59 = vld [vmem:[#allocation3 + $0x129] sm:$0xff]  ;;  %v1621_v42 = vmax.f32 %v1557_v61, %v1589_v31 }
 0x17e   : > { %v6748_v43 = vld [vmem:[#allocation3 + $0x19] sm:$0xff]  ;;  %v1613_v48 = vld [vmem:[#allocation3 + $0x122] sm:$0xff]  ;;  %v1521_v41 = vld [vmem:[#allocation3 + $0x150] sm:$0xff]  ;;  %v1581_v52 = vmax.f32 %v1517_v35, %v1549_v5  ;;  %8499 = vst [vmem:[#allocation36_spill] sm:$0xff] %v6776_v10  ;;  %v1582_v2 = vmax.f32 %v1518_v22, %v1550_v59  ;;  %v1622_v59 = vmax.f32 %v1558_v18, %v1590_v58 }
 0x17f   : > { %v1519_v60 = vld [vmem:[#allocation3 + $0x138] sm:$0xff]  ;;  %v6770_v33 = vld [vmem:[#allocation3 + $0x20] sm:$0xff]  ;;  %v1614_v47 = vld [vmem:[#allocation3 + $0x12a] sm:$0xff]  ;;  %2237 = vst.msk [vmem:[#allocation2 + $0x110] sm:$0xff] %vm909_vm2, %v6776_v10  ;;  %v1685_v44 = vmax.f32 %v1621_v42, %v1653_v20 }
 0x180   : > { %v6750_v21 = vld [vmem:[#allocation3 + $0x113] sm:$0xff]  ;;  %v6772_v3 = vld [vmem:[#allocation3 + $0x21] sm:$0xff]  ;;  %v1654_v11 = vld [vmem:[#allocation3 + $0xb] sm:$0xff]  ;;  %v1646_v31 = vmax.f32 %v1582_v2, %v1614_v47 }
 0x181   : > { %v1729_v38 = vld [vmem:[#allocation3 + $0x94] sm:$0xff]  ;;  %v1520_v62 = vld [vmem:[#allocation3 + $0x140] sm:$0xff]  ;;  %v1686_v58 = vmax.f32 %v1622_v59, %v1654_v11 }
 0x182   : > { %v6768_v40 = vld [vmem:[#allocation3 + $0x18] sm:$0xff]  ;;  %v6774_v29 = vmax.f32 %v1697_v26, %v1729_v38  ;;  %v1552_v56 = vld [vmem:[#allocation3 + $0x141] sm:$0xff]  ;;  %v6781_v38 = vmax.f32 %v1581_v52, %v1613_v48  ;;  %v1678_v48 = vld [vmem:[#allocation3 + $0x12b] sm:$0xff] }
 0x183   : > { %v1551_v17 = vld [vmem:[#allocation3 + $0x139] sm:$0xff]  ;;  %v1553_v46 = vld [vmem:[#allocation3 + $0x151] sm:$0xff]  ;;  %v1584_v26 = vmax.f32 %v1520_v62, %v1552_v56  ;;  %v1559_v55 = vmax.f32 %v6768_v40, %v6748_v43  ;;  %v1616_v14 = vld [vmem:[#allocation3 + $0x142] sm:$0xff]  ;;  %v8526_v40 = vmax.f32 %v6770_v33, %v6772_v3  ;;  %v3091_v3 = vsel %vm1847_vm3, %v6348_v39, 0 }
 0x184   : > { %8498 = vst [vmem:[#allocation35_spill] sm:$0xff] %v6774_v29  ;;  %v1583_v63 = vmax.f32 %v1519_v60, %v1551_v17  ;;  %v1615_v0 = vld [vmem:[#allocation3 + $0x13a] sm:$0xff]  ;;  %2236 = vst.msk [vmem:[#allocation2 + $0x108] sm:$0xff] %vm909_vm2, %v6774_v29  ;;  %v1585_v19 = vmax.f32 %v1521_v41, %v1553_v46  ;;  %v1617_v60 = vld [vmem:[#allocation3 + $0x152] sm:$0xff]  ;;  %5106 = vmatpush3.bf16.msra.mxu1 %v3091_v3 }
 0x185   : > { %v1522_v15 = vld [vmem:[#allocation3 + $0x158] sm:$0xff]  ;;  %v1717_v52 = vld [vmem:[#allocation3 + $0x4] sm:$0xff]  ;;  %v1718_v56 = vld [vmem:[#allocation3 + $0xc] sm:$0xff]  ;;  %v6791_v62 = vmax.f32 %v1584_v26, %v1616_v14 }
 0x186   : > { %v1554_v35 = vld [vmem:[#allocation3 + $0x159] sm:$0xff]  ;;  %v6789_v22 = vmax.f32 %v1583_v63, %v1615_v0  ;;  %v1677_v5 = vld [vmem:[#allocation3 + $0x123] sm:$0xff]  ;;  %v1649_v41 = vmax.f32 %v1585_v19, %v1617_v60  ;;  %v1710_v0 = vmax.f32 %v1646_v31, %v1678_v48  ;;  %v1731_v14 = vld [vmem:[#allocation3 + $0xac] sm:$0xff]  ;;  %v1749_v42 = vmax.f32 %v1685_v44, %v1717_v52 }
 0x187   : > { %v1586_v61 = vmax.f32 %v1522_v15, %v1554_v35  ;;  %v1618_v23 = vld [vmem:[#allocation3 + $0x15a] sm:$0xff]  ;;  %v1680_v46 = vld [vmem:[#allocation3 + $0x143] sm:$0xff]  ;;  %v1709_v63 = vmax.f32 %v6781_v38, %v1677_v5  ;;  %v1750_v59 = vmax.f32 %v1686_v58, %v1718_v56  ;;  %v8500_v38 = vmax.f32 %v6699_v32, %v6705_v7  ;;  %v1739_v56 = vld [vmem:[#allocation3 + $0x10c] sm:$0xff] }
 0x188   : > { %v1679_v17 = vld [vmem:[#allocation3 + $0x13b] sm:$0xff]  ;;  %v1681_v35 = vld [vmem:[#allocation3 + $0x153] sm:$0xff]  ;;  %v1712_v26 = vmax.f32 %v6791_v62, %v1680_v46  ;;  %v1733_v11 = vld [vmem:[#allocation3 + $0xc4] sm:$0xff]  ;;  %v8504_v48 = vmax.f32 %v6703_v25, %v6717_v54  ;;  %v8506_v58 = vmax.f32 %v6709_v57, %v6725_v37  ;;  %v8508_v7 = vmax.f32 %v6711_v53, %v6727_v6  ;;  %2224 = vst.msk [vmem:[#allocation2 + $0x48] sm:$0xff] %vm909_vm2, %v1749_v42 }
 0x189   : > { %v6795_v15 = vmax.f32 %v1586_v61, %v1618_v23  ;;  %v6797_v47 = vld [vmem:[#allocation3 + $0x15b] sm:$0xff]  ;;  %v1711_v2 = vmax.f32 %v6789_v22, %v1679_v17  ;;  %v1713_v18 = vmax.f32 %v1649_v41, %v1681_v35  ;;  %v1734_v61 = vld [vmem:[#allocation3 + $0xcc] sm:$0xff]  ;;  %v1736_v23 = vld [vmem:[#allocation3 + $0xe4] sm:$0xff]  ;;  %v6807_v31 = vmax.f32 %v8500_v38, %v1731_v14  ;;  %2225 = vst.msk [vmem:[#allocation2 + $0x50] sm:$0xff] %vm909_vm2, %v1750_v59 }
 0x18a   : > { %v1732_v20 = vld [vmem:[#allocation3 + $0xb4] sm:$0xff]  ;;  %v1735_v60 = vld [vmem:[#allocation3 + $0xdc] sm:$0xff]  ;;  %v8502_v22 = vmax.f32 %v6701_v30, %v6715_v34  ;;  %v6817_v17 = vmax.f32 %v8504_v48, %v1733_v11  ;;  %v6822_v32 = vmax.f32 %v8506_v58, %v1734_v61  ;;  %v8510_v34 = vmax.f32 %v6713_v8, %v6729_v36  ;;  %v1742_v57 = vld [vmem:[#allocation3 + $0x12c] sm:$0xff] }
 0x18b   : > { %v1714_v19 = vmax.f32 %v6795_v15, %v6797_v47  ;;  %8501 = vst [vmem:[#allocation37_spill] sm:$0xff] %v6807_v31  ;;  %v1591_v5 = vld [vmem:[#allocation3 + $0x1a] sm:$0xff]  ;;  %v6827_v30 = vmax.f32 %v8508_v7, %v1735_v60  ;;  %v1592_v25 = vld [vmem:[#allocation3 + $0x22] sm:$0xff]  ;;  %v8512_v37 = vmax.f32 %v6721_v4, %v6739_v28  ;;  %v8514_v53 = vmax.f32 %v6735_v50, %v6741_v49  ;;  %v2272_v61 = vld [vmem:[#allocation2 + $0xae] sm:$0xff] }
 0x18c   : > { %v6812_v62 = vmax.f32 %v8502_v22, %v1732_v20  ;;  %v1737_v44 = vld [vmem:[#allocation3 + $0xf4] sm:$0xff]  ;;  %v1738_v52 = vld [vmem:[#allocation3 + $0xfc] sm:$0xff]  ;;  %8505 = vst [vmem:[#allocation39_spill] sm:$0xff] %v6817_v17  ;;  %8507 = vst [vmem:[#allocation40_spill] sm:$0xff] %v6822_v32  ;;  %v6832_v41 = vmax.f32 %v8510_v34, %v1736_v23  ;;  %v8516_v8 = vmax.f32 %v6723_v9, %v6743_v16 }
 0x18d   : > { %8509 = vst [vmem:[#allocation41_spill] sm:$0xff] %v6827_v30  ;;  %v1740_v54 = vld [vmem:[#allocation3 + $0x114] sm:$0xff]  ;;  %v1741_v15 = vld [vmem:[#allocation3 + $0x124] sm:$0xff]  ;;  %v6839_v46 = vmax.f32 %v8512_v37, %v1737_v44  ;;  %v6844_v6 = vmax.f32 %v8514_v53, %v1738_v52  ;;  %2238 = vst.msk [vmem:[#allocation2 + $0x128] sm:$0xff] %vm909_vm2, %v6807_v31  ;;  %v1781_v35 = vpack.c.bf16 %v1750_v59, %v1749_v42 }
 0x18e   : > { %8503 = vst [vmem:[#allocation38_spill] sm:$0xff] %v6812_v62  ;;  %8511 = vst [vmem:[#allocation42_spill] sm:$0xff] %v6832_v41  ;;  %v6849_v36 = vmax.f32 %v8516_v8, %v1739_v56  ;;  %v1655_v4 = vld [vmem:[#allocation3 + $0x1b] sm:$0xff]  ;;  %v1744_v47 = vld [vmem:[#allocation3 + $0x144] sm:$0xff]  ;;  %v8518_v50 = vmax.f32 %v6737_v12, %v6750_v21  ;;  %v6860_v20 = vmax.f32 %v1709_v63, %v1741_v15 }
 0x18f   : > { %8513 = vst [vmem:[#allocation43_spill] sm:$0xff] %v6839_v46  ;;  %8515 = vst [vmem:[#allocation44_spill] sm:$0xff] %v6844_v6  ;;  %v1743_v28 = vld [vmem:[#allocation3 + $0x13c] sm:$0xff]  ;;  %v1745_v14 = vld [vmem:[#allocation3 + $0x154] sm:$0xff]  ;;  %v6862_v9 = vmax.f32 %v1710_v0, %v1742_v57  ;;  %v1623_v12 = vmax.f32 %v1559_v55, %v1591_v5  ;;  %v6881_v11 = vmax.f32 %v1712_v26, %v1744_v47  ;;  %5039 = vmatprep.mubr.msk.bf16.mxu0 %vm909_vm2, %v1781_v35 }
 0x190   : > { %8517 = vst [vmem:[#allocation45_spill] sm:$0xff] %v6849_v36  ;;  %2239 = vst.msk [vmem:[#allocation2 + $0x130] sm:$0xff] %vm909_vm2, %v6812_v62  ;;  %v6858_v49 = vmax.f32 %v8518_v50, %v1740_v54  ;;  %v6875_v16 = vld [vmem:[#allocation3 + $0x23] sm:$0xff]  ;;  %v6877_v21 = vld [vmem:[#allocation2 + $0x1f6] sm:$0xf]  ;;  %v6879_v0 = vmax.f32 %v1711_v2, %v1743_v28  ;;  %v6883_v42 = vmax.f32 %v1713_v18, %v1745_v14 }
 0x191   : > { %8520 = vst [vmem:[#allocation47_spill] sm:$0xff] %v6860_v20  ;;  %8521 = vst [vmem:[#allocation48_spill] sm:$0xff] %v6862_v9  ;;  %v1746_v63 = vld [vmem:[#allocation3 + $0x15c] sm:$0xff]  ;;  %v2268_v43 = vld [vmem:[#allocation2 + $0x86] sm:$0xff]  ;;  %v6895_v55 = vmax.f32 %v8526_v40, %v1592_v25  ;;  %v1687_v60 = vmax.f32 %v1623_v12, %v1655_v4 }
 0x192   : > { %8519 = vst [vmem:[#allocation46_spill] sm:$0xff] %v6858_v49  ;;  %2240 = vst.msk [vmem:[#allocation2 + $0x148] sm:$0xff] %vm909_vm2, %v6817_v17  ;;  %v1719_v2 = vld [vmem:[#allocation3 + $0x1c] sm:$0xff]  ;;  %v6897_v18 = vmax.f32 %v1714_v19, %v1746_v63  ;;  %v2269_v26 = vld [vmem:[#allocation2 + $0x8e] sm:$0xff] }
 0x193   : > { %2241 = vst.msk [vmem:[#allocation2 + $0x150] sm:$0xff] %vm909_vm2, %v6822_v32  ;;  %2242 = vst.msk [vmem:[#allocation2 + $0x168] sm:$0xff] %vm909_vm2, %v6827_v30  ;;  %v2271_v59 = vld [vmem:[#allocation2 + $0xa6] sm:$0xff]  ;;  %v6909_v19 = vld [vmem:[#allocation2 + $0x216] sm:$0xf]  ;;  %v2365_v39 = vmax.f32 %v2269_v26, %v2272_v61  ;;  %v6933_v7 = vmax.f32 %v1687_v60, %v1719_v2 }
 0x194   : > { %2243 = vst.msk [vmem:[#allocation2 + $0x170] sm:$0xff] %vm909_vm2, %v6832_v41  ;;  %8522 = vst [vmem:[#allocation49_spill] sm:$0xff] %v6877_v21  ;;  %v6917_v23 = vld [vmem:[#allocation2 + $0xc6] sm:$0xff]  ;;  %v6919_v38 = vld [vmem:[#allocation2 + $0xce] sm:$0xff]  ;;  %v2364_v22 = vmax.f32 %v2268_v43, %v2271_v59 }
 0x195   : > { %8523 = vst [vmem:[#allocation50_spill] sm:$0xff] %v6879_v0  ;;  %8524 = vst [vmem:[#allocation51_spill] sm:$0xff] %v6881_v11  ;;  %v6927_v52 = vld [vmem:[#allocation2 + $0xe6] sm:$0xff]  ;;  %v6929_v56 = vld [vmem:[#allocation2 + $0xee] sm:$0xff]  ;;  %v2367_v48 = vmax.f32 %v2271_v59, %v6917_v23  ;;  %v2368_v58 = vmax.f32 %v2272_v61, %v6919_v38  ;;  %v6949_v53 = vmax.f32 %v2365_v39, %v6919_v38 }
 0x196   : > { %8525 = vst [vmem:[#allocation52_spill] sm:$0xff] %v6883_v42  ;;  %2244 = vst.msk [vmem:[#allocation2 + $0x188] sm:$0xff] %vm909_vm2, %v6839_v46  ;;  %v6937_v25 = vld [vmem:[#allocation2 + $0x106] sm:$0xff]  ;;  %v6939_v54 = vld [vmem:[#allocation2 + $0x10e] sm:$0xff]  ;;  %v2370_v15 = vmax.f32 %v6917_v23, %v6927_v52  ;;  %v2371_v57 = vmax.f32 %v6919_v38, %v6929_v56  ;;  %v6946_v37 = vmax.f32 %v2364_v22, %v6917_v23 }
 0x197   : > { %2245 = vst.msk [vmem:[#allocation2 + $0x190] sm:$0xff] %vm909_vm2, %v6844_v6  ;;  %2246 = vst.msk [vmem:[#allocation2 + $0x1a8] sm:$0xff] %vm909_vm2, %v6849_v36  ;;  %v6951_v8 = vld [vmem:[#allocation2 + $0x126] sm:$0xff]  ;;  %v6953_v35 = vld [vmem:[#allocation2 + $0x12e] sm:$0xff]  ;;  %v2373_v4 = vmax.f32 %v6927_v52, %v6937_v25  ;;  %v2374_v28 = vmax.f32 %v6929_v56, %v6939_v54  ;;  %v6960_v47 = vmax.f32 %v2367_v48, %v6927_v52 }
 0x198   : > { %8527 = vst [vmem:[#allocation53_spill] sm:$0xff] %v6897_v18  ;;  %2247 = vst.msk [vmem:[#allocation2 + $0x1b0] sm:$0xff] %vm909_vm2, %v6858_v49  ;;  %v6963_v14 = vmax.f32 %v2368_v58, %v6929_v56  ;;  %v2376_v63 = vmax.f32 %v6937_v25, %v6951_v8  ;;  %v2377_v43 = vmax.f32 %v6939_v54, %v6953_v35  ;;  %v2270_v39 = vld [vmem:[#allocation2 + $0x96] sm:$0xf] }
 0x199   : > { %2248 = vst.msk [vmem:[#allocation2 + $0x1c8] sm:$0xff] %vm909_vm2, %v6860_v20  ;;  %2249 = vst.msk [vmem:[#allocation2 + $0x1d0] sm:$0xff] %vm909_vm2, %v6862_v9  ;;  %v6967_v50 = vld [vmem:[#allocation2 + $0x146] sm:$0xff]  ;;  %v6976_v40 = vmax.f32 %v2370_v15, %v6937_v25  ;;  %v6979_v2 = vmax.f32 %v2371_v57, %v6939_v54  ;;  %v6990_v3 = vmax.f32 %v2373_v4, %v6951_v8  ;;  %v2273_v44 = vld [vmem:[#allocation2 + $0xb6] sm:$0xf] }
 0x19a   : > { %8528 = vst [vmem:[#allocation54_spill] sm:$0xff] %v6909_v19  ;;  %2250 = vst.msk [vmem:[#allocation2 + $0x1e8] sm:$0xff] %vm909_vm2, %v6879_v0  ;;  %v6969_v12 = vld [vmem:[#allocation2 + $0x14e] sm:$0xff]  ;;  %v6981_v26 = vld [vmem:[#allocation2 + $0x166] sm:$0xff]  ;;  %v2379_v61 = vmax.f32 %v6951_v8, %v6967_v50  ;;  %v6993_v22 = vmax.f32 %v2374_v28, %v6953_v35  ;;  %v7004_v34 = vmax.f32 %v2376_v63, %v6967_v50 }
 0x19b   : > { %2251 = vst.msk [vmem:[#allocation2 + $0x1f0] sm:$0xff] %vm909_vm2, %v6881_v11  ;;  %2252 = vst.msk [vmem:[#allocation2 + $0x208] sm:$0xff] %vm909_vm2, %v6883_v42  ;;  %v6983_v59 = vld [vmem:[#allocation2 + $0x16e] sm:$0xff]  ;;  %v2380_v60 = vmax.f32 %v6953_v35, %v6969_v12  ;;  %v2382_v15 = vmax.f32 %v6967_v50, %v6981_v26  ;;  %v7007_v4 = vmax.f32 %v2377_v43, %v6969_v12  ;;  %v2276_v28 = vld [vmem:[#allocation2 + $0xd6] sm:$0xf] }
 0x19c   : > { %8529 = vst [vmem:[#allocation55_spill] sm:$0xff] %v6917_v23  ;;  %8530 = vst [vmem:[#allocation56_spill] sm:$0xff] %v6919_v38  ;;  %v2383_v57 = vmax.f32 %v6969_v12, %v6983_v59  ;;  %v2279_v33 = vld [vmem:[#allocation2 + $0xf6] sm:$0xf]  ;;  %v7018_v27 = vmax.f32 %v2379_v61, %v6981_v26 }
 0x19d   : > { %2253 = vst.msk [vmem:[#allocation2 + $0x210] sm:$0xff] %vm909_vm2, %v6897_v18  ;;  %8531 = vst [vmem:[#allocation57_spill] sm:$0xff] %v6933_v7  ;;  %v6995_v48 = vld [vmem:[#allocation2 + $0x186] sm:$0xff]  ;;  %v7021_v63 = vmax.f32 %v2380_v60, %v6983_v59  ;;  %v2282_v43 = vld [vmem:[#allocation2 + $0x116] sm:$0xf] }
 0x19e   : > { %2226 = vst.msk [vmem:[#allocation2 + $0x68] sm:$0xff] %vm909_vm2, %v6933_v7  ;;  %v6997_v58 = vld [vmem:[#allocation2 + $0x18e] sm:$0xff]  ;;  %v7009_v5 = vld [vmem:[#allocation2 + $0x1a6] sm:$0xff]  ;;  %v2385_v45 = vmax.f32 %v6981_v26, %v6995_v48  ;;  %v2285_v24 = vld [vmem:[#allocation2 + $0x136] sm:$0xf]  ;;  %v7032_v61 = vmax.f32 %v2382_v15, %v6995_v48 }
 0x19f   : > { %8532 = vst [vmem:[#allocation58_spill] sm:$0xff] %v7009_v5  ;;  %v7011_v38 = vld [vmem:[#allocation2 + $0x1ae] sm:$0xff]  ;;  %v2386_v1 = vmax.f32 %v6983_v59, %v6997_v58  ;;  %v2288_v32 = vld [vmem:[#allocation2 + $0x156] sm:$0xf]  ;;  %v2388_v10 = vmax.f32 %v6995_v48, %v7009_v5  ;;  %v7035_v60 = vmax.f32 %v2383_v57, %v6997_v58 }
 0x1a0   : > { %8533 = vst [vmem:[#allocation59_spill] sm:$0xff] %v7011_v38  ;;  %v7023_v17 = vld [vmem:[#allocation2 + $0x1c6] sm:$0xff]  ;;  %v7025_v62 = vld [vmem:[#allocation2 + $0x1ce] sm:$0xff]  ;;  %v2318_v31 = vld [vmem:[#allocation2 + $0xb6] sm:$0xf]  ;;  %v2389_v29 = vmax.f32 %v6997_v58, %v7011_v38  ;;  %v7038_v0 = vmax.f32 %v2385_v45, %v7009_v5 }
 0x1a1   : > { %8534 = vst [vmem:[#allocation60_spill] sm:$0xff] %v7023_v17  ;;  %8535 = vst [vmem:[#allocation61_spill] sm:$0xff] %v7025_v62  ;;  %v2321_v18 = vld [vmem:[#allocation2 + $0xd6] sm:$0xf]  ;;  %v2366_v11 = vmax.f32 %v2270_v39, %v2318_v31  ;;  %v7041_v9 = vmax.f32 %v2386_v1, %v7011_v38  ;;  %v7046_v6 = vmax.f32 %v2388_v10, %v7023_v17 }
 0x1a2   : > { %v2324_v42 = vld [vmem:[#allocation2 + $0xf6] sm:$0xf]  ;;  %v2369_v13 = vmax.f32 %v2273_v44, %v2321_v18  ;;  %v7049_v1 = vmax.f32 %v2389_v29, %v7025_v62  ;;  %v2559_v10 = vmax.f32 %v6960_v47, %v6937_v25  ;;  %v2560_v29 = vmax.f32 %v6963_v14, %v6939_v54 }
 0x1a3   : > { %v2327_v23 = vld [vmem:[#allocation2 + $0x116] sm:$0xf]  ;;  %v2372_v51 = vmax.f32 %v2276_v28, %v2324_v42  ;;  %v2557_v42 = vmax.f32 %v6949_v53, %v6929_v56  ;;  %v2562_v44 = vmax.f32 %v6976_v40, %v6951_v8  ;;  %v2563_v53 = vmax.f32 %v6979_v2, %v6953_v35 }
 0x1a4   : > { %v2330_v49 = vld [vmem:[#allocation2 + $0x136] sm:$0xf]  ;;  %v2375_v57 = vmax.f32 %v2279_v33, %v2327_v23  ;;  %v2565_v14 = vmax.f32 %v6990_v3, %v6967_v50  ;;  %v2566_v40 = vmax.f32 %v6993_v22, %v6969_v12  ;;  %v2568_v2 = vmax.f32 %v7004_v34, %v6981_v26 }
 0x1a5   : > { %v2333_v36 = vld [vmem:[#allocation2 + $0x156] sm:$0xf]  ;;  %v2378_v46 = vmax.f32 %v2282_v43, %v2330_v49  ;;  %v7069_v43 = vld [vmem:[#allocation2 + $0x1e6] sm:$0xff]  ;;  %v2571_v3 = vmax.f32 %v7018_v27, %v6995_v48  ;;  %v2574_v22 = vmax.f32 %v7032_v61, %v7009_v5  ;;  %v2575_v34 = vmax.f32 %v7035_v60, %v7011_v38 }
 0x1a6   : > { %v2336_v15 = vld [vmem:[#allocation2 + $0x176] sm:$0xf]  ;;  %v2381_v31 = vmax.f32 %v2285_v24, %v2333_v36  ;;  %v2578_v27 = vmax.f32 %v7041_v9, %v7025_v62  ;;  %v8536_v60 = vmax.f32 %v6946_v37, %v6927_v52  ;;  %v2656_v9 = vmax.f32 %v2560_v29, %v6953_v35  ;;  %v2628_v37 = vld [vmem:[#allocation2 + $0x206] sm:$0xff] }
 0x1a7   : > { %v2384_v39 = vmax.f32 %v2288_v32, %v2336_v15  ;;  %v2414_v45 = vld [vmem:[#allocation2 + $0xd6] sm:$0xf]  ;;  %v7071_v15 = vld [vmem:[#allocation2 + $0x1ee] sm:$0xff]  ;;  %v2671_v29 = vmax.f32 %v2575_v34, %v7025_v62 }
 0x1a8   : > { %v2417_v21 = vld [vmem:[#allocation2 + $0xf6] sm:$0xf]  ;;  %v2462_v41 = vmax.f32 %v2366_v11, %v2414_v45  ;;  %2704 = vst.msk [vmem:[#allocation3 + $0x80] sm:$0xff] %vm909_vm2, %v2656_v9 }
 0x1a9   : > { %v2420_v19 = vld [vmem:[#allocation2 + $0x116] sm:$0xf]  ;;  %v2465_v30 = vmax.f32 %v2369_v13, %v2417_v21  ;;  %2719 = vst.msk [vmem:[#allocation3 + $0xf8] sm:$0xff] %vm909_vm2, %v2671_v29  ;;  %v7184_v29 = vld [vmem:[#allocation2 + $0x4e] sm:$0xff] }
 0x1aa   : > { %v2423_v7 = vld [vmem:[#allocation2 + $0x136] sm:$0xf]  ;;  %v2468_v24 = vmax.f32 %v2372_v51, %v2420_v19 }
 0x1ab   : > { %v2426_v20 = vld [vmem:[#allocation2 + $0x156] sm:$0xf]  ;;  %v2471_v32 = vmax.f32 %v2375_v57, %v2423_v7 }
 0x1ac   : > { %v2429_v18 = vld [vmem:[#allocation2 + $0x176] sm:$0xf]  ;;  %v7055_v36 = vmax.f32 %v2378_v46, %v2426_v20 }
 0x1ad   : > { %v2432_v49 = vld [vmem:[#allocation2 + $0x196] sm:$0xf]  ;;  %v7059_v33 = vmax.f32 %v2381_v31, %v2429_v18  ;;  %v2572_v31 = vmax.f32 %v7021_v63, %v6997_v58  ;;  %v2580_v63 = vmax.f32 %v7046_v6, %v7069_v43 }
 0x1ae   : > { %v7061_v23 = vmax.f32 %v2384_v39, %v2432_v49  ;;  %v2510_v13 = vld [vmem:[#allocation2 + $0xf6] sm:$0xf] }
 0x1af   : > { %v2513_v21 = vld [vmem:[#allocation2 + $0x116] sm:$0xf]  ;;  %v2558_v20 = vmax.f32 %v2462_v41, %v2510_v13  ;;  %v2569_v41 = vmax.f32 %v7007_v4, %v6983_v59  ;;  %v2577_v4 = vmax.f32 %v7038_v0, %v7023_v17  ;;  %v2653_v0 = vmax.f32 %v2557_v42, %v6939_v54 }
 0x1b0   : > { %v2516_v11 = vld [vmem:[#allocation2 + $0x136] sm:$0xf]  ;;  %v2561_v7 = vmax.f32 %v2465_v30, %v2513_v21  ;;  %v2655_v13 = vmax.f32 %v2559_v10, %v6951_v8  ;;  %v2662_v54 = vmax.f32 %v2566_v40, %v6983_v59  ;;  %v2664_v8 = vmax.f32 %v2568_v2, %v6995_v48  ;;  %v2262_v59 = vld [vmem:[#allocation2 + $0x46] sm:$0xff] }
 0x1b1   : > { %v2519_v51 = vld [vmem:[#allocation2 + $0x156] sm:$0xf]  ;;  %v2564_v47 = vmax.f32 %v2468_v24, %v2516_v11  ;;  %2701 = vst.msk [vmem:[#allocation3 + $0x68] sm:$0xff] %vm909_vm2, %v2653_v0  ;;  %v2665_v35 = vmax.f32 %v2569_v41, %v6997_v58  ;;  %v2670_v10 = vmax.f32 %v2574_v22, %v7023_v17  ;;  %v8538_v40 = vld [vmem:[#allocation32_spill] sm:$0xff]  ;;  %v8541_v22 = vld [vmem:[#allocation41_spill] sm:$0xff] }
 0x1b2   : > { %v2522_v19 = vld [vmem:[#allocation2 + $0x176] sm:$0xf]  ;;  %v2567_v57 = vmax.f32 %v2471_v32, %v2519_v51  ;;  %v2581_v32 = vmax.f32 %v7049_v1, %v7071_v15  ;;  %v2658_v51 = vmax.f32 %v2562_v44, %v6967_v50  ;;  %v2659_v1 = vmax.f32 %v2563_v53, %v6969_v12  ;;  %2703 = vst.msk [vmem:[#allocation3 + $0x78] sm:$0xff] %vm909_vm2, %v2655_v13  ;;  %v7131_v44 = vld [vmem:[%s8365_s4 + $0x3] sm:$0x1]  ;;  %v1720_v2 = vld [vmem:[#allocation3 + $0x24] sm:$0xff] }
 0x1b3   : > { %v2525_v46 = vld [vmem:[#allocation2 + $0x196] sm:$0xf]  ;;  %v2570_v30 = vmax.f32 %v7055_v36, %v2522_v19  ;;  %v2652_v36 = vmax.f32 %v8536_v60, %v6937_v25  ;;  %v2629_v25 = vld [vmem:[#allocation2 + $0x20e] sm:$0xff]  ;;  %v2667_v12 = vmax.f32 %v2571_v3, %v7009_v5  ;;  %2710 = vst.msk [vmem:[#allocation3 + $0xb0] sm:$0xff] %vm909_vm2, %v2662_v54  ;;  %2712 = vst.msk [vmem:[#allocation3 + $0xc0] sm:$0xff] %vm909_vm2, %v2664_v8  ;;  %5276 = vmatprep.subr.msk.bf16.mxu1 %vm1847_vm3, %v7131_v44 }
 0x1b4   : > { %v2528_v28 = vld [vmem:[#allocation2 + $0x1b6] sm:$0xf]  ;;  %v2573_v39 = vmax.f32 %v7059_v33, %v2525_v46  ;;  %v2661_v46 = vmax.f32 %v2565_v14, %v6981_v26  ;;  %v2668_v26 = vmax.f32 %v2572_v31, %v7011_v38  ;;  %2706 = vst.msk [vmem:[#allocation3 + $0x90] sm:$0xff] %vm909_vm2, %v2658_v51  ;;  %2707 = vst.msk [vmem:[#allocation3 + $0x98] sm:$0xff] %vm909_vm2, %v2659_v1  ;;  %v2259_v14 = vld [vmem:[#allocation2 + $0x26] sm:$0xff] }
 0x1b5   : > { %v2606_v45 = vld [vmem:[#allocation2 + $0x116] sm:$0xf]  ;;  %v2576_v18 = vmax.f32 %v7061_v23, %v2528_v28  ;;  %2700 = vst.msk [vmem:[#allocation3 + $0x60] sm:$0xff] %vm909_vm2, %v2652_v36  ;;  %8537 = vst [vmem:[#allocation62_spill] sm:$0xff] %v7131_v44  ;;  %v2673_v53 = vmax.f32 %v2577_v4, %v7069_v43  ;;  %v2256_v28 = vld [vmem:[#allocation2 + $0x6] sm:$0xff]  ;;  %v8540_v3 = vmax.f32 %v6895_v55, %v6875_v16 }
 0x1b6   : > { %v2609_v49 = vld [vmem:[#allocation2 + $0x136] sm:$0xf]  ;;  %v2654_v23 = vmax.f32 %v2558_v20, %v2606_v45  ;;  %2709 = vst.msk [vmem:[#allocation3 + $0xa8] sm:$0xff] %vm909_vm2, %v2661_v46  ;;  %v2674_v20 = vmax.f32 %v2578_v27, %v7071_v15  ;;  %2713 = vst.msk [vmem:[#allocation3 + $0xc8] sm:$0xff] %vm909_vm2, %v2665_v35  ;;  %v2355_v15 = vmax.f32 %v2259_v14, %v2262_v59  ;;  %v2496_v41 = vld [vmem:[#allocation2 + $0x66] sm:$0xff] }
 0x1b7   : > { %v2612_v24 = vld [vmem:[#allocation2 + $0x156] sm:$0xf]  ;;  %v2657_v6 = vmax.f32 %v2561_v7, %v2609_v49  ;;  %v2676_v7 = vmax.f32 %v2580_v63, %v2628_v37  ;;  %2715 = vst.msk [vmem:[#allocation3 + $0xd8] sm:$0xff] %vm909_vm2, %v2667_v12  ;;  %2716 = vst.msk [vmem:[#allocation3 + $0xe0] sm:$0xff] %vm909_vm2, %v2668_v26  ;;  %v1752_v31 = vmax.f32 %v8540_v3, %v1720_v2  ;;  %v7156_v45 = vld [vmem:[#allocation2 + $0x2e] sm:$0xff] }
 0x1b8   : > { %v2615_v61 = vld [vmem:[#allocation2 + $0x176] sm:$0xf]  ;;  %v2660_v19 = vmax.f32 %v2564_v47, %v2612_v24  ;;  %2702 = vst.msk [vmem:[#allocation3 + $0x70] sm:$0xf] %vm1446_vm4, %v2654_v23  ;;  %v2677_v47 = vmax.f32 %v2581_v32, %v2629_v25  ;;  %v2352_v4 = vmax.f32 %v2256_v28, %v2259_v14  ;;  %v2409_v49 = vld [vmem:[#allocation2 + $0xa6] sm:$0xff]  ;;  %v2358_v63 = vmax.f32 %v2262_v59, %v2496_v41 }
 0x1b9   : > { %v2618_v33 = vld [vmem:[#allocation2 + $0x196] sm:$0xf]  ;;  %v2663_v42 = vmax.f32 %v2567_v57, %v2615_v61  ;;  %2705 = vst.msk [vmem:[#allocation3 + $0x88] sm:$0xf] %vm1446_vm4, %v2657_v6  ;;  %v8543_v24 = vld [vmem:[#allocation57_spill] sm:$0xff]  ;;  %v2451_v61 = vmax.f32 %v2355_v15, %v2496_v41  ;;  %v8548_v13 = vld [vmem:[#allocation44_spill] sm:$0xff] }
 0x1ba   : > { %v2621_v21 = vld [vmem:[#allocation2 + $0x1b6] sm:$0xf]  ;;  %v2666_v50 = vmax.f32 %v2570_v30, %v2618_v33  ;;  %2708 = vst.msk [vmem:[#allocation3 + $0xa0] sm:$0xf] %vm1446_vm4, %v2660_v19  ;;  %v2592_v30 = vld [vmem:[#allocation2 + $0x86] sm:$0xff]  ;;  %v1782_v27 = vpack.c.bf16 %v1752_v31, %v8543_v24  ;;  %v2448_v0 = vmax.f32 %v2352_v4, %v2262_v59 }
 0x1bb   : > { %v2624_v11 = vld [vmem:[#allocation2 + $0x1d6] sm:$0xf]  ;;  %v2669_v48 = vmax.f32 %v2573_v39, %v2621_v21  ;;  %2711 = vst.msk [vmem:[#allocation3 + $0xb8] sm:$0xf] %vm1446_vm4, %v2663_v42  ;;  %v7154_v39 = vld [vmem:[#allocation2 + $0xe] sm:$0xff]  ;;  %v2361_v32 = vmax.f32 %v2496_v41, %v2592_v30  ;;  %v2547_v51 = vmax.f32 %v2451_v61, %v2592_v30  ;;  %v8549_v1 = vld [vmem:[#allocation24_spill] sm:$0xff] }
 0x1bc   : > { %v2672_v58 = vmax.f32 %v2576_v18, %v2624_v11  ;;  %2714 = vst.msk [vmem:[#allocation3 + $0xd0] sm:$0xf] %vm1446_vm4, %v2666_v50  ;;  %v8539_v57 = vld [vmem:[#allocation31_spill] sm:$0xff]  ;;  %v8542_v34 = vld [vmem:[#allocation42_spill] sm:$0xff]  ;;  %v8545_v36 = vld [vmem:[#allocation49_spill] sm:$0xff]  ;;  %v2353_v21 = vmax.f32 %v7154_v39, %v7156_v45  ;;  %5040 = vmatmul.mubr.msk.bf16.vlgmr.msra.gmra.mrb[32].mxu0 %vm909_vm2, %v1782_v27  ;;  %v2454_v11 = vmax.f32 %v2358_v63, %v2592_v30 }
 0x1bd   : > { %v1152_v43 = vmax.f32 %v8539_v57, %v8538_v40  ;;  %2717 = vst.msk [vmem:[#allocation3 + $0xe8] sm:$0xf] %vm1446_vm4, %v2669_v48  ;;  %v8544_v60 = vld [vmem:[#allocation54_spill] sm:$0xff]  ;;  %v8546_v55 = vld [vmem:[#allocation33_spill] sm:$0xff]  ;;  %v8547_v23 = vld [vmem:[#allocation43_spill] sm:$0xff]  ;;  %v2457_v6 = vmax.f32 %v2361_v32, %v2409_v49  ;;  %v2544_v25 = vmax.f32 %v2448_v0, %v2496_v41  ;;  %v2643_v14 = vmax.f32 %v2547_v51, %v2409_v49 }
 0x1be   : > { %2718 = vst.msk [vmem:[#allocation3 + $0xf0] sm:$0xff] %vm909_vm2, %v2670_v10  ;;  %2721 = vst.msk [vmem:[#allocation3 + $0x108] sm:$0xff] %vm909_vm2, %v2673_v53  ;;  %v1153_v16 = vmax.f32 %v8545_v36, %v8544_v60  ;;  %v8550_v19 = vld [vmem:[#allocation23_spill] sm:$0xff]  ;;  %v8553_v54 = vld [vmem:[#allocation46_spill] sm:$0xff] }
 0x1bf   : > { %2720 = vst.msk [vmem:[#allocation3 + $0x100] sm:$0xf] %vm1446_vm4, %v2672_v58  ;;  %v7165_v33 = vmax.f32 %v1152_v43, %v8546_v55  ;;  %v8551_v37 = vpack.c.bf16 %v8549_v1, %v8550_v19  ;;  %v1201_v48 = vld [vmem:[#allocation2 + $0x236] sm:$0xf]  ;;  %v7182_v10 = vld [vmem:[#allocation3 + $0x60] sm:$0xff]  ;;  %v7194_v15 = vld [vmem:[#allocation3 + $0x68] sm:$0xff] }
 0x1c0   : > { %2722 = vst.msk [vmem:[#allocation3 + $0x110] sm:$0xff] %vm909_vm2, %v2674_v20  ;;  %2724 = vst.msk [vmem:[#allocation3 + $0x120] sm:$0xff] %vm909_vm2, %v2676_v7  ;;  %v7186_v58 = vld [vmem:[#allocation2 + $0x16] sm:$0xf]  ;;  %v2550_v20 = vmax.f32 %v2454_v11, %v2409_v49  ;;  %v8561_v43 = vld [vmem:[#allocation4_spill] sm:$0xff]  ;;  %v7204_v4 = vmax.f32 %v1153_v16, %v1201_v48 }
 0x1c1   : > { %2725 = vst.msk [vmem:[#allocation3 + $0x128] sm:$0xff] %vm909_vm2, %v2677_v47  ;;  %2227 = vst.msk [vmem:[#allocation2 + $0x70] sm:$0xff] %vm909_vm2, %v1752_v31  ;;  %5043 = vmatprep.mubr.msk.bf16.mxu0 %vm909_vm2, %v8551_v37  ;;  %v7188_v53 = vld [vmem:[#allocation2 + $0x36] sm:$0xf]  ;;  %5072 = vmatpush3.bf16.msra.mxu0 %v8561_v43  ;;  %v7198_v41 = vld [vmem:[#allocation3 + $0x80] sm:$0xff]  ;;  %v2640_v31 = vmax.f32 %v2544_v25, %v2592_v30  ;;  %v7253_v43 = vmax.f32 %v2353_v21, %v7184_v29 }
 0x1c2   : > { %v8558_v7 = vld [vmem:[#allocation55_spill] sm:$0xff]  ;;  %v7200_v3 = vld [vmem:[#allocation3 + $0x61] sm:$0xff]  ;;  %v7206_v24 = vld [vmem:[#allocation3 + $0x90] sm:$0xff]  ;;  %2691 = vst.msk [vmem:[#allocation3 + $0x18] sm:$0xff] %vm909_vm2, %v2643_v14 }
 0x1c3   : > { %v2553_v47 = vmax.f32 %v2457_v6, %v8558_v7  ;;  %v7196_v2 = vld [vmem:[#allocation3 + $0x78] sm:$0xff]  ;;  %v7210_v27 = vld [vmem:[#allocation3 + $0xa8] sm:$0xff]  ;;  %v2646_v60 = vmax.f32 %v2550_v20, %v8558_v7  ;;  %v8562_v16 = vld [vmem:[#allocation34_spill] sm:$0xff]  ;;  %2688 = vst.msk [vmem:[#allocation3] sm:$0xff] %vm909_vm2, %v2640_v31  ;;  %v2808_v21 = vmax.f32 %v7182_v10, %v7200_v3 }
 0x1c4   : > { %v7202_v39 = vld [vmem:[#allocation2 + $0x256] sm:$0xf]  ;;  %v7212_v63 = vld [vmem:[#allocation3 + $0x69] sm:$0xff]  ;;  %v7216_v61 = vld [vmem:[#allocation3 + $0x81] sm:$0xff]  ;;  %v1345_v55 = vmax.f32 %v7165_v33, %v8562_v16 }
 0x1c5   : > { %v7208_v49 = vld [vmem:[#allocation3 + $0x98] sm:$0xff]  ;;  %v2649_v30 = vmax.f32 %v2553_v47, %v6927_v52  ;;  %v1394_v36 = vld [vmem:[#allocation2 + $0x26e] sm:$0xff]  ;;  %v7225_v11 = vld [vmem:[#allocation3 + $0xc0] sm:$0xff]  ;;  %2694 = vst.msk [vmem:[#allocation3 + $0x30] sm:$0xff] %vm909_vm2, %v2646_v60  ;;  %v2809_v26 = vmax.f32 %v7194_v15, %v7212_v63  ;;  %v2811_v3 = vmax.f32 %v7198_v41, %v7216_v61  ;;  %v1346_v60 = vmax.f32 %v7204_v4, %v7202_v39 }
 0x1c6   : > { %v7214_v32 = vld [vmem:[#allocation3 + $0x79] sm:$0xff]  ;;  %v7223_v0 = vld [vmem:[#allocation3 + $0xb0] sm:$0xff]  ;;  %v7227_v6 = vld [vmem:[#allocation3 + $0xc8] sm:$0xff] }
 0x1c7   : > { %v7229_v51 = vld [vmem:[#allocation3 + $0x91] sm:$0xff]  ;;  %v7231_v1 = vld [vmem:[#allocation3 + $0x99] sm:$0xff]  ;;  %v7233_v19 = vld [vmem:[#allocation3 + $0xa9] sm:$0xff]  ;;  %2697 = vst.msk [vmem:[#allocation3 + $0x48] sm:$0xff] %vm909_vm2, %v2649_v30  ;;  %v2810_v10 = vmax.f32 %v7196_v2, %v7214_v32 }
 0x1c8   : > { %v1395_v52 = vld [vmem:[#allocation2 + $0x276] sm:$0xf]  ;;  %v7238_v25 = vld [vmem:[#allocation3 + $0xe0] sm:$0xff]  ;;  %v7248_v47 = vld [vmem:[#allocation3 + $0xc9] sm:$0xff]  ;;  %v2812_v35 = vmax.f32 %v7206_v24, %v7229_v51  ;;  %v2813_v15 = vmax.f32 %v7208_v49, %v7231_v1  ;;  %v2814_v2 = vmax.f32 %v7210_v27, %v7233_v19 }
 0x1c9   : > { %v7236_v37 = vld [vmem:[#allocation3 + $0xd8] sm:$0xff]  ;;  %v7240_v33 = vld [vmem:[#allocation3 + $0xf0] sm:$0xff]  ;;  %v7246_v7 = vld [vmem:[#allocation3 + $0xc1] sm:$0xff]  ;;  %v2817_v4 = vmax.f32 %v7227_v6, %v7248_v47  ;;  %v1443_v51 = vmax.f32 %v1346_v60, %v1395_v52 }
 0x1ca   : > { %v7242_v48 = vld [vmem:[#allocation3 + $0xf8] sm:$0xff]  ;;  %v8563_v31 = vld [vmem:[#allocation29_spill] sm:$0xff]  ;;  %v8564_v16 = vld [vmem:[#allocation30_spill] sm:$0xff]  ;;  %v2816_v39 = vmax.f32 %v7225_v11, %v7246_v7 }
 0x1cb   : > { %v7244_v20 = vld [vmem:[#allocation3 + $0xb1] sm:$0xff]  ;;  %v8566_v50 = vld [vmem:[#allocation36_spill] sm:$0xff]  ;;  %v7261_v9 = vld [vmem:[#allocation3 + $0x108] sm:$0xff]  ;;  %1492 = vst.msk [vmem:[#allocation3 + $0x178] sm:$0xf] %vm1446_vm4, %v1443_v51  ;;  %v8577_v51 = vpack.c.bf16 %v8564_v16, %v8563_v31 }
 0x1cc   : > { %v8565_v59 = vld [vmem:[#allocation35_spill] sm:$0xff]  ;;  %v7265_v5 = vld [vmem:[#allocation3 + $0xe1] sm:$0xff]  ;;  %v8568_v57 = vld [vmem:[#allocation38_spill] sm:$0xff] }
 0x1cd   : > { %v7263_v18 = vld [vmem:[#allocation3 + $0xd9] sm:$0xff]  ;;  %v7267_v14 = vld [vmem:[#allocation3 + $0xf1] sm:$0xff]  ;;  %v8567_v17 = vld [vmem:[#allocation37_spill] sm:$0xff] }
 0x1ce   : > { %v8569_v62 = vld [vmem:[#allocation39_spill] sm:$0xff]  ;;  %v8570_v42 = vld [vmem:[#allocation40_spill] sm:$0xff]  ;;  %v2790_v44 = vld [vmem:[#allocation3 + $0x109] sm:$0xff]  ;;  %v2818_v1 = vmax.f32 %v7236_v37, %v7263_v18 }
 0x1cf   : > { %v7277_v30 = vld [vmem:[#allocation3 + $0x120] sm:$0xff]  ;;  %v8571_v38 = vld [vmem:[#allocation26_spill] sm:$0xff]  ;;  %v8572_v28 = vld [vmem:[#allocation25_spill] sm:$0xff]  ;;  %v2822_v6 = vmax.f32 %v7261_v9, %v2790_v44 }
 0x1d0   : > { %v2789_v40 = vld [vmem:[#allocation3 + $0xf9] sm:$0xff]  ;;  %v7279_v12 = vld [vmem:[#allocation3 + $0x121] sm:$0xff]  ;;  %v8573_v8 = vpack.c.bf16 %v8571_v38, %v8572_v28  ;;  %v2841_v32 = vld [vmem:[#allocation3 + $0x6a] sm:$0xff]  ;;  %v2815_v28 = vmax.f32 %v7223_v0, %v7244_v20 }
 0x1d1   : > { %v2840_v63 = vld [vmem:[#allocation3 + $0x62] sm:$0xff]  ;;  %v2842_v41 = vld [vmem:[#allocation3 + $0x7a] sm:$0xff]  ;;  %v2844_v49 = vld [vmem:[#allocation3 + $0x92] sm:$0xff]  ;;  %v7320_v37 = vmax.f32 %v2809_v26, %v2841_v32 }
 0x1d2   : > { %5044 = vmatmul.mubr.msk.bf16.gmra.mrb[36].mxu0 %vm909_vm2, %v8573_v8  ;;  %v8574_v61 = vld [vmem:[#allocation28_spill] sm:$0xff]  ;;  %v8575_v46 = vld [vmem:[#allocation27_spill] sm:$0xff]  ;;  %v1442_v8 = vmax.f32 %v1345_v55, %v1394_v36  ;;  %v2820_v36 = vmax.f32 %v7240_v33, %v7267_v14  ;;  %v2821_v55 = vmax.f32 %v7242_v48, %v2789_v40  ;;  %v2846_v0 = vld [vmem:[#allocation3 + $0xaa] sm:$0xff]  ;;  %v7318_v18 = vmax.f32 %v2808_v21, %v2840_v63 }
 0x1d3   : > { %v8576_v38 = vpack.c.bf16 %v8574_v61, %v8575_v46  ;;  %v2843_v24 = vld [vmem:[#allocation3 + $0x82] sm:$0xff]  ;;  %v2845_v27 = vld [vmem:[#allocation3 + $0x9a] sm:$0xff]  ;;  %v2819_v46 = vmax.f32 %v7238_v25, %v7265_v5  ;;  %v2847_v11 = vld [vmem:[#allocation3 + $0xb2] sm:$0xff]  ;;  %v7322_v5 = vmax.f32 %v2810_v10, %v2842_v41  ;;  %v2824_v40 = vmax.f32 %v7277_v30, %v7279_v12 }
 0x1d4   : > { %v2848_v19 = vld [vmem:[#allocation3 + $0xc2] sm:$0xff]  ;;  %v2849_v20 = vld [vmem:[#allocation3 + $0xca] sm:$0xff]  ;;  %1491 = vst.msk [vmem:[#allocation3 + $0x170] sm:$0xff] %vm909_vm2, %v1442_v8  ;;  %v2850_v52 = vld [vmem:[#allocation3 + $0xda] sm:$0xff]  ;;  %v7327_v48 = vmax.f32 %v2811_v3, %v2843_v24  ;;  %v7329_v14 = vmax.f32 %v2812_v35, %v2844_v49  ;;  %v7331_v44 = vmax.f32 %v2813_v15, %v2845_v27  ;;  %v7333_v60 = vmax.f32 %v2814_v2, %v2846_v0 }
 0x1d5   : > { %5047 = vmatprep.mubr.msk.bf16.mxu0 %vm909_vm2, %v8576_v38  ;;  %v2851_v7 = vld [vmem:[#allocation3 + $0xe2] sm:$0xff]  ;;  %v2852_v47 = vld [vmem:[#allocation3 + $0xf2] sm:$0xff]  ;;  %v2853_v25 = vld [vmem:[#allocation3 + $0xfa] sm:$0xff]  ;;  %v7335_v26 = vmax.f32 %v2815_v28, %v2847_v11  ;;  %v7337_v10 = vmax.f32 %v2816_v39, %v2848_v19  ;;  %v7339_v63 = vmax.f32 %v2817_v4, %v2849_v20  ;;  %v7341_v41 = vmax.f32 %v2818_v1, %v2850_v52 }
 0x1d6   : > { %v2854_v33 = vld [vmem:[#allocation3 + $0x10a] sm:$0xff]  ;;  %v2856_v21 = vld [vmem:[#allocation3 + $0x122] sm:$0xff]  ;;  %v7343_v3 = vmax.f32 %v2819_v46, %v2851_v7  ;;  %v7345_v35 = vmax.f32 %v2820_v36, %v2852_v47  ;;  %v7347_v15 = vmax.f32 %v2821_v55, %v2853_v25  ;;  %v2908_v61 = vld [vmem:[#allocation3 + $0x93] sm:$0xff]  ;;  %v8578_v20 = vpack.c.bf16 %v8566_v50, %v8565_v59 }
 0x1d7   : > { %v2904_v9 = vld [vmem:[#allocation3 + $0x63] sm:$0xff]  ;;  %v2905_v32 = vld [vmem:[#allocation3 + $0x6b] sm:$0xff]  ;;  %v2906_v12 = vld [vmem:[#allocation3 + $0x7b] sm:$0xff]  ;;  %v7349_v8 = vmax.f32 %v2822_v6, %v2854_v33  ;;  %v7360_v1 = vmax.f32 %v2824_v40, %v2856_v21  ;;  %v2940_v11 = vmax.f32 %v7329_v14, %v2908_v61 }
 0x1d8   : > { %v2907_v30 = vld [vmem:[#allocation3 + $0x83] sm:$0xff]  ;;  %v2909_v2 = vld [vmem:[#allocation3 + $0x9b] sm:$0xff]  ;;  %v2910_v38 = vld [vmem:[#allocation3 + $0xab] sm:$0xff]  ;;  %v2936_v24 = vmax.f32 %v7318_v18, %v2904_v9  ;;  %v2937_v49 = vmax.f32 %v7320_v37, %v2905_v32  ;;  %v2938_v27 = vmax.f32 %v7322_v5, %v2906_v12 }
 0x1d9   : > { %v2911_v28 = vld [vmem:[#allocation3 + $0xb3] sm:$0xff]  ;;  %v2912_v39 = vld [vmem:[#allocation3 + $0xc3] sm:$0xff]  ;;  %v7351_v4 = vld [vmem:[#allocation3 + $0xcb] sm:$0xff]  ;;  %v2939_v0 = vmax.f32 %v7327_v48, %v2907_v30  ;;  %v2941_v19 = vmax.f32 %v7331_v44, %v2909_v2  ;;  %v2942_v7 = vmax.f32 %v7333_v60, %v2910_v38 }
 0x1da   : > { %5048 = vmatmul.mubr.msk.bf16.gmra.mrb[40].mxu0 %vm909_vm2, %v8577_v51  ;;  %v2914_v46 = vld [vmem:[#allocation3 + $0xdb] sm:$0xff]  ;;  %v2915_v36 = vld [vmem:[#allocation3 + $0xe3] sm:$0xff]  ;;  %v7362_v55 = vld [vmem:[#allocation3 + $0xf3] sm:$0xff]  ;;  %v2943_v47 = vmax.f32 %v7335_v26, %v2911_v28  ;;  %v2944_v18 = vmax.f32 %v7337_v10, %v2912_v39  ;;  %v2945_v37 = vmax.f32 %v7339_v63, %v7351_v4 }
 0x1db   : > { %5051 = vmatprep.mubr.msk.bf16.mxu0 %vm909_vm2, %v8578_v20  ;;  %v2402_v31 = vld [vmem:[#allocation2 + $0x56] sm:$0xf]  ;;  %v2917_v16 = vld [vmem:[#allocation3 + $0xfb] sm:$0xff]  ;;  %v2918_v6 = vld [vmem:[#allocation3 + $0x10b] sm:$0xff]  ;;  %v2946_v25 = vmax.f32 %v7341_v41, %v2914_v46  ;;  %v2947_v33 = vmax.f32 %v7343_v3, %v2915_v36  ;;  %v2948_v48 = vmax.f32 %v7345_v35, %v7362_v55  ;;  %v8579_v46 = vmax.f32 %v7186_v58, %v7188_v53 }
 0x1dc   : > { %v7371_v52 = vld [vmem:[#allocation3 + $0x123] sm:$0xff]  ;;  %v7378_v5 = vld [vmem:[#allocation2 + $0x36] sm:$0xf]  ;;  %v2949_v14 = vmax.f32 %v7347_v15, %v2917_v16  ;;  %v2969_v9 = vld [vmem:[#allocation3 + $0x6c] sm:$0xff]  ;;  %v2950_v26 = vmax.f32 %v7349_v8, %v2918_v6 }
 0x1dd   : > { %v7380_v40 = vld [vmem:[#allocation2 + $0x56] sm:$0xf]  ;;  %v2968_v44 = vld [vmem:[#allocation3 + $0x64] sm:$0xff]  ;;  %v2970_v21 = vld [vmem:[#allocation3 + $0x7c] sm:$0xff]  ;;  %v7396_v30 = vmax.f32 %v2937_v49, %v2969_v9  ;;  %v2952_v3 = vmax.f32 %v7360_v1, %v7371_v52  ;;  %v2450_v36 = vmax.f32 %v8579_v46, %v2402_v31 }
 0x1de   : > { %v7382_v50 = vld [vmem:[#allocation2 + $0xd6] sm:$0xf]  ;;  %v2971_v10 = vld [vmem:[#allocation3 + $0x84] sm:$0xff]  ;;  %v2973_v32 = vld [vmem:[#allocation3 + $0x9c] sm:$0xff]  ;;  %v7394_v12 = vmax.f32 %v2936_v24, %v2968_v44  ;;  %v7398_v41 = vmax.f32 %v2938_v27, %v2970_v21  ;;  %v2357_v53 = vmax.f32 %v7378_v5, %v7380_v40  ;;  %v8580_v5 = vpack.c.bf16 %v8568_v57, %v8567_v17 }
 0x1df   : > { %v7384_v59 = vld [vmem:[#allocation2 + $0xd6] sm:$0xf]  ;;  %v2974_v35 = vld [vmem:[#allocation3 + $0xac] sm:$0xff]  ;;  %v2976_v61 = vld [vmem:[#allocation3 + $0xc4] sm:$0xff]  ;;  %v7402_v2 = vmax.f32 %v2939_v0, %v2971_v10  ;;  %v7406_v8 = vmax.f32 %v2941_v19, %v2973_v32  ;;  %v8582_v44 = vpack.c.bf16 %v8570_v42, %v8569_v62 }
 0x1e0   : > { %v7391_v60 = vld [vmem:[#allocation2 + $0xf6] sm:$0xf]  ;;  %v7408_v28 = vld [vmem:[#allocation2 + $0x8e] sm:$0xff]  ;;  %v2978_v24 = vld [vmem:[#allocation3 + $0xdc] sm:$0xff]  ;;  %v7412_v27 = vmax.f32 %v2942_v7, %v2974_v35  ;;  %v7416_v1 = vmax.f32 %v2944_v18, %v2976_v61  ;;  %3294 = vst.msk [vmem:[#allocation2 + $0xc8] sm:$0xff] %vm909_vm2, %v7394_v12 }
 0x1e1   : > { %v2972_v63 = vld [vmem:[#allocation3 + $0x94] sm:$0xff]  ;;  %v2977_v4 = vld [vmem:[#allocation3 + $0xcc] sm:$0xff]  ;;  %v2979_v49 = vld [vmem:[#allocation3 + $0xe4] sm:$0xff]  ;;  %3295 = vst.msk [vmem:[#allocation2 + $0xd0] sm:$0xff] %vm909_vm2, %v7396_v30  ;;  %v7433_v6 = vmax.f32 %v2946_v25, %v2978_v24 }
 0x1e2   : > { %v2975_v15 = vld [vmem:[#allocation3 + $0xb4] sm:$0xff]  ;;  %v7404_v38 = vmax.f32 %v2940_v11, %v2972_v63  ;;  %3296 = vst.msk [vmem:[#allocation2 + $0xe8] sm:$0xff] %vm909_vm2, %v7398_v41  ;;  %v2981_v19 = vld [vmem:[#allocation3 + $0xfc] sm:$0xff]  ;;  %v2982_v20 = vld [vmem:[#allocation3 + $0x10c] sm:$0xff]  ;;  %v7431_v16 = vmax.f32 %v2945_v37, %v2977_v4  ;;  %v7435_v52 = vmax.f32 %v2947_v33, %v2979_v49  ;;  %5052 = vmatmul.mubr.msk.bf16.gmra.mrb[44].mxu0 %vm909_vm2, %v8580_v5 }
 0x1e3   : > { %v7410_v39 = vld [vmem:[#allocation2 + $0x176] sm:$0xf]  ;;  %v7414_v51 = vmax.f32 %v2943_v47, %v2975_v15  ;;  %3297 = vst.msk [vmem:[#allocation2 + $0xf0] sm:$0xff] %vm909_vm2, %v7402_v2  ;;  %3299 = vst.msk [vmem:[#allocation2 + $0x110] sm:$0xff] %vm909_vm2, %v7406_v8  ;;  %v2596_v31 = vld [vmem:[#allocation2 + $0xae] sm:$0xff]  ;;  %v7447_v18 = vmax.f32 %v2949_v14, %v2981_v19  ;;  %v7449_v37 = vmax.f32 %v2950_v26, %v2982_v20  ;;  %5055 = vmatprep.mubr.msk.bf16.mxu0 %vm909_vm2, %v8582_v44 }
 0x1e4   : > { %v7427_v55 = vld [vmem:[#allocation2 + $0x196] sm:$0xf]  ;;  %3298 = vst.msk [vmem:[#allocation2 + $0x108] sm:$0xff] %vm909_vm2, %v7404_v38  ;;  %v2984_v7 = vld [vmem:[#allocation3 + $0x124] sm:$0xff]  ;;  %3300 = vst.msk [vmem:[#allocation2 + $0x128] sm:$0xff] %vm909_vm2, %v7412_v27  ;;  %v8581_v14 = vmax.f32 %v7156_v45, %v7184_v29 }
 0x1e5   : > { %v7429_v0 = vld [vmem:[#allocation2 + $0x196] sm:$0xf]  ;;  %3301 = vst.msk [vmem:[#allocation2 + $0x130] sm:$0xff] %vm909_vm2, %v7414_v51  ;;  %3302 = vst.msk [vmem:[#allocation2 + $0x148] sm:$0xff] %vm909_vm2, %v7416_v1  ;;  %v2266_v25 = vld [vmem:[#allocation2 + $0x6e] sm:$0xff]  ;;  %v7461_v33 = vmax.f32 %v2952_v3, %v2984_v7 }
 0x1e6   : > { %v2980_v11 = vld [vmem:[#allocation3 + $0xf4] sm:$0xff]  ;;  %3303 = vst.msk [vmem:[#allocation2 + $0x150] sm:$0xff] %vm909_vm2, %v7431_v16  ;;  %3304 = vst.msk [vmem:[#allocation2 + $0x168] sm:$0xff] %vm909_vm2, %v7433_v6  ;;  %v2452_v17 = vmax.f32 %v8581_v14, %v2266_v25  ;;  %v2545_v57 = vmax.f32 %v7253_v43, %v2266_v25  ;;  %v2362_v43 = vmax.f32 %v2266_v25, %v7408_v28  ;;  %v8583_v5 = vld [vmem:[#allocation56_spill] sm:$0xff] }
 0x1e7   : > { %v2264_v58 = vld [vmem:[#allocation2 + $0x56] sm:$0xf]  ;;  %v7445_v47 = vmax.f32 %v2948_v48, %v2980_v11  ;;  %3305 = vst.msk [vmem:[#allocation2 + $0x170] sm:$0xff] %vm909_vm2, %v7435_v52  ;;  %v2359_v48 = vmax.f32 %v7184_v29, %v2266_v25  ;;  %3307 = vst.msk [vmem:[#allocation2 + $0x190] sm:$0xff] %vm909_vm2, %v7447_v18 }
 0x1e8   : > { %v2498_v40 = vld [vmem:[#allocation2 + $0x76] sm:$0xf]  ;;  %3308 = vst.msk [vmem:[#allocation2 + $0x1a8] sm:$0xff] %vm909_vm2, %v7449_v37  ;;  %3310 = vst.msk [vmem:[#allocation2 + $0x1c8] sm:$0xff] %vm909_vm2, %v7461_v33  ;;  %v2641_v42 = vmax.f32 %v2545_v57, %v7408_v28  ;;  %v2548_v15 = vmax.f32 %v2452_v17, %v7408_v28  ;;  %v2458_v24 = vmax.f32 %v2362_v43, %v2596_v31 }
 0x1e9   : > { %v2594_v9 = vld [vmem:[#allocation2 + $0x96] sm:$0xf]  ;;  %3306 = vst.msk [vmem:[#allocation2 + $0x188] sm:$0xff] %vm909_vm2, %v7445_v47  ;;  %v2546_v45 = vmax.f32 %v2450_v36, %v2498_v40  ;;  %v2455_v3 = vmax.f32 %v2359_v48, %v7408_v28  ;;  %v3339_v46 = vld [vmem:[#allocation2 + $0xe6] sm:$0xff] }
 0x1ea   : > { %v2312_v21 = vld [vmem:[#allocation2 + $0x76] sm:$0xf]  ;;  %2689 = vst.msk [vmem:[#allocation3 + $0x8] sm:$0xff] %vm909_vm2, %v2641_v42  ;;  %v2644_v20 = vmax.f32 %v2548_v15, %v2596_v31  ;;  %v2554_v40 = vmax.f32 %v2458_v24, %v8583_v5 }
 0x1eb   : > { %v2408_v26 = vld [vmem:[#allocation2 + $0x96] sm:$0xf]  ;;  %v2360_v29 = vmax.f32 %v2264_v58, %v2312_v21  ;;  %v2642_v61 = vmax.f32 %v2546_v45, %v2594_v9  ;;  %v2551_v19 = vmax.f32 %v2455_v3, %v2596_v31  ;;  %v3336_v58 = vld [vmem:[#allocation2 + $0xc6] sm:$0xff]  ;;  %v8584_v45 = vpack.c.bf16 %v8542_v34, %v8541_v22 }
 0x1ec   : > { %v2405_v10 = vld [vmem:[#allocation2 + $0x76] sm:$0xf]  ;;  %v3342_v7 = vld [vmem:[#allocation2 + $0x106] sm:$0xff]  ;;  %v3432_v14 = vmax.f32 %v3336_v58, %v3339_v46  ;;  %2692 = vst.msk [vmem:[#allocation3 + $0x20] sm:$0xff] %vm909_vm2, %v2644_v20 }
 0x1ed   : > { %v2501_v62 = vld [vmem:[#allocation2 + $0x96] sm:$0xf]  ;;  %v2453_v32 = vmax.f32 %v2357_v53, %v2405_v10  ;;  %v2456_v4 = vmax.f32 %v2360_v29, %v2408_v26  ;;  %2690 = vst.msk [vmem:[#allocation3 + $0x10] sm:$0xf] %vm1446_vm4, %v2642_v61  ;;  %v3345_v28 = vld [vmem:[#allocation2 + $0x126] sm:$0xff]  ;;  %v3435_v17 = vmax.f32 %v3339_v46, %v3342_v7  ;;  %v2647_v44 = vmax.f32 %v2551_v19, %v8583_v5 }
 0x1ee   : > { %v2315_v63 = vld [vmem:[#allocation2 + $0x96] sm:$0xf]  ;;  %v3348_v48 = vld [vmem:[#allocation2 + $0x146] sm:$0xff]  ;;  %v3438_v31 = vmax.f32 %v3342_v7, %v3345_v28  ;;  %5056 = vmatmul.mubr.msk.bf16.gmra.mrb[48].mxu0 %vm909_vm2, %v8584_v45  ;;  %v3528_v42 = vmax.f32 %v3432_v14, %v3342_v7 }
 0x1ef   : > { %v2504_v35 = vld [vmem:[#allocation2 + $0xb6] sm:$0xf]  ;;  %v2549_v11 = vmax.f32 %v2453_v32, %v2501_v62  ;;  %v3441_v26 = vmax.f32 %v3345_v28, %v3348_v48  ;;  %v3396_v10 = vld [vmem:[#allocation2 + $0x166] sm:$0xff]  ;;  %2695 = vst.msk [vmem:[#allocation3 + $0x38] sm:$0xff] %vm909_vm2, %v2647_v44  ;;  %v8585_v32 = vpack.c.bf16 %v8548_v13, %v8547_v23  ;;  %v3531_v15 = vmax.f32 %v3435_v17, %v3345_v28 }
 0x1f0   : > { %v2597_v49 = vld [vmem:[#allocation2 + $0xb6] sm:$0xf]  ;;  %v2552_v25 = vmax.f32 %v2456_v4, %v2504_v35  ;;  %v3444_v22 = vmax.f32 %v3348_v48, %v3396_v10  ;;  %v3534_v3 = vmax.f32 %v3438_v31, %v3348_v48  ;;  %v3588_v46 = vld [vmem:[#allocation2 + $0x1a6] sm:$0xff] }
 0x1f1   : > { %v2267_v36 = vld [vmem:[#allocation2 + $0x76] sm:$0xf]  ;;  %v2645_v57 = vmax.f32 %v2549_v11, %v2597_v49  ;;  %5059 = vmatprep.mubr.msk.bf16.mxu0 %vm909_vm2, %v8585_v32  ;;  %v2736_v49 = vld [vmem:[#allocation3] sm:$0xff]  ;;  %v3627_v13 = vmax.f32 %v3531_v15, %v3348_v48  ;;  %v2737_v5 = vld [vmem:[#allocation3 + $0x8] sm:$0xff] }
 0x1f2   : > { %v2363_v53 = vmax.f32 %v2267_v36, %v2315_v63  ;;  %v3338_v9 = vld [vmem:[#allocation2 + $0xd6] sm:$0xf]  ;;  %v2648_v43 = vmax.f32 %v2552_v25, %v7384_v59  ;;  %v2650_v63 = vmax.f32 %v2554_v40, %v6929_v56  ;;  %v3492_v59 = vld [vmem:[#allocation2 + $0x186] sm:$0xff]  ;;  %v3537_v56 = vmax.f32 %v3441_v26, %v3396_v10 }
 0x1f3   : > { %v3386_v21 = vld [vmem:[#allocation2 + $0xf6] sm:$0xf]  ;;  %2693 = vst.msk [vmem:[#allocation3 + $0x28] sm:$0xf] %vm1446_vm4, %v2645_v57  ;;  %v3540_v4 = vmax.f32 %v3444_v22, %v3492_v59  ;;  %v3624_v36 = vmax.f32 %v3528_v42, %v3345_v28  ;;  %v3630_v20 = vmax.f32 %v3534_v3, %v3396_v10  ;;  %v3684_v25 = vld [vmem:[#allocation2 + $0x1c6] sm:$0xff]  ;;  %v3723_v57 = vmax.f32 %v3627_v13, %v3396_v10 }
 0x1f4   : > { %v2411_v29 = vld [vmem:[#allocation2 + $0xb6] sm:$0xf]  ;;  %v3434_v62 = vmax.f32 %v3338_v9, %v3386_v21  ;;  %2696 = vst.msk [vmem:[#allocation3 + $0x40] sm:$0xf] %vm1446_vm4, %v2648_v43  ;;  %v3633_v58 = vmax.f32 %v3537_v56, %v3492_v59  ;;  %v2768_v40 = vld [vmem:[#allocation3 + $0x1] sm:$0xff]  ;;  %v2769_v44 = vld [vmem:[#allocation3 + $0x9] sm:$0xff] }
 0x1f5   : > { %v3482_v34 = vld [vmem:[#allocation2 + $0x116] sm:$0xf]  ;;  %v2459_v61 = vmax.f32 %v2363_v53, %v2411_v29  ;;  %2698 = vst.msk [vmem:[#allocation3 + $0x50] sm:$0xff] %vm909_vm2, %v2650_v63  ;;  %v3636_v7 = vmax.f32 %v3540_v4, %v3588_v46  ;;  %v3720_v14 = vmax.f32 %v3624_v36, %v3348_v48  ;;  %v2800_v9 = vmax.f32 %v2736_v49, %v2768_v40  ;;  %v2742_v31 = vld [vmem:[#allocation3 + $0x48] sm:$0xff]  ;;  %v2739_v22 = vld [vmem:[#allocation3 + $0x20] sm:$0xff] }
 0x1f6   : > { %v3530_v35 = vmax.f32 %v3434_v62, %v3482_v34  ;;  %v3578_v24 = vld [vmem:[#allocation2 + $0x136] sm:$0xf]  ;;  %v3726_v28 = vmax.f32 %v3630_v20, %v3492_v59  ;;  %v3729_v26 = vmax.f32 %v3633_v58, %v3588_v46  ;;  %v2801_v29 = vmax.f32 %v2737_v5, %v2769_v44  ;;  %v2832_v43 = vld [vmem:[#allocation3 + $0x2] sm:$0xff]  ;;  %3771 = vst.msk [vmem:[#allocation3 + $0xa8] sm:$0xff] %vm909_vm2, %v3723_v57  ;;  %v2897_v10 = vld [vmem:[#allocation3 + $0xb] sm:$0xff] }
 0x1f7   : > { %v3674_v11 = vld [vmem:[#allocation2 + $0x156] sm:$0xf]  ;;  %v2555_v19 = vmax.f32 %v2459_v61, %v7382_v50  ;;  %v3732_v45 = vmax.f32 %v3636_v7, %v3684_v25  ;;  %v2833_v50 = vld [vmem:[#allocation3 + $0xa] sm:$0xff]  ;;  %3768 = vst.msk [vmem:[#allocation3 + $0x90] sm:$0xff] %vm909_vm2, %v3720_v14  ;;  %v2864_v48 = vmax.f32 %v2800_v9, %v2832_v43  ;;  %v8588_v3 = vld [vmem:[#allocation48_spill] sm:$0xff] }
 0x1f8   : > { %v3626_v23 = vmax.f32 %v3530_v35, %v3578_v24  ;;  %v2738_v53 = vld [vmem:[#allocation3 + $0x18] sm:$0xff]  ;;  %v2740_v21 = vld [vmem:[#allocation3 + $0x30] sm:$0xff]  ;;  %v2896_v62 = vld [vmem:[#allocation3 + $0x3] sm:$0xff]  ;;  %3774 = vst.msk [vmem:[#allocation3 + $0xc0] sm:$0xff] %vm909_vm2, %v3726_v28 }
 0x1f9   : > { %v8586_v42 = vld [vmem:[#allocation45_spill] sm:$0xff]  ;;  %v2651_v32 = vmax.f32 %v2555_v19, %v7391_v60  ;;  %v2741_v34 = vld [vmem:[#allocation3 + $0x38] sm:$0xff]  ;;  %3777 = vst.msk [vmem:[#allocation3 + $0xd8] sm:$0xff] %vm909_vm2, %v3729_v26  ;;  %3780 = vst.msk [vmem:[#allocation3 + $0xf0] sm:$0xff] %vm909_vm2, %v3732_v45  ;;  %v2928_v49 = vmax.f32 %v2864_v48, %v2896_v62 }
 0x1fa   : > { %v3722_v17 = vmax.f32 %v3626_v23, %v3674_v11  ;;  %v8587_v63 = vpack.c.bf16 %v8553_v54, %v8586_v42  ;;  %v8589_v59 = vld [vmem:[#allocation47_spill] sm:$0xff]  ;;  %v2865_v54 = vmax.f32 %v2801_v29, %v2833_v50  ;;  %v2960_v15 = vld [vmem:[#allocation3 + $0x4] sm:$0xff]  ;;  %v7525_v4 = vld [vmem:[#allocation3 + $0x170] sm:$0xff] }
 0x1fb   : > { %v8590_v35 = vpack.c.bf16 %v8588_v3, %v8589_v59  ;;  %v2770_v61 = vld [vmem:[#allocation3 + $0x19] sm:$0xff]  ;;  %v2771_v56 = vld [vmem:[#allocation3 + $0x21] sm:$0xff]  ;;  %v7527_v60 = vld [vmem:[#allocation3 + $0x169] sm:$0xff]  ;;  %2699 = vst.msk [vmem:[#allocation3 + $0x58] sm:$0xf] %vm1446_vm4, %v2651_v32  ;;  %v2992_v14 = vmax.f32 %v2928_v49, %v2960_v15 }
 0x1fc   : > { %5060 = vmatmul.mubr.msk.bf16.gmra.mrb[52].mxu0 %vm909_vm2, %v8587_v63  ;;  %3770 = vst.msk [vmem:[#allocation3 + $0xa0] sm:$0xf] %vm1446_vm4, %v3722_v17  ;;  %v7529_v24 = vld [vmem:[#allocation3 + $0x171] sm:$0xff]  ;;  %v2773_v36 = vld [vmem:[#allocation3 + $0x39] sm:$0xff]  ;;  %v2774_v23 = vld [vmem:[#allocation3 + $0x49] sm:$0xff]  ;;  %v2802_v13 = vmax.f32 %v2738_v53, %v2770_v61  ;;  %v2803_v11 = vmax.f32 %v2739_v22, %v2771_v56  ;;  %v2929_v19 = vmax.f32 %v2865_v54, %v2897_v10 }
 0x1fd   : > { %5063 = vmatprep.mubr.msk.bf16.mxu0 %vm909_vm2, %v8590_v35  ;;  %v2772_v46 = vld [vmem:[#allocation3 + $0x31] sm:$0xff]  ;;  %v2805_v7 = vmax.f32 %v2741_v34, %v2773_v36  ;;  %v2806_v25 = vmax.f32 %v2742_v31, %v2774_v23  ;;  %v2834_v5 = vld [vmem:[#allocation3 + $0x1a] sm:$0xff]  ;;  %v2835_v40 = vld [vmem:[#allocation3 + $0x22] sm:$0xff]  ;;  %3286 = vst.msk [vmem:[#allocation2 + $0x48] sm:$0xff] %vm909_vm2, %v2992_v14  ;;  %v1588_v22 = vmax.f32 %v7525_v4, %v7529_v24 }
 0x1fe   : > { %v2961_v20 = vld [vmem:[#allocation3 + $0xc] sm:$0xff]  ;;  %v2804_v58 = vmax.f32 %v2740_v21, %v2772_v46  ;;  %v2837_v57 = vld [vmem:[#allocation3 + $0x3a] sm:$0xff]  ;;  %v2866_v9 = vmax.f32 %v2802_v13, %v2834_v5  ;;  %v2867_v28 = vmax.f32 %v2803_v11, %v2835_v40  ;;  %v2899_v53 = vld [vmem:[#allocation3 + $0x23] sm:$0xff] }
 0x1ff   : > { %v2836_v17 = vld [vmem:[#allocation3 + $0x32] sm:$0xff]  ;;  %v2838_v44 = vld [vmem:[#allocation3 + $0x4a] sm:$0xff]  ;;  %v2993_v26 = vmax.f32 %v2929_v19, %v2961_v20  ;;  %v2869_v29 = vmax.f32 %v2805_v7, %v2837_v57  ;;  %v2898_v50 = vld [vmem:[#allocation3 + $0x1b] sm:$0xff] }
 0x200   : > { %v2868_v45 = vmax.f32 %v2804_v58, %v2836_v17  ;;  %v2870_v43 = vmax.f32 %v2806_v25, %v2838_v44  ;;  %v1523_v62 = vld [vmem:[#allocation3 + $0x168] sm:$0xff]  ;;  %v7532_v42 = vld [vmem:[#allocation2 + $0x116] sm:$0xf]  ;;  %v2901_v31 = vld [vmem:[#allocation3 + $0x3b] sm:$0xff]  ;;  %v2930_v48 = vmax.f32 %v2866_v9, %v2898_v50  ;;  %v2931_v10 = vmax.f32 %v2867_v28, %v2899_v53 }
 0x201   : > { %v2900_v21 = vld [vmem:[#allocation3 + $0x33] sm:$0xff]  ;;  %v2902_v63 = vld [vmem:[#allocation3 + $0x4b] sm:$0xff]  ;;  %v1587_v32 = vmax.f32 %v1523_v62, %v7527_v60  ;;  %v3024_v34 = vpack.c.bf16 %v2993_v26, %v2992_v14  ;;  %3287 = vst.msk [vmem:[#allocation2 + $0x50] sm:$0xff] %vm909_vm2, %v2993_v26  ;;  %v2933_v35 = vmax.f32 %v2869_v29, %v2901_v31  ;;  %v2962_v15 = vld [vmem:[#allocation3 + $0x1c] sm:$0xff] }
 0x202   : > { %v2743_v3 = vld [vmem:[#allocation3 + $0x50] sm:$0xff]  ;;  %v2932_v59 = vmax.f32 %v2868_v45, %v2900_v21  ;;  %v2934_v54 = vmax.f32 %v2870_v43, %v2902_v63  ;;  %v2963_v61 = vld [vmem:[#allocation3 + $0x24] sm:$0xff]  ;;  %v8591_v56 = vld [vmem:[#allocation51_spill] sm:$0xff]  ;;  %v2994_v24 = vmax.f32 %v2930_v48, %v2962_v15 }
 0x203   : > { %v8592_v49 = vld [vmem:[#allocation50_spill] sm:$0xff]  ;;  %v2965_v13 = vld [vmem:[#allocation3 + $0x3c] sm:$0xff]  ;;  %v2995_v11 = vmax.f32 %v2931_v10, %v2963_v61  ;;  %v8595_v58 = vld [vmem:[#allocation53_spill] sm:$0xff]  ;;  %5107 = vmatprep.mubr.msk.bf16.mxu1 %vm909_vm2, %v3024_v34 }
 0x204   : > { %v8593_v46 = vpack.c.bf16 %v8591_v56, %v8592_v49  ;;  %v1619_v36 = vld [vmem:[#allocation3 + $0x16a] sm:$0xff]  ;;  %v7543_v23 = vld [vmem:[#allocation2 + $0x16] sm:$0xf]  ;;  %v8596_v7 = vld [vmem:[#allocation52_spill] sm:$0xff]  ;;  %v2997_v17 = vmax.f32 %v2933_v35, %v2965_v13  ;;  %3288 = vst.msk [vmem:[#allocation2 + $0x68] sm:$0xff] %vm909_vm2, %v2994_v24 }
 0x205   : > { %v2964_v60 = vld [vmem:[#allocation3 + $0x34] sm:$0xff]  ;;  %v2966_v4 = vld [vmem:[#allocation3 + $0x4c] sm:$0xff]  ;;  %v8597_v25 = vpack.c.bf16 %v8595_v58, %v8596_v7  ;;  %v3025_v50 = vpack.c.bf16 %v2995_v11, %v2994_v24  ;;  %3289 = vst.msk [vmem:[#allocation2 + $0x70] sm:$0xff] %vm909_vm2, %v2995_v11  ;;  %v1651_v62 = vmax.f32 %v1587_v32, %v1619_v36 }
 0x206   : > { %5064 = vmatmul.mubr.msk.bf16.gmra.mrb[56].mxu0 %vm909_vm2, %v8593_v46  ;;  %v8594_v19 = vld [vmem:[#allocation62_spill] sm:$0xff]  ;;  %v2996_v14 = vmax.f32 %v2932_v59, %v2964_v60  ;;  %v7552_v57 = vmax.f32 %v2934_v54, %v2966_v4  ;;  %v8598_v44 = vld [vmem:[#allocation61_spill] sm:$0xff]  ;;  %v8599_v9 = vld [vmem:[#allocation59_spill] sm:$0xff]  ;;  %3291 = vst.msk [vmem:[#allocation2 + $0x90] sm:$0xff] %vm909_vm2, %v2997_v17 }
 0x207   : > { %v4153_v20 = vsel %vm1847_vm3, %v8594_v19, 0  ;;  %5067 = vmatprep.mubr.msk.bf16.mxu0 %vm909_vm2, %v8597_v25  ;;  %v3392_v5 = vld [vmem:[#allocation2 + $0x136] sm:$0xf]  ;;  %v2392_v28 = vmax.f32 %v8599_v9, %v8598_v44  ;;  %v7560_v53 = vld [vmem:[#allocation2 + $0x1ee] sm:$0xff]  ;;  %5108 = vmatmul.mubr.msk.bf16.vlgmr.msra.gmra.mrb[16].mxu1 %vm909_vm2, %v3025_v50  ;;  %v8600_v25 = vld [vmem:[#allocation12_spill] sm:$0xff] }
 0x208   : > { %v2775_v40 = vld [vmem:[#allocation3 + $0x51] sm:$0xff]  ;;  %3290 = vst.msk [vmem:[#allocation2 + $0x88] sm:$0xff] %vm909_vm2, %v2996_v14  ;;  %3292 = vst.msk [vmem:[#allocation2 + $0xa8] sm:$0xff] %vm909_vm2, %v7552_v57  ;;  %v3026_v34 = vpack.c.bf16 %v2997_v17, %v2996_v14  ;;  %5140 = vmatpush3.bf16.msra.mxu1 %v4153_v20  ;;  %v2395_v61 = vmax.f32 %v8598_v44, %v7560_v53  ;;  %v8601_v44 = vld [vmem:[#allocation60_spill] sm:$0xff] }
 0x209   : > { %v1620_v26 = vld [vmem:[#allocation3 + $0x172] sm:$0xff]  ;;  %v2807_v43 = vmax.f32 %v2743_v3, %v2775_v40  ;;  %v7578_v56 = vmax.f32 %v2392_v28, %v7560_v53 }
 0x20a   : > { %v7556_v45 = vld [vmem:[#allocation2 + $0x36] sm:$0xf]  ;;  %v1652_v21 = vmax.f32 %v1588_v22, %v1620_v26  ;;  %v7568_v32 = vld [vmem:[#allocation2 + $0x20e] sm:$0xff]  ;;  %5111 = vmatprep.mubr.msk.bf16.mxu1 %vm909_vm2, %v3026_v34  ;;  %v2387_v34 = vmax.f32 %v7410_v39, %v7429_v0 }
 0x20b   : > { %v3341_v29 = vld [vmem:[#allocation2 + $0xf6] sm:$0xf]  ;;  %v1683_v49 = vld [vmem:[#allocation3 + $0x16b] sm:$0xff] }
 0x20c   : > { %v3344_v31 = vld [vmem:[#allocation2 + $0x116] sm:$0xf]  ;;  %v3437_v63 = vmax.f32 %v3341_v29, %v7532_v42  ;;  %v3325_v13 = vld [vmem:[#allocation2 + $0x4e] sm:$0xff]  ;;  %v1715_v11 = vmax.f32 %v1651_v62, %v1683_v49 }
 0x20d   : > { %v3488_v48 = vld [vmem:[#allocation2 + $0x156] sm:$0xf]  ;;  %v3440_v59 = vmax.f32 %v3344_v31, %v3392_v5  ;;  %v5558_v58 = vld [vmem:[#allocation2 + $0x2e] sm:$0xff]  ;;  %v3511_v5 = vmax.f32 %v8600_v25, %v3325_v13  ;;  %v7587_v31 = vld [vmem:[#allocation2 + $0x1e6] sm:$0xff] }
 0x20e   : > { %v2839_v10 = vld [vmem:[#allocation3 + $0x52] sm:$0xff]  ;;  %v3418_v7 = vmax.f32 %v5558_v58, %v3325_v13 }
 0x20f   : > { %v3323_v3 = vld [vmem:[#allocation2 + $0x36] sm:$0xf]  ;;  %v2871_v54 = vmax.f32 %v2807_v43, %v2839_v10  ;;  %v7580_v36 = vmax.f32 %v3440_v59, %v3488_v48  ;;  %v1747_v14 = vld [vmem:[#allocation3 + $0x16c] sm:$0xff]  ;;  %v2584_v10 = vmax.f32 %v7578_v56, %v7568_v32 }
 0x210   : > { %v3485_v35 = vld [vmem:[#allocation2 + $0x136] sm:$0xf]  ;;  %v1779_v43 = vmax.f32 %v1715_v11, %v1747_v14  ;;  %v7589_v48 = vld [vmem:[#allocation2 + $0x6e] sm:$0xff] }
 0x211   : > { %v7572_v22 = vld [vmem:[#allocation2 + $0x156] sm:$0xf]  ;;  %v3533_v20 = vmax.f32 %v3437_v63, %v3485_v35  ;;  %v7594_v63 = vmax.f32 %v2395_v61, %v7568_v32  ;;  %v7604_v35 = vld [vmem:[#allocation2 + $0x8e] sm:$0xff]  ;;  %v3028_v61 = vpack.c.bf16 %v7396_v30, %v7394_v12  ;;  %v3421_v49 = vmax.f32 %v3325_v13, %v7589_v48 }
 0x212   : > { %v2903_v15 = vld [vmem:[#allocation3 + $0x53] sm:$0xff]  ;;  %2254 = vst.msk [vmem:[#allocation2 + $0x228] sm:$0xff] %vm909_vm2, %v1779_v43  ;;  %v3424_v13 = vmax.f32 %v7589_v48, %v7604_v35 }
 0x213   : > { %v1684_v46 = vld [vmem:[#allocation3 + $0x173] sm:$0xff]  ;;  %v2935_v4 = vmax.f32 %v2871_v54, %v2903_v15  ;;  %v3607_v54 = vmax.f32 %v3511_v5, %v7589_v48 }
 0x214   : > { %v7582_v60 = vld [vmem:[#allocation2 + $0x176] sm:$0xf]  ;;  %v1716_v19 = vmax.f32 %v1652_v21, %v1684_v46  ;;  %v2398_v21 = vmax.f32 %v7560_v53, %v7568_v32 }
 0x215   : > { %v3371_v24 = vld [vmem:[#allocation2 + $0x56] sm:$0xf]  ;;  %v3632_v59 = vmax.f32 %v7580_v36, %v7582_v60  ;;  %v3703_v11 = vmax.f32 %v3607_v54, %v7604_v35 }
 0x216   : > { %v2967_v40 = vld [vmem:[#allocation3 + $0x54] sm:$0xff]  ;;  %v3419_v29 = vmax.f32 %v3323_v3, %v3371_v24  ;;  %v3629_v3 = vmax.f32 %v3533_v20, %v7572_v22  ;;  %v2394_v20 = vmax.f32 %v8601_v44, %v7587_v31 }
 0x217   : > { %v1748_v17 = vld [vmem:[#allocation3 + $0x174] sm:$0xff]  ;;  %v2999_v26 = vmax.f32 %v2935_v4, %v2967_v40  ;;  %v3514_v4 = vmax.f32 %v3418_v7, %v7589_v48  ;;  %v7625_v7 = vld [vmem:[#allocation2 + $0x206] sm:$0xff]  ;;  %3751 = vst.msk [vmem:[#allocation3 + $0x8] sm:$0xff] %vm909_vm2, %v3703_v11 }
 0x218   : > { %v8602_v9 = vld [vmem:[#allocation58_spill] sm:$0xff]  ;;  %v1780_v50 = vmax.f32 %v1716_v19, %v1748_v17 }
 0x219   : > { %v2391_v28 = vmax.f32 %v8602_v9, %v8601_v44  ;;  %v3467_v62 = vld [vmem:[#allocation2 + $0x76] sm:$0xf]  ;;  %3293 = vst.msk [vmem:[#allocation2 + $0xb0] sm:$0xff] %vm909_vm2, %v2999_v26  ;;  %v3027_v46 = vpack.c.bf16 %v2999_v26, %v7552_v57  ;;  %v3517_v57 = vmax.f32 %v3421_v49, %v7604_v35  ;;  %v3610_v40 = vmax.f32 %v3514_v4, %v7604_v35  ;;  %v8603_v44 = vld [vmem:[#allocation8_spill] sm:$0xff] }
 0x21a   : > { %v3374_v15 = vld [vmem:[#allocation2 + $0x76] sm:$0xf]  ;;  %2255 = vst.msk [vmem:[#allocation2 + $0x230] sm:$0xff] %vm909_vm2, %v1780_v50  ;;  %v1796_v36 = vpack.c.bf16 %v1780_v50, %v1779_v43  ;;  %v3515_v24 = vmax.f32 %v3419_v29, %v3467_v62  ;;  %v3568_v50 = vld [vmem:[#allocation2 + $0xce] sm:$0xff]  ;;  %v3029_v35 = vpack.c.bf16 %v7402_v2, %v7398_v41 }
 0x21b   : > { %v3563_v22 = vld [vmem:[#allocation2 + $0x96] sm:$0xf]  ;;  %v7614_v60 = vmax.f32 %v2391_v28, %v7587_v31  ;;  %5112 = vmatmul.mubr.msk.bf16.gmra.mrb[20].mxu1 %vm909_vm2, %v3027_v46 }
 0x21c   : > { %v3326_v19 = vld [vmem:[#allocation2 + $0x56] sm:$0xf]  ;;  %5068 = vmatmul.mubr.msk.bf16.gmra.mrb[60].mxu0 %vm909_vm2, %v1796_v36  ;;  %v3611_v14 = vmax.f32 %v3515_v24, %v3563_v22  ;;  %5115 = vmatprep.mubr.msk.bf16.mxu1 %vm909_vm2, %v3028_v61 }
 0x21d   : > { %v3470_v12 = vld [vmem:[#allocation2 + $0x96] sm:$0xf]  ;;  %v3422_v58 = vmax.f32 %v3326_v19, %v3374_v15  ;;  %v3030_v19 = vpack.c.bf16 %v7406_v8, %v7404_v38 }
 0x21e   : > { %v3377_v30 = vld [vmem:[#allocation2 + $0x96] sm:$0xf] }
 0x21f   : > { %v7627_v25 = vld [vmem:[#allocation2 + $0x216] sm:$0xf]  ;;  %v3518_v48 = vmax.f32 %v3422_v58, %v3470_v12  ;;  %v3664_v12 = vld [vmem:[#allocation2 + $0xee] sm:$0xff]  ;;  %v7650_v58 = vld [vmem:[#allocation2 + $0x246] sm:$0xff] }
 0x220   : > { %v3677_v5 = vld [vmem:[#allocation2 + $0x176] sm:$0xf]  ;;  %v3472_v2 = vld [vmem:[#allocation2 + $0xae] sm:$0xff] }
 0x221   : > { %v3329_v17 = vld [vmem:[#allocation2 + $0x76] sm:$0xf]  ;;  %v3725_v26 = vmax.f32 %v3629_v3, %v3677_v5  ;;  %v2397_v3 = vmax.f32 %v7587_v31, %v7625_v7  ;;  %v3520_v5 = vmax.f32 %v3424_v13, %v3472_v2  ;;  %v2446_v41 = vld [vmem:[#allocation2 + $0x22e] sm:$0xff] }
 0x222   : > { %v8604_v9 = vld [vmem:[#allocation6_spill] sm:$0xff]  ;;  %v3425_v62 = vmax.f32 %v3329_v17, %v3377_v30  ;;  %v3613_v17 = vmax.f32 %v3517_v57, %v3472_v2 }
 0x223   : > { %v8605_v28 = vpack.c.bf16 %v8603_v44, %v8604_v9  ;;  %v3680_v29 = vld [vmem:[#allocation2 + $0x196] sm:$0xf]  ;;  %3773 = vst.msk [vmem:[#allocation3 + $0xb8] sm:$0xf] %vm1446_vm4, %v3725_v26  ;;  %v3706_v44 = vmax.f32 %v3610_v40, %v3472_v2  ;;  %v3616_v8 = vmax.f32 %v3520_v5, %v3568_v50  ;;  %v2494_v40 = vmax.f32 %v2398_v21, %v2446_v41 }
 0x224   : > { %v7636_v43 = vld [vmem:[#allocation2 + $0x1b6] sm:$0xf]  ;;  %v3728_v15 = vmax.f32 %v3632_v59, %v3680_v29  ;;  %v3709_v38 = vmax.f32 %v3613_v17, %v3568_v50  ;;  %5116 = vmatmul.mubr.msk.bf16.gmra.mrb[24].mxu1 %vm909_vm2, %v3029_v35  ;;  %v2587_v17 = vmax.f32 %v7594_v63, %v2446_v41 }
 0x225   : > { %5073 = vmatprep.mubr.msk.bf16.mxu0 %vm909_vm2, %v8605_v28  ;;  %v2303_v54 = vld [vmem:[#allocation2 + $0x1f6] sm:$0xf]  ;;  %3754 = vst.msk [vmem:[#allocation3 + $0x20] sm:$0xff] %vm909_vm2, %v3706_v44  ;;  %5119 = vmatprep.mubr.msk.bf16.mxu1 %vm909_vm2, %v3030_v19  ;;  %v2680_v19 = vmax.f32 %v2584_v10, %v2446_v41  ;;  %v7697_v41 = vld [vmem:[#allocation2 + $0x46] sm:$0xff] }
 0x226   : > { %v2435_v49 = vld [vmem:[#allocation2 + $0x1b6] sm:$0xf]  ;;  %v2399_v11 = vmax.f32 %v2303_v54, %v7627_v25  ;;  %3776 = vst.msk [vmem:[#allocation3 + $0xd0] sm:$0xf] %vm1446_vm4, %v3728_v15  ;;  %v7663_v25 = vmax.f32 %v2394_v20, %v7625_v7 }
 0x227   : > { %v3662_v22 = vld [vmem:[#allocation2 + $0xd6] sm:$0xf]  ;;  %v7656_v31 = vmax.f32 %v2387_v34, %v2435_v49  ;;  %v7665_v49 = vld [vmem:[#allocation2 + $0x226] sm:$0xff]  ;;  %3757 = vst.msk [vmem:[#allocation3 + $0x38] sm:$0xff] %vm909_vm2, %v3709_v38  ;;  %2728 = vst.msk [vmem:[#allocation3 + $0x140] sm:$0xff] %vm909_vm2, %v2680_v19 }
 0x228   : > { %v7640_v61 = vld [vmem:[#allocation2 + $0xd6] sm:$0xf]  ;;  %v2493_v57 = vmax.f32 %v2397_v3, %v7665_v49 }
 0x229   : > { %v3332_v46 = vld [vmem:[#allocation2 + $0x96] sm:$0xf] }
 0x22a   : > { %v3476_v36 = vld [vmem:[#allocation2 + $0xd6] sm:$0xf]  ;;  %v2589_v53 = vmax.f32 %v2493_v57, %v7650_v58 }
 0x22b   : > { %v3383_v4 = vld [vmem:[#allocation2 + $0xd6] sm:$0xf] }
 0x22c   : > { %v3479_v24 = vld [vmem:[#allocation2 + $0xf6] sm:$0xf] }
 0x22d   : > { %v3659_v59 = vld [vmem:[#allocation2 + $0xb6] sm:$0xf] }
 0x22e   : > { %v3566_v30 = vld [vmem:[#allocation2 + $0xb6] sm:$0xf]  ;;  %v3707_v9 = vmax.f32 %v3611_v14, %v3659_v59  ;;  %v2542_v14 = vld [vmem:[#allocation2 + $0x24e] sm:$0xff]  ;;  %v2637_v59 = vld [vmem:[#allocation2 + $0x266] sm:$0xff] }
 0x22f   : > { %v3473_v28 = vld [vmem:[#allocation2 + $0xb6] sm:$0xf]  ;;  %v3614_v39 = vmax.f32 %v3518_v48, %v3566_v30  ;;  %v3712_v30 = vmax.f32 %v3616_v8, %v3664_v12  ;;  %v8607_v12 = vld [vmem:[#allocation5_spill] sm:$0xff] }
 0x230   : > { %v3665_v26 = vld [vmem:[#allocation2 + $0xf6] sm:$0xf]  ;;  %v3521_v0 = vmax.f32 %v3425_v62, %v3473_v28  ;;  %3755 = vst.msk [vmem:[#allocation3 + $0x28] sm:$0xf] %vm1446_vm4, %v3707_v9  ;;  %v2683_v9 = vmax.f32 %v2587_v17, %v2542_v14  ;;  %v2685_v28 = vmax.f32 %v2589_v53, %v2637_v59 }
 0x231   : > { %v3380_v29 = vld [vmem:[#allocation2 + $0xb6] sm:$0xf]  ;;  %v3710_v48 = vmax.f32 %v3614_v39, %v3662_v22  ;;  %3760 = vst.msk [vmem:[#allocation3 + $0x50] sm:$0xff] %vm909_vm2, %v3712_v30 }
 0x232   : > { %v3335_v54 = vld [vmem:[#allocation2 + $0xb6] sm:$0xf]  ;;  %v3428_v34 = vmax.f32 %v3332_v46, %v3380_v29  ;;  %v3617_v62 = vmax.f32 %v3521_v0, %v7640_v61  ;;  %2733 = vst.msk [vmem:[#allocation3 + $0x168] sm:$0xff] %vm909_vm2, %v2685_v28  ;;  %2731 = vst.msk [vmem:[#allocation3 + $0x158] sm:$0xff] %vm909_vm2, %v2683_v9  ;;  %v8618_v28 = vld [vmem:[#allocation9_spill] sm:$0xff] }
 0x233   : > { %v3431_v15 = vmax.f32 %v3335_v54, %v3383_v4  ;;  %v2447_v42 = vld [vmem:[#allocation2 + $0x236] sm:$0xf]  ;;  %3758 = vst.msk [vmem:[#allocation3 + $0x40] sm:$0xf] %vm1446_vm4, %v3710_v48  ;;  %v3032_v48 = vpack.c.bf16 %v7431_v16, %v7416_v1  ;;  %v8613_v1 = vmax.f32 %v7614_v60, %v7625_v7  ;;  %v8615_v60 = vmax.f32 %v7543_v23, %v7556_v45  ;;  %v3801_v23 = vld [vmem:[#allocation3 + $0x20] sm:$0xff] }
 0x234   : > { %v3572_v20 = vld [vmem:[#allocation2 + $0xf6] sm:$0xf]  ;;  %v3524_v46 = vmax.f32 %v3428_v34, %v3476_v36  ;;  %v2495_v3 = vmax.f32 %v2399_v11, %v2447_v42  ;;  %v3713_v61 = vmax.f32 %v3617_v62, %v3665_v26  ;;  %v8612_v62 = vmax.f32 %v7427_v55, %v7636_v43  ;;  %v7718_v43 = vld [vmem:[#allocation2 + $0x66] sm:$0xff] }
 0x235   : > { %v3575_v13 = vld [vmem:[#allocation2 + $0x116] sm:$0xf]  ;;  %v3527_v50 = vmax.f32 %v3431_v15, %v3479_v24  ;;  %v2590_v24 = vmax.f32 %v2494_v40, %v2542_v14  ;;  %v2679_v16 = vmax.f32 %v8613_v1, %v7665_v49  ;;  %v2586_v55 = vmax.f32 %v7663_v25, %v7665_v49 }
 0x236   : > { %v3668_v4 = vld [vmem:[#allocation2 + $0x116] sm:$0xf]  ;;  %v3620_v35 = vmax.f32 %v3524_v46, %v3572_v20  ;;  %3761 = vst.msk [vmem:[#allocation3 + $0x58] sm:$0xf] %vm1446_vm4, %v3713_v61  ;;  %v8616_v25 = vpack.c.bf16 %v7414_v51, %v7412_v27  ;;  %v3034_v1 = vpack.c.bf16 %v7447_v18, %v7445_v47 }
 0x237   : > { %v2543_v2 = vld [vmem:[#allocation2 + $0x256] sm:$0xf]  ;;  %v3623_v36 = vmax.f32 %v3527_v50, %v3575_v13  ;;  %v7693_v13 = vld [vmem:[#allocation2 + $0x26e] sm:$0xff]  ;;  %2727 = vst.msk [vmem:[#allocation3 + $0x138] sm:$0xff] %vm909_vm2, %v2679_v16  ;;  %v3833_v45 = vld [vmem:[#allocation3 + $0x21] sm:$0xff] }
 0x238   : > { %v3671_v5 = vld [vmem:[#allocation2 + $0x136] sm:$0xf]  ;;  %v2591_v38 = vmax.f32 %v2495_v3, %v2543_v2  ;;  %v3716_v15 = vmax.f32 %v3620_v35, %v3668_v4  ;;  %v2686_v57 = vmax.f32 %v2590_v24, %v7693_v13  ;;  %5120 = vmatmul.mubr.msk.bf16.gmra.mrb[28].mxu1 %vm909_vm2, %v8616_v25  ;;  %v2682_v24 = vmax.f32 %v2586_v55, %v7650_v58  ;;  %v8617_v58 = vld [vmem:[#allocation13_spill] sm:$0xff] }
 0x239   : > { %v2639_v21 = vld [vmem:[#allocation2 + $0x276] sm:$0xf]  ;;  %v3719_v20 = vmax.f32 %v3623_v36, %v3671_v5  ;;  %v7726_v36 = vld [vmem:[#allocation2 + $0x86] sm:$0xff]  ;;  %5123 = vmatprep.mubr.msk.bf16.mxu1 %vm909_vm2, %v3032_v48 }
 0x23a   : > { %v2531_v22 = vld [vmem:[#allocation2 + $0x1d6] sm:$0xf]  ;;  %v2687_v14 = vmax.f32 %v2591_v38, %v2639_v21  ;;  %3764 = vst.msk [vmem:[#allocation3 + $0x70] sm:$0xf] %vm1446_vm4, %v3716_v15  ;;  %v2761_v55 = vld [vmem:[#allocation3 + $0x128] sm:$0xff] }
 0x23b   : > { %v8606_v44 = vld [vmem:[#allocation7_spill] sm:$0xff]  ;;  %v8609_v26 = vld [vmem:[#allocation14_spill] sm:$0xff]  ;;  %v2579_v32 = vmax.f32 %v7656_v31, %v2531_v22  ;;  %3767 = vst.msk [vmem:[#allocation3 + $0x88] sm:$0xf] %vm1446_vm4, %v3719_v20  ;;  %v3897_v18 = vld [vmem:[#allocation3 + $0x22] sm:$0xff] }
 0x23c   : > { %v8608_v8 = vpack.c.bf16 %v8606_v44, %v8607_v12  ;;  %v2297_v42 = vld [vmem:[#allocation2 + $0x1b6] sm:$0xf]  ;;  %2734 = vst.msk [vmem:[#allocation3 + $0x170] sm:$0xff] %vm909_vm2, %v2686_v57  ;;  %v5560_v12 = vld [vmem:[#allocation2 + $0x26] sm:$0xff]  ;;  %2730 = vst.msk [vmem:[#allocation3 + $0x150] sm:$0xff] %vm909_vm2, %v2682_v24 }
 0x23d   : > { %v2345_v11 = vld [vmem:[#allocation2 + $0x1d6] sm:$0xf]  ;;  %2735 = vst.msk [vmem:[#allocation3 + $0x178] sm:$0xf] %vm1446_vm4, %v2687_v14  ;;  %v2763_v24 = vld [vmem:[#allocation3 + $0x140] sm:$0xff] }
 0x23e   : > { %5074 = vmatmul.mubr.msk.bf16.vlgmr.msra.gmra.mrb[32].mxu0 %vm909_vm2, %v8608_v8  ;;  %v2438_v63 = vld [vmem:[#allocation2 + $0x1d6] sm:$0xf]  ;;  %v2393_v4 = vmax.f32 %v2297_v42, %v2345_v11  ;;  %v3417_v8 = vmax.f32 %v5560_v12, %v7697_v41 }
 0x23f   : > { %v8610_v29 = vld [vmem:[#allocation11_spill] sm:$0xff]  ;;  %v2486_v31 = vmax.f32 %v8612_v62, %v2438_v63  ;;  %v8614_v61 = vld [vmem:[#allocation10_spill] sm:$0xff] }
 0x240   : > { %v8611_v54 = vpack.c.bf16 %v8609_v26, %v8610_v29  ;;  %v2627_v39 = vld [vmem:[#allocation2 + $0x1f6] sm:$0xf]  ;;  %v3510_v35 = vmax.f32 %v8614_v61, %v7697_v41  ;;  %v8619_v26 = vpack.c.bf16 %v8617_v58, %v8618_v28 }
 0x241   : > { %v2300_v0 = vld [vmem:[#allocation2 + $0x1d6] sm:$0xf]  ;;  %v2675_v59 = vmax.f32 %v2579_v32, %v2627_v39  ;;  %v3420_v39 = vmax.f32 %v7697_v41, %v7718_v43  ;;  %v3033_v41 = vpack.c.bf16 %v7435_v52, %v7433_v6  ;;  %v7770_v6 = vld [vmem:[#allocation2 + $0xc6] sm:$0xff]  ;;  %v3423_v52 = vmax.f32 %v7718_v43, %v7726_v36 }
 0x242   : > { %5077 = vmatprep.mubr.msk.bf16.mxu0 %vm909_vm2, %v8611_v54  ;;  %v2348_v34 = vld [vmem:[#allocation2 + $0x1f6] sm:$0xf]  ;;  %v3606_v63 = vmax.f32 %v3510_v35, %v7718_v43  ;;  %v3513_v54 = vmax.f32 %v3417_v8, %v7718_v43  ;;  %v7781_v43 = vld [vmem:[#allocation2 + $0xe6] sm:$0xff] }
 0x243   : > { %v2534_v56 = vld [vmem:[#allocation2 + $0x1f6] sm:$0xf]  ;;  %v2396_v5 = vmax.f32 %v2300_v0, %v2348_v34  ;;  %2723 = vst.msk [vmem:[#allocation3 + $0x118] sm:$0xf] %vm1446_vm4, %v2675_v59  ;;  %v8621_v34 = vld [vmem:[#allocation16_spill] sm:$0xff]  ;;  %5124 = vmatmul.mubr.msk.bf16.gmra.mrb[0].mxu1 %vm909_vm2, %v3033_v41 }
 0x244   : > { %v2441_v10 = vld [vmem:[#allocation2 + $0x1f6] sm:$0xf]  ;;  %v2582_v17 = vmax.f32 %v2486_v31, %v2534_v56  ;;  %v3702_v57 = vmax.f32 %v3606_v63, %v7726_v36  ;;  %v7755_v56 = vld [vmem:[#allocation2 + $0xa6] sm:$0xff]  ;;  %5127 = vmatprep.mubr.msk.bf16.mxu1 %vm909_vm2, %v3034_v1 }
 0x245   : > { %v7699_v40 = vld [vmem:[#allocation2 + $0x156] sm:$0xf]  ;;  %v2489_v53 = vmax.f32 %v2393_v4, %v2441_v10  ;;  %v3865_v10 = vmax.f32 %v3801_v23, %v3833_v45  ;;  %v2766_v4 = vld [vmem:[#allocation3 + $0x168] sm:$0xff] }
 0x246   : > { %v2630_v46 = vld [vmem:[#allocation2 + $0x216] sm:$0xf]  ;;  %5078 = vmatmul.mubr.msk.bf16.gmra.mrb[36].mxu0 %vm909_vm2, %v8619_v26  ;;  %3750 = vst.msk [vmem:[#allocation3] sm:$0xff] %vm909_vm2, %v3702_v57  ;;  %v2862_v23 = vld [vmem:[#allocation3 + $0x16a] sm:$0xff] }
 0x247   : > { %v2444_v50 = vld [vmem:[#allocation2 + $0x216] sm:$0xf]  ;;  %v2678_v11 = vmax.f32 %v2582_v17, %v2630_v46  ;;  %v7778_v35 = vmax.f32 %v3865_v10, %v3897_v18  ;;  %v7788_v45 = vld [vmem:[#allocation3 + $0x23] sm:$0xff] }
 0x248   : > { %v3464_v2 = vld [vmem:[#allocation2 + $0x56] sm:$0xf]  ;;  %v2492_v49 = vmax.f32 %v2396_v5, %v2444_v50  ;;  %v3609_v50 = vmax.f32 %v3513_v54, %v7726_v36  ;;  %v2798_v5 = vld [vmem:[#allocation3 + $0x169] sm:$0xff] }
 0x249   : > { %v2537_v30 = vld [vmem:[#allocation2 + $0x216] sm:$0xf]  ;;  %v3512_v7 = vmax.f32 %v8615_v60, %v3464_v2  ;;  %2726 = vst.msk [vmem:[#allocation3 + $0x130] sm:$0xf] %vm1446_vm4, %v2678_v11  ;;  %v3516_v2 = vmax.f32 %v3420_v39, %v7726_v36  ;;  %v2830_v17 = vmax.f32 %v2766_v4, %v2798_v5  ;;  %v3899_v60 = vld [vmem:[#allocation3 + $0x3a] sm:$0xff]  ;;  %v8623_v54 = vld [vmem:[#allocation17_spill] sm:$0xff] }
 0x24a   : > { %v3560_v3 = vld [vmem:[#allocation2 + $0x76] sm:$0xf]  ;;  %v2585_v27 = vmax.f32 %v2489_v53, %v2537_v30  ;;  %v3705_v47 = vmax.f32 %v3609_v50, %v7755_v56  ;;  %v7812_v4 = vld [vmem:[#allocation3 + $0x3b] sm:$0xff] }
 0x24b   : > { %v2633_v21 = vld [vmem:[#allocation2 + $0x236] sm:$0xf]  ;;  %v3608_v38 = vmax.f32 %v3512_v7, %v3560_v3  ;;  %v3612_v53 = vmax.f32 %v3516_v2, %v7755_v56  ;;  %v3519_v7 = vmax.f32 %v3423_v52, %v7755_v56 }
 0x24c   : > { %v2540_v22 = vld [vmem:[#allocation2 + $0x236] sm:$0xf]  ;;  %v2681_v20 = vmax.f32 %v2585_v27, %v2633_v21  ;;  %3753 = vst.msk [vmem:[#allocation3 + $0x18] sm:$0xff] %vm909_vm2, %v3705_v47 }
 0x24d   : > { %v3656_v44 = vld [vmem:[#allocation2 + $0x96] sm:$0xf]  ;;  %v2588_v29 = vmax.f32 %v2492_v49, %v2540_v22 }
 0x24e   : > { %v3347_v42 = vld [vmem:[#allocation2 + $0x136] sm:$0xf]  ;;  %v3704_v32 = vmax.f32 %v3608_v38, %v3656_v44  ;;  %2729 = vst.msk [vmem:[#allocation3 + $0x148] sm:$0xf] %vm1446_vm4, %v2681_v20  ;;  %v7792_v38 = vmax.f32 %v2830_v17, %v2862_v23  ;;  %v3799_v23 = vld [vmem:[#allocation3 + $0x8] sm:$0xff] }
 0x24f   : > { %v2636_v51 = vld [vmem:[#allocation2 + $0x256] sm:$0xf]  ;;  %v3443_v9 = vmax.f32 %v3347_v42, %v7699_v40  ;;  %v3708_v42 = vmax.f32 %v3612_v53, %v7770_v6 }
 0x250   : > { %v7738_v19 = vld [vmem:[#allocation2 + $0x176] sm:$0xf]  ;;  %v2684_v46 = vmax.f32 %v2588_v29, %v2636_v51  ;;  %3752 = vst.msk [vmem:[#allocation3 + $0x10] sm:$0xf] %vm1446_vm4, %v3704_v32  ;;  %v2793_v29 = vld [vmem:[#allocation3 + $0x129] sm:$0xff] }
 0x251   : > { %v8620_v0 = vld [vmem:[#allocation18_spill] sm:$0xff]  ;;  %v3803_v40 = vld [vmem:[#allocation3 + $0x38] sm:$0xff]  ;;  %3756 = vst.msk [vmem:[#allocation3 + $0x30] sm:$0xff] %vm909_vm2, %v3708_v42  ;;  %v2825_v32 = vmax.f32 %v2761_v55, %v2793_v29  ;;  %v3426_v55 = vmax.f32 %v7726_v36, %v7755_v56 }
 0x252   : > { %v8622_v15 = vpack.c.bf16 %v8620_v0, %v8621_v34  ;;  %v3835_v14 = vld [vmem:[#allocation3 + $0x39] sm:$0xff]  ;;  %v2759_v31 = vld [vmem:[#allocation3 + $0x110] sm:$0xff]  ;;  %2732 = vst.msk [vmem:[#allocation3 + $0x160] sm:$0xf] %vm1446_vm4, %v2684_v46  ;;  %v3993_v46 = vmax.f32 %v7778_v35, %v7788_v45  ;;  %v4022_v45 = vld [vmem:[#allocation3 + $0x4] sm:$0xff] }
 0x253   : > { %v3350_v48 = vld [vmem:[#allocation2 + $0x156] sm:$0xf]  ;;  %v3867_v21 = vmax.f32 %v3803_v40, %v3835_v14  ;;  %v2858_v34 = vld [vmem:[#allocation3 + $0x13a] sm:$0xff]  ;;  %v2921_v17 = vld [vmem:[#allocation3 + $0x12b] sm:$0xff] }
 0x254   : > { %5081 = vmatprep.mubr.msk.bf16.mxu0 %vm909_vm2, %v8622_v15  ;;  %v3491_v62 = vld [vmem:[#allocation2 + $0x176] sm:$0xf]  ;;  %v3446_v22 = vmax.f32 %v3350_v48, %v7738_v19  ;;  %v3615_v19 = vmax.f32 %v3519_v7, %v7770_v6  ;;  %v2926_v15 = vld [vmem:[#allocation3 + $0x16b] sm:$0xff]  ;;  %v8627_v40 = vld [vmem:[#allocation20_spill] sm:$0xff] }
 0x255   : > { %v3494_v59 = vld [vmem:[#allocation2 + $0x196] sm:$0xf]  ;;  %v7783_v25 = vmax.f32 %v3443_v9, %v3491_v62  ;;  %v7804_v20 = vmax.f32 %v3867_v21, %v3899_v60  ;;  %v2922_v62 = vld [vmem:[#allocation3 + $0x13b] sm:$0xff]  ;;  %v2985_v60 = vld [vmem:[#allocation3 + $0x12c] sm:$0xff] }
 0x256   : > { %v7761_v30 = vld [vmem:[#allocation2 + $0x196] sm:$0xf]  ;;  %v7795_v9 = vmax.f32 %v3446_v22, %v3494_v59  ;;  %v3711_v50 = vmax.f32 %v3615_v19, %v7781_v43  ;;  %v2857_v59 = vld [vmem:[#allocation3 + $0x12a] sm:$0xff]  ;;  %v2795_v1 = vld [vmem:[#allocation3 + $0x141] sm:$0xff]  ;;  %v2958_v22 = vmax.f32 %v7792_v38, %v2926_v15 }
 0x257   : > { %v7766_v16 = vld [vmem:[#allocation3 + $0x170] sm:$0xff]  ;;  %v2762_v44 = vld [vmem:[#allocation3 + $0x138] sm:$0xff]  ;;  %v3635_v26 = vmax.f32 %v7783_v25, %v7761_v30  ;;  %v2827_v47 = vmax.f32 %v2763_v24, %v2795_v1  ;;  %v2859_v7 = vld [vmem:[#allocation3 + $0x142] sm:$0xff]  ;;  %v3995_v36 = vmax.f32 %v7804_v20, %v7812_v4 }
 0x258   : > { %v2799_v3 = vld [vmem:[#allocation3 + $0x171] sm:$0xff]  ;;  %v2794_v12 = vld [vmem:[#allocation3 + $0x139] sm:$0xff]  ;;  %3759 = vst.msk [vmem:[#allocation3 + $0x48] sm:$0xff] %vm909_vm2, %v3711_v50  ;;  %v8629_v50 = vld [vmem:[#allocation21_spill] sm:$0xff] }
 0x259   : > { %v2791_v61 = vld [vmem:[#allocation3 + $0x111] sm:$0xff]  ;;  %v2831_v8 = vmax.f32 %v7766_v16, %v2799_v3  ;;  %v2826_v27 = vmax.f32 %v2762_v44, %v2794_v12  ;;  %v2986_v16 = vld [vmem:[#allocation3 + $0x13c] sm:$0xff]  ;;  %v2889_v3 = vmax.f32 %v2825_v32, %v2857_v59  ;;  %v2891_v24 = vmax.f32 %v2827_v47, %v2859_v7 }
 0x25a   : > { %v2823_v49 = vmax.f32 %v2759_v31, %v2791_v61  ;;  %v2855_v11 = vld [vmem:[#allocation3 + $0x112] sm:$0xff]  ;;  %v2861_v12 = vld [vmem:[#allocation3 + $0x15a] sm:$0xff] }
 0x25b   : > { %v2765_v51 = vld [vmem:[#allocation3 + $0x158] sm:$0xff]  ;;  %v8626_v10 = vld [vmem:[#allocation22_spill] sm:$0xff]  ;;  %v2890_v48 = vmax.f32 %v2826_v27, %v2858_v34  ;;  %v2953_v42 = vmax.f32 %v2889_v3, %v2921_v17  ;;  %v3798_v20 = vld [vmem:[#allocation3] sm:$0xff] }
 0x25c   : > { %v2863_v63 = vld [vmem:[#allocation3 + $0x172] sm:$0xff]  ;;  %v2887_v58 = vmax.f32 %v2823_v49, %v2855_v11  ;;  %v8628_v14 = vpack.c.bf16 %v8626_v10, %v8627_v40  ;;  %v2923_v49 = vld [vmem:[#allocation3 + $0x143] sm:$0xff]  ;;  %v2925_v38 = vld [vmem:[#allocation3 + $0x15b] sm:$0xff] }
 0x25d   : > { %v2919_v28 = vld [vmem:[#allocation3 + $0x113] sm:$0xff]  ;;  %v2895_v52 = vmax.f32 %v2831_v8, %v2863_v63  ;;  %v2954_v18 = vmax.f32 %v2890_v48, %v2922_v62  ;;  %v2955_v32 = vmax.f32 %v2891_v24, %v2923_v49  ;;  %v3830_v48 = vld [vmem:[#allocation3 + $0x1] sm:$0xff]  ;;  %v3831_v62 = vld [vmem:[#allocation3 + $0x9] sm:$0xff] }
 0x25e   : > { %v8624_v39 = vld [vmem:[#allocation15_spill] sm:$0xff]  ;;  %v2764_v31 = vld [vmem:[#allocation3 + $0x150] sm:$0xff]  ;;  %v2951_v2 = vmax.f32 %v2887_v58, %v2919_v28  ;;  %v3863_v3 = vmax.f32 %v3799_v23, %v3831_v62  ;;  %v3894_v17 = vld [vmem:[#allocation3 + $0x2] sm:$0xff] }
 0x25f   : > { %v8625_v0 = vpack.c.bf16 %v8623_v54, %v8624_v39  ;;  %v2983_v57 = vld [vmem:[#allocation3 + $0x114] sm:$0xff]  ;;  %v7823_v27 = vmax.f32 %v2954_v18, %v2986_v16  ;;  %v2990_v15 = vld [vmem:[#allocation3 + $0x16c] sm:$0xff]  ;;  %v4025_v16 = vld [vmem:[#allocation3 + $0x24] sm:$0xff] }
 0x260   : > { %v2796_v41 = vld [vmem:[#allocation3 + $0x151] sm:$0xff]  ;;  %v2797_v53 = vld [vmem:[#allocation3 + $0x159] sm:$0xff]  ;;  %v3015_v61 = vmax.f32 %v2951_v2, %v2983_v57  ;;  %v3017_v57 = vmax.f32 %v2953_v42, %v2985_v60 }
 0x261   : > { %5082 = vmatmul.mubr.msk.bf16.gmra.mrb[40].mxu0 %vm909_vm2, %v8625_v0  ;;  %v2828_v5 = vmax.f32 %v2764_v31, %v2796_v41  ;;  %v2860_v21 = vld [vmem:[#allocation3 + $0x152] sm:$0xff]  ;;  %v2829_v44 = vmax.f32 %v2765_v51, %v2797_v53  ;;  %v7830_v51 = vmax.f32 %v3426_v55, %v7770_v6  ;;  %3312 = vst.msk [vmem:[#allocation2 + $0x1e8] sm:$0xff] %vm909_vm2, %v7823_v27  ;;  %v2987_v31 = vld [vmem:[#allocation3 + $0x144] sm:$0xff] }
 0x262   : > { %5085 = vmatprep.mubr.msk.bf16.mxu0 %vm909_vm2, %v8628_v14  ;;  %v7821_v11 = vld [vmem:[#allocation2 + $0x196] sm:$0xf]  ;;  %3309 = vst.msk [vmem:[#allocation2 + $0x1b0] sm:$0xff] %vm909_vm2, %v3015_v61  ;;  %v3035_v29 = vpack.c.bf16 %v3015_v61, %v7449_v37  ;;  %v7838_v14 = vmax.f32 %v2958_v22, %v2990_v15  ;;  %v3429_v37 = vmax.f32 %v7755_v56, %v7770_v6  ;;  %3311 = vst.msk [vmem:[#allocation2 + $0x1d0] sm:$0xff] %vm909_vm2, %v3017_v57  ;;  %v2989_v6 = vld [vmem:[#allocation3 + $0x15c] sm:$0xff] }
 0x263   : > { %v2892_v8 = vmax.f32 %v2828_v5, %v2860_v21  ;;  %v2924_v63 = vld [vmem:[#allocation3 + $0x153] sm:$0xff]  ;;  %v2893_v54 = vmax.f32 %v2829_v44, %v2861_v12  ;;  %v4027_v5 = vld [vmem:[#allocation3 + $0x3c] sm:$0xff]  ;;  %v3036_v56 = vpack.c.bf16 %v3017_v57, %v7461_v33  ;;  %v3862_v55 = vmax.f32 %v3798_v20, %v3830_v48  ;;  %v3895_v21 = vld [vmem:[#allocation3 + $0xa] sm:$0xff] }
 0x264   : > { %v2927_v19 = vld [vmem:[#allocation3 + $0x173] sm:$0xff]  ;;  %5128 = vmatmul.mubr.msk.bf16.gmra.mrb[4].mxu1 %vm909_vm2, %v3035_v29  ;;  %3316 = vst.msk [vmem:[#allocation2 + $0x228] sm:$0xff] %vm909_vm2, %v7838_v14  ;;  %v3958_v33 = vld [vmem:[#allocation3 + $0x3] sm:$0xff]  ;;  %v7864_v61 = vmax.f32 %v3993_v46, %v4025_v16  ;;  %v3927_v49 = vmax.f32 %v3863_v3, %v3895_v21  ;;  %v3959_v44 = vld [vmem:[#allocation3 + $0xb] sm:$0xff]  ;;  %v7870_v42 = vmax.f32 %v3995_v36, %v4027_v5 }
 0x265   : > { %v7825_v58 = vld [vmem:[#allocation3 + $0x50] sm:$0xff]  ;;  %v2956_v39 = vmax.f32 %v2892_v8, %v2924_v63  ;;  %v2959_v34 = vmax.f32 %v2895_v52, %v2927_v19  ;;  %v2957_v41 = vmax.f32 %v2893_v54, %v2925_v38  ;;  %v8630_v2 = vld [vmem:[#allocation19_spill] sm:$0xff]  ;;  %v3019_v52 = vmax.f32 %v2955_v32, %v2987_v31  ;;  %5131 = vmatprep.mubr.msk.bf16.mxu1 %vm909_vm2, %v3036_v56 }
 0x266   : > { %v7827_v28 = vld [vmem:[#allocation3 + $0x51] sm:$0xff]  ;;  %v8631_v59 = vpack.c.bf16 %v8629_v50, %v8630_v2  ;;  %v3832_v22 = vld [vmem:[#allocation3 + $0x19] sm:$0xff]  ;;  %v3926_v7 = vmax.f32 %v3862_v55, %v3894_v17  ;;  %v3836_v48 = vld [vmem:[#allocation3 + $0x49] sm:$0xff] }
 0x267   : > { %v2988_v0 = vld [vmem:[#allocation3 + $0x154] sm:$0xff]  ;;  %v3021_v53 = vmax.f32 %v2957_v41, %v2989_v6  ;;  %v3869_v60 = vmax.f32 %v7825_v58, %v7827_v28  ;;  %3313 = vst.msk [vmem:[#allocation2 + $0x1f0] sm:$0xff] %vm909_vm2, %v3019_v52  ;;  %v3037_v24 = vpack.c.bf16 %v3019_v52, %v7823_v27  ;;  %v4023_v46 = vld [vmem:[#allocation3 + $0xc] sm:$0xff]  ;;  %v3618_v58 = vmax.f32 %v7830_v51, %v7781_v43 }
 0x268   : > { %v7834_v10 = vld [vmem:[#allocation2 + $0x176] sm:$0xf]  ;;  %v7843_v4 = vmax.f32 %v2956_v39, %v2988_v0  ;;  %v7874_v35 = vld [vmem:[#allocation2 + $0x18e] sm:$0xff]  ;;  %v3960_v63 = vld [vmem:[#allocation3 + $0x1b] sm:$0xff]  ;;  %v7879_v28 = vmax.f32 %v3429_v37, %v7781_v43  ;;  %v3990_v39 = vmax.f32 %v3926_v7, %v3958_v33  ;;  %v3991_v0 = vmax.f32 %v3927_v49, %v3959_v44 }
 0x269   : > { %v2991_v40 = vld [vmem:[#allocation3 + $0x174] sm:$0xff]  ;;  %5086 = vmatmul.mubr.msk.bf16.gmra.mrb[44].mxu0 %vm909_vm2, %v8631_v59  ;;  %v3449_v18 = vmax.f32 %v7834_v10, %v7821_v11  ;;  %3315 = vst.msk [vmem:[#allocation2 + $0x210] sm:$0xff] %vm909_vm2, %v3021_v53 }
 0x26a   : > { %v7849_v1 = vmax.f32 %v2959_v34, %v2991_v40  ;;  %v3800_v47 = vld [vmem:[#allocation3 + $0x18] sm:$0xff]  ;;  %3314 = vst.msk [vmem:[#allocation2 + $0x208] sm:$0xff] %vm909_vm2, %v7843_v4  ;;  %v3802_v8 = vld [vmem:[#allocation3 + $0x30] sm:$0xff]  ;;  %v3038_v27 = vpack.c.bf16 %v3021_v53, %v7843_v4  ;;  %v3804_v40 = vld [vmem:[#allocation3 + $0x48] sm:$0xff]  ;;  %v7890_v37 = vmax.f32 %v3990_v39, %v4022_v45  ;;  %v7892_v31 = vmax.f32 %v3991_v0, %v4023_v46 }
 0x26b   : > { %v3864_v12 = vmax.f32 %v3800_v47, %v3832_v22  ;;  %v3834_v23 = vld [vmem:[#allocation3 + $0x31] sm:$0xff]  ;;  %v3896_v11 = vld [vmem:[#allocation3 + $0x1a] sm:$0xff]  ;;  %v3868_v16 = vmax.f32 %v3804_v40, %v3836_v48 }
 0x26c   : > { %3317 = vst.msk [vmem:[#allocation2 + $0x230] sm:$0xff] %vm909_vm2, %v7849_v1  ;;  %v3866_v38 = vmax.f32 %v3802_v8, %v3834_v23  ;;  %v3898_v19 = vld [vmem:[#allocation3 + $0x32] sm:$0xff]  ;;  %v4024_v4 = vld [vmem:[#allocation3 + $0x1c] sm:$0xff]  ;;  %5132 = vmatmul.mubr.msk.bf16.gmra.mrb[8].mxu1 %vm909_vm2, %v3037_v24  ;;  %v3039_v2 = vpack.c.bf16 %v7849_v1, %v7838_v14  ;;  %v3900_v47 = vld [vmem:[#allocation3 + $0x4a] sm:$0xff]  ;;  %v4086_v14 = vpack.c.bf16 %v7892_v31, %v7890_v37 }
 0x26d   : > { %v3683_v36 = vld [vmem:[#allocation2 + $0x1b6] sm:$0xf]  ;;  %v3928_v34 = vmax.f32 %v3864_v12, %v3896_v11  ;;  %v7886_v32 = vld [vmem:[#allocation2 + $0x1ae] sm:$0xff]  ;;  %5135 = vmatprep.mubr.msk.bf16.mxu1 %vm909_vm2, %v3038_v27  ;;  %v3932_v22 = vmax.f32 %v3868_v16, %v3900_v47 }
 0x26e   : > { %v3590_v29 = vld [vmem:[#allocation2 + $0x1b6] sm:$0xf]  ;;  %v3731_v15 = vmax.f32 %v3635_v26, %v3683_v36  ;;  %v3930_v10 = vmax.f32 %v3866_v38, %v3898_v19  ;;  %v3451_v62 = vmax.f32 %v7874_v35, %v7886_v32  ;;  %v7896_v26 = vld [vmem:[#allocation2 + $0x1ce] sm:$0xff] }
 0x26f   : > { %v3497_v54 = vld [vmem:[#allocation2 + $0x1b6] sm:$0xf]  ;;  %v3638_v20 = vmax.f32 %v7795_v9, %v3590_v29  ;;  %v3992_v41 = vmax.f32 %v3928_v34, %v3960_v63  ;;  %v3454_v55 = vmax.f32 %v7886_v32, %v7896_v26  ;;  %v7904_v53 = vld [vmem:[#allocation2 + $0x1ee] sm:$0xff] }
 0x270   : > { %v3545_v57 = vmax.f32 %v3449_v18, %v3497_v54  ;;  %v3962_v50 = vld [vmem:[#allocation3 + $0x33] sm:$0xff]  ;;  %3779 = vst.msk [vmem:[#allocation3 + $0xe8] sm:$0xf] %vm1446_vm4, %v3731_v15  ;;  %v3547_v6 = vmax.f32 %v3451_v62, %v7896_v26  ;;  %v3457_v8 = vmax.f32 %v7896_v26, %v7904_v53  ;;  %v3964_v38 = vld [vmem:[#allocation3 + $0x4b] sm:$0xff] }
 0x271   : > { %v3901_v30 = vld [vmem:[#allocation3 + $0x52] sm:$0xff]  ;;  %v3994_v59 = vmax.f32 %v3930_v10, %v3962_v50  ;;  %v7908_v1 = vmax.f32 %v3992_v41, %v4024_v4  ;;  %v3550_v23 = vmax.f32 %v3454_v55, %v7904_v53  ;;  %v3996_v39 = vmax.f32 %v3932_v22, %v3964_v38  ;;  %v3666_v15 = vld [vmem:[#allocation2 + $0x106] sm:$0xff] }
 0x272   : > { %v3686_v25 = vld [vmem:[#allocation2 + $0x1d6] sm:$0xf]  ;;  %v3933_v5 = vmax.f32 %v3869_v60, %v3901_v30  ;;  %v3643_v7 = vmax.f32 %v3547_v6, %v7904_v53  ;;  %v3691_v49 = vld [vmem:[#allocation2 + $0x20e] sm:$0xff]  ;;  %v3714_v30 = vmax.f32 %v3618_v58, %v3666_v15  ;;  %v3621_v43 = vmax.f32 %v7879_v28, %v3666_v15  ;;  %v3399_v22 = vld [vmem:[#allocation2 + $0x186] sm:$0xff] }
 0x273   : > { %v3593_v9 = vld [vmem:[#allocation2 + $0x1d6] sm:$0xf]  ;;  %v3734_v52 = vmax.f32 %v3638_v20, %v3686_v25  ;;  %v3508_v3 = vld [vmem:[#allocation2 + $0x22e] sm:$0xff]  ;;  %v3460_v45 = vmax.f32 %v7904_v53, %v3691_v49  ;;  %v4087_v11 = vpack.c.bf16 %v7864_v61, %v7908_v1  ;;  %v3553_v54 = vmax.f32 %v3457_v8, %v3691_v49  ;;  %v3351_v8 = vld [vmem:[#allocation2 + $0x166] sm:$0xff] }
 0x274   : > { %v3641_v56 = vmax.f32 %v3545_v57, %v3593_v9  ;;  %v4026_v17 = vld [vmem:[#allocation3 + $0x34] sm:$0xff]  ;;  %v3739_v29 = vmax.f32 %v3643_v7, %v3691_v49  ;;  %v3646_v27 = vmax.f32 %v3550_v23, %v3691_v49  ;;  %v4028_v40 = vld [vmem:[#allocation3 + $0x4c] sm:$0xff]  ;;  %5136 = vmatmul.mubr.msk.bf16.gmra.mrb[12].mxu1 %vm909_vm2, %v3039_v2  ;;  %3762 = vst.msk [vmem:[#allocation3 + $0x60] sm:$0xff] %vm909_vm2, %v3714_v30 }
 0x275   : > { %v3689_v18 = vld [vmem:[#allocation2 + $0x1f6] sm:$0xf]  ;;  %v7910_v33 = vmax.f32 %v3994_v59, %v4026_v17  ;;  %3782 = vst.msk [vmem:[#allocation3 + $0x100] sm:$0xf] %vm1446_vm4, %v3734_v52  ;;  %v3379_v36 = vld [vmem:[#allocation2 + $0xae] sm:$0xff]  ;;  %v3556_v20 = vmax.f32 %v3460_v45, %v3508_v3  ;;  %v3649_v37 = vmax.f32 %v3553_v54, %v3508_v3  ;;  %v7924_v50 = vmax.f32 %v3996_v39, %v4028_v40  ;;  %v7942_v23 = vld [vmem:[#allocation2 + $0x1a6] sm:$0xff] }
 0x276   : > { %v3509_v21 = vld [vmem:[#allocation2 + $0x236] sm:$0xf]  ;;  %v3737_v60 = vmax.f32 %v3641_v56, %v3689_v18  ;;  %v3331_v0 = vld [vmem:[#allocation2 + $0x8e] sm:$0xff]  ;;  %3787 = vst.msk [vmem:[#allocation3 + $0x128] sm:$0xff] %vm909_vm2, %v3739_v29  ;;  %v3742_v41 = vmax.f32 %v3646_v27, %v3508_v3  ;;  %v3669_v56 = vld [vmem:[#allocation2 + $0x126] sm:$0xff]  ;;  %5141 = vmatprep.mubr.msk.bf16.mxu1 %vm909_vm2, %v4086_v14  ;;  %v3447_v38 = vmax.f32 %v3351_v8, %v3399_v22 }
 0x277   : > { %v3365_v44 = vld [vmem:[#allocation2 + $0x1f6] sm:$0xf]  ;;  %v4088_v63 = vpack.c.bf16 %v7870_v42, %v7910_v33  ;;  %v3475_v34 = vld [vmem:[#allocation2 + $0xce] sm:$0xff]  ;;  %v3427_v48 = vmax.f32 %v3331_v0, %v3379_v36  ;;  %v7948_v27 = vld [vmem:[#allocation2 + $0x1c6] sm:$0xff] }
 0x278   : > { %v3413_v12 = vld [vmem:[#allocation2 + $0x216] sm:$0xf]  ;;  %3785 = vst.msk [vmem:[#allocation3 + $0x118] sm:$0xf] %vm1446_vm4, %v3737_v60  ;;  %v3571_v62 = vld [vmem:[#allocation2 + $0xee] sm:$0xff]  ;;  %v3430_v55 = vmax.f32 %v3379_v36, %v3475_v34  ;;  %v3717_v60 = vmax.f32 %v3621_v43, %v3669_v56 }
 0x279   : > { %v3605_v24 = vld [vmem:[#allocation2 + $0x256] sm:$0xf]  ;;  %v3461_v46 = vmax.f32 %v3365_v44, %v3413_v12  ;;  %v5561_v25 = vld [vmem:[#allocation2 + $0x24e] sm:$0xff]  ;;  %3790 = vst.msk [vmem:[#allocation3 + $0x140] sm:$0xff] %vm909_vm2, %v3742_v41  ;;  %v3433_v58 = vmax.f32 %v3475_v34, %v3571_v62 }
 0x27a   : > { %v3965_v19 = vld [vmem:[#allocation3 + $0x53] sm:$0xff]  ;;  %v3652_v9 = vmax.f32 %v3556_v20, %v5561_v25  ;;  %v3745_v6 = vmax.f32 %v3649_v37, %v5561_v25  ;;  %v3526_v14 = vmax.f32 %v3430_v55, %v3571_v62  ;;  %3765 = vst.msk [vmem:[#allocation3 + $0x78] sm:$0xff] %vm909_vm2, %v3717_v60  ;;  %v3543_v20 = vmax.f32 %v3447_v38, %v7942_v23 }
 0x27b   : > { %v3557_v57 = vmax.f32 %v3461_v46, %v3509_v21  ;;  %v3997_v10 = vmax.f32 %v3933_v5, %v3965_v19  ;;  %v3701_v31 = vld [vmem:[#allocation2 + $0x276] sm:$0xf]  ;;  %v3523_v5 = vmax.f32 %v3427_v48, %v3475_v34  ;;  %v3667_v52 = vld [vmem:[#allocation2 + $0x10e] sm:$0xff]  ;;  %v3806_v56 = vld [vmem:[#allocation3 + $0x60] sm:$0xff] }
 0x27c   : > { %v4029_v4 = vld [vmem:[#allocation3 + $0x54] sm:$0xff]  ;;  %v3748_v17 = vmax.f32 %v3652_v9, %v7693_v13  ;;  %3793 = vst.msk [vmem:[#allocation3 + $0x158] sm:$0xff] %vm909_vm2, %v3745_v6  ;;  %v3529_v7 = vmax.f32 %v3433_v58, %v3667_v52  ;;  %v3436_v49 = vmax.f32 %v3571_v62, %v3667_v52  ;;  %5142 = vmatmul.mubr.msk.bf16.vlgmr.msra.gmra.mrb[16].mxu1 %vm909_vm2, %v4087_v11 }
 0x27d   : > { %v3653_v59 = vmax.f32 %v3557_v57, %v3605_v24  ;;  %v7930_v16 = vmax.f32 %v3997_v10, %v4029_v4  ;;  %v3670_v51 = vld [vmem:[#allocation2 + $0x12e] sm:$0xff]  ;;  %v3619_v21 = vmax.f32 %v3523_v5, %v3571_v62  ;;  %v3622_v24 = vmax.f32 %v3526_v14, %v3667_v52  ;;  %v3404_v39 = vld [vmem:[#allocation2 + $0x1b6] sm:$0xf]  ;;  %v7958_v62 = vld [vmem:[#allocation2 + $0x1e6] sm:$0xff]  ;;  %5145 = vmatprep.mubr.msk.bf16.mxu1 %vm909_vm2, %v4088_v63 }
 0x27e   : > { %v3673_v2 = vld [vmem:[#allocation2 + $0x14e] sm:$0xff]  ;;  %3796 = vst.msk [vmem:[#allocation3 + $0x170] sm:$0xff] %vm909_vm2, %v3748_v17  ;;  %v3439_v44 = vmax.f32 %v3667_v52, %v3670_v51  ;;  %v3625_v45 = vmax.f32 %v3529_v7, %v3670_v51  ;;  %v3532_v46 = vmax.f32 %v3436_v49, %v3670_v51  ;;  %v3356_v37 = vld [vmem:[#allocation2 + $0x196] sm:$0xf]  ;;  %v3639_v1 = vmax.f32 %v3543_v20, %v7948_v27  ;;  %v7972_v63 = vld [vmem:[#allocation2 + $0x206] sm:$0xff] }
 0x27f   : > { %v3676_v3 = vld [vmem:[#allocation2 + $0x16e] sm:$0xff]  ;;  %v3749_v47 = vmax.f32 %v3653_v59, %v3701_v31  ;;  %v4089_v18 = vpack.c.bf16 %v7930_v16, %v7924_v50  ;;  %v3715_v28 = vmax.f32 %v3619_v21, %v3667_v52  ;;  %v3442_v12 = vmax.f32 %v3670_v51, %v3673_v2  ;;  %v3500_v31 = vld [vmem:[#allocation2 + $0x1d6] sm:$0xf] }
 0x280   : > { %v3445_v13 = vmax.f32 %v3673_v2, %v3676_v3  ;;  %v3535_v19 = vmax.f32 %v3439_v44, %v3673_v2  ;;  %v3448_v54 = vmax.f32 %v3676_v3, %v7874_v35  ;;  %v3718_v0 = vmax.f32 %v3622_v24, %v3670_v51  ;;  %v3596_v4 = vld [vmem:[#allocation2 + $0x1f6] sm:$0xf] }
 0x281   : > { %3797 = vst.msk [vmem:[#allocation3 + $0x178] sm:$0xf] %vm1446_vm4, %v3749_v47  ;;  %v3538_v36 = vmax.f32 %v3442_v12, %v3676_v3  ;;  %v3721_v34 = vmax.f32 %v3625_v45, %v3673_v2  ;;  %v3628_v15 = vmax.f32 %v3532_v46, %v3673_v2  ;;  %v3450_v11 = vmax.f32 %v3399_v22, %v7942_v23  ;;  %v3407_v30 = vld [vmem:[#allocation2 + $0x1d6] sm:$0xf] }
 0x282   : > { %3763 = vst.msk [vmem:[#allocation3 + $0x68] sm:$0xff] %vm909_vm2, %v3715_v28  ;;  %v3541_v29 = vmax.f32 %v3445_v13, %v7874_v35  ;;  %v3631_v57 = vmax.f32 %v3535_v19, %v3676_v3  ;;  %v3544_v48 = vmax.f32 %v3448_v54, %v7886_v32  ;;  %3766 = vst.msk [vmem:[#allocation3 + $0x80] sm:$0xff] %vm909_vm2, %v3718_v0  ;;  %v3410_v25 = vld [vmem:[#allocation2 + $0x1f6] sm:$0xf] }
 0x283   : > { %v3634_v10 = vmax.f32 %v3538_v36, %v7874_v35  ;;  %3769 = vst.msk [vmem:[#allocation3 + $0x98] sm:$0xff] %vm909_vm2, %v3721_v34  ;;  %v3724_v61 = vmax.f32 %v3628_v15, %v3676_v3  ;;  %v3452_v41 = vmax.f32 %v3356_v37, %v3404_v39  ;;  %v3692_v5 = vld [vmem:[#allocation2 + $0x216] sm:$0xf]  ;;  %v3735_v6 = vmax.f32 %v3639_v1, %v7958_v62  ;;  %v3693_v3 = vld [vmem:[#allocation2 + $0x226] sm:$0xff] }
 0x284   : > { %v3637_v40 = vmax.f32 %v3541_v29, %v7886_v32  ;;  %v3727_v9 = vmax.f32 %v3631_v57, %v7874_v35  ;;  %v3640_v33 = vmax.f32 %v3544_v48, %v7896_v26  ;;  %v3359_v52 = vld [vmem:[#allocation2 + $0x1b6] sm:$0xf]  ;;  %v3546_v55 = vmax.f32 %v3450_v11, %v7948_v27  ;;  %5146 = vmatmul.mubr.msk.bf16.gmra.mrb[20].mxu1 %vm909_vm2, %v4089_v18 }
 0x285   : > { %v3730_v59 = vmax.f32 %v3634_v10, %v7886_v32  ;;  %3772 = vst.msk [vmem:[#allocation3 + $0xb0] sm:$0xff] %vm909_vm2, %v3724_v61  ;;  %v3548_v43 = vmax.f32 %v3452_v41, %v3500_v31  ;;  %v3453_v35 = vmax.f32 %v7942_v23, %v7948_v27  ;;  %v3503_v32 = vld [vmem:[#allocation2 + $0x1f6] sm:$0xf]  ;;  %v3455_v58 = vmax.f32 %v3359_v52, %v3407_v30  ;;  %v3812_v30 = vld [vmem:[#allocation3 + $0xa8] sm:$0xff] }
 0x286   : > { %v3733_v42 = vmax.f32 %v3637_v40, %v7896_v26  ;;  %v3362_v51 = vld [vmem:[#allocation2 + $0x1d6] sm:$0xf]  ;;  %3775 = vst.msk [vmem:[#allocation3 + $0xc8] sm:$0xff] %vm909_vm2, %v3727_v9  ;;  %v3736_v26 = vmax.f32 %v3640_v33, %v7904_v53  ;;  %v3456_v17 = vmax.f32 %v7948_v27, %v7958_v62  ;;  %3783 = vst.msk [vmem:[#allocation3 + $0x108] sm:$0xff] %vm909_vm2, %v3735_v6  ;;  %v5562_v9 = vld [vmem:[#allocation2 + $0x246] sm:$0xff] }
 0x287   : > { %3778 = vst.msk [vmem:[#allocation3 + $0xe0] sm:$0xff] %vm909_vm2, %v3730_v59  ;;  %v3599_v2 = vld [vmem:[#allocation2 + $0x216] sm:$0xf]  ;;  %v3458_v47 = vmax.f32 %v3362_v51, %v3410_v25  ;;  %v3642_v7 = vmax.f32 %v3546_v55, %v7958_v62  ;;  %v3644_v49 = vmax.f32 %v3548_v43, %v3596_v4  ;;  %v3549_v28 = vmax.f32 %v3453_v35, %v7958_v62 }
 0x288   : > { %3781 = vst.msk [vmem:[#allocation3 + $0xf8] sm:$0xff] %vm909_vm2, %v3733_v42  ;;  %v3506_v21 = vld [vmem:[#allocation2 + $0x216] sm:$0xf]  ;;  %v3459_v53 = vmax.f32 %v7958_v62, %v7972_v63  ;;  %3784 = vst.msk [vmem:[#allocation3 + $0x110] sm:$0xff] %vm909_vm2, %v3736_v26  ;;  %v3551_v8 = vmax.f32 %v3455_v58, %v3503_v32  ;;  %v3552_v24 = vmax.f32 %v3456_v17, %v7972_v63 }
 0x289   : > { %v3807_v22 = vld [vmem:[#allocation3 + $0x68] sm:$0xff]  ;;  %v3808_v13 = vld [vmem:[#allocation3 + $0x78] sm:$0xff]  ;;  %v3810_v19 = vld [vmem:[#allocation3 + $0x90] sm:$0xff]  ;;  %v3738_v36 = vmax.f32 %v3642_v7, %v7972_v63  ;;  %v3740_v29 = vmax.f32 %v3644_v49, %v3692_v5  ;;  %v3645_v54 = vmax.f32 %v3549_v28, %v7972_v63  ;;  %v3554_v27 = vmax.f32 %v3458_v47, %v3506_v21 }
 0x28a   : > { %v3838_v14 = vld [vmem:[#allocation3 + $0x61] sm:$0xff]  ;;  %v3839_v60 = vld [vmem:[#allocation3 + $0x69] sm:$0xff]  ;;  %v3695_v23 = vld [vmem:[#allocation2 + $0x236] sm:$0xf]  ;;  %v3647_v10 = vmax.f32 %v3551_v8, %v3599_v2  ;;  %v3648_v40 = vmax.f32 %v3552_v24, %v3693_v3  ;;  %v3555_v6 = vmax.f32 %v3459_v53, %v3693_v3 }
 0x28b   : > { %v3870_v44 = vmax.f32 %v3806_v56, %v3838_v14  ;;  %v3871_v12 = vmax.f32 %v3807_v22, %v3839_v60  ;;  %v3602_v45 = vld [vmem:[#allocation2 + $0x236] sm:$0xf]  ;;  %v3902_v46 = vld [vmem:[#allocation3 + $0x62] sm:$0xff]  ;;  %v3903_v38 = vld [vmem:[#allocation3 + $0x6a] sm:$0xff]  ;;  %3786 = vst.msk [vmem:[#allocation3 + $0x120] sm:$0xff] %vm909_vm2, %v3738_v36  ;;  %v3741_v1 = vmax.f32 %v3645_v54, %v3693_v3 }
 0x28c   : > { %v3698_v39 = vld [vmem:[#allocation2 + $0x256] sm:$0xf]  ;;  %v3809_v15 = vld [vmem:[#allocation3 + $0x80] sm:$0xff]  ;;  %v3967_v62 = vld [vmem:[#allocation3 + $0x6b] sm:$0xff]  ;;  %3788 = vst.msk [vmem:[#allocation3 + $0x130] sm:$0xf] %vm1446_vm4, %v3740_v29  ;;  %v3650_v50 = vmax.f32 %v3554_v27, %v3602_v45  ;;  %v3743_v25 = vmax.f32 %v3647_v10, %v3695_v23  ;;  %v3744_v59 = vmax.f32 %v3648_v40, %v5562_v9  ;;  %v3651_v3 = vmax.f32 %v3555_v6, %v5562_v9 }
 0x28d   : > { %v3934_v0 = vmax.f32 %v3870_v44, %v3902_v46  ;;  %v3935_v34 = vmax.f32 %v3871_v12, %v3903_v38  ;;  %v3840_v20 = vld [vmem:[#allocation3 + $0x79] sm:$0xff]  ;;  %v3841_v57 = vld [vmem:[#allocation3 + $0x81] sm:$0xff]  ;;  %v4031_v11 = vld [vmem:[#allocation3 + $0x6c] sm:$0xff]  ;;  %3789 = vst.msk [vmem:[#allocation3 + $0x138] sm:$0xff] %vm909_vm2, %v3741_v1 }
 0x28e   : > { %v3966_v48 = vld [vmem:[#allocation3 + $0x63] sm:$0xff]  ;;  %v3872_v31 = vmax.f32 %v3808_v13, %v3840_v20  ;;  %v3873_v61 = vmax.f32 %v3809_v15, %v3841_v57  ;;  %v3904_v41 = vld [vmem:[#allocation3 + $0x7a] sm:$0xff]  ;;  %v3842_v5 = vld [vmem:[#allocation3 + $0x91] sm:$0xff]  ;;  %v3746_v56 = vmax.f32 %v3650_v50, %v3698_v39  ;;  %3791 = vst.msk [vmem:[#allocation3 + $0x148] sm:$0xf] %vm1446_vm4, %v3743_v25 }
 0x28f   : > { %v4030_v37 = vld [vmem:[#allocation3 + $0x64] sm:$0xff]  ;;  %v3998_v16 = vmax.f32 %v3934_v0, %v3966_v48  ;;  %v3999_v18 = vmax.f32 %v3935_v34, %v3967_v62  ;;  %v3811_v63 = vld [vmem:[#allocation3 + $0x98] sm:$0xff]  ;;  %v3874_v26 = vmax.f32 %v3810_v19, %v3842_v5  ;;  %3792 = vst.msk [vmem:[#allocation3 + $0x150] sm:$0xff] %vm909_vm2, %v3744_v59  ;;  %v3813_v28 = vld [vmem:[#allocation3 + $0xb0] sm:$0xff] }
 0x290   : > { %v3905_v4 = vld [vmem:[#allocation3 + $0x82] sm:$0xff]  ;;  %v3936_v42 = vmax.f32 %v3872_v31, %v3904_v41  ;;  %v3843_v52 = vld [vmem:[#allocation3 + $0x99] sm:$0xff]  ;;  %3794 = vst.msk [vmem:[#allocation3 + $0x160] sm:$0xf] %vm1446_vm4, %v3746_v56  ;;  %v3845_v44 = vld [vmem:[#allocation3 + $0xb1] sm:$0xff] }
 0x291   : > { %v3937_v33 = vmax.f32 %v3873_v61, %v3905_v4  ;;  %v4062_v55 = vmax.f32 %v3998_v16, %v4030_v37  ;;  %v4063_v43 = vmax.f32 %v3999_v18, %v4031_v11  ;;  %v3968_v35 = vld [vmem:[#allocation3 + $0x7b] sm:$0xff]  ;;  %v3969_v32 = vld [vmem:[#allocation3 + $0x83] sm:$0xff]  ;;  %v3875_v58 = vmax.f32 %v3811_v63, %v3843_v52  ;;  %v3906_v21 = vld [vmem:[#allocation3 + $0x92] sm:$0xff] }
 0x292   : > { %v4032_v51 = vld [vmem:[#allocation3 + $0x7c] sm:$0xff]  ;;  %v4000_v2 = vmax.f32 %v3936_v42, %v3968_v35  ;;  %v4033_v47 = vld [vmem:[#allocation3 + $0x84] sm:$0xff]  ;;  %v3938_v7 = vmax.f32 %v3874_v26, %v3906_v21  ;;  %v3970_v8 = vld [vmem:[#allocation3 + $0x93] sm:$0xff]  ;;  %v3877_v46 = vmax.f32 %v3813_v28, %v3845_v44 }
 0x293   : > { %v4001_v17 = vmax.f32 %v3937_v33, %v3969_v32  ;;  %v3907_v22 = vld [vmem:[#allocation3 + $0x9a] sm:$0xff]  ;;  %v4090_v60 = vpack.c.bf16 %v4063_v43, %v4062_v55  ;;  %v3844_v53 = vld [vmem:[#allocation3 + $0xa9] sm:$0xff]  ;;  %v3909_v54 = vld [vmem:[#allocation3 + $0xb2] sm:$0xff] }
 0x294   : > { %v3814_v14 = vld [vmem:[#allocation3 + $0xc0] sm:$0xff]  ;;  %v3939_v49 = vmax.f32 %v3875_v58, %v3907_v22  ;;  %v4064_v12 = vmax.f32 %v4000_v2, %v4032_v51  ;;  %v4034_v24 = vld [vmem:[#allocation3 + $0x94] sm:$0xff]  ;;  %v3876_v45 = vmax.f32 %v3812_v30, %v3844_v53  ;;  %v4002_v38 = vmax.f32 %v3938_v7, %v3970_v8  ;;  %v3908_v29 = vld [vmem:[#allocation3 + $0xaa] sm:$0xff] }
 0x295   : > { %v4065_v13 = vmax.f32 %v4001_v17, %v4033_v47  ;;  %v3971_v23 = vld [vmem:[#allocation3 + $0x9b] sm:$0xff]  ;;  %5149 = vmatprep.mubr.msk.bf16.mxu1 %vm909_vm2, %v4090_v60  ;;  %v5563_v39 = vld [vmem:[#allocation2 + $0x266] sm:$0xff]  ;;  %v3941_v20 = vmax.f32 %v3877_v46, %v3909_v54  ;;  %v3973_v31 = vld [vmem:[#allocation3 + $0xb3] sm:$0xff] }
 0x296   : > { %v4003_v19 = vmax.f32 %v3939_v49, %v3971_v23  ;;  %v4035_v36 = vld [vmem:[#allocation3 + $0x9c] sm:$0xff]  ;;  %v3747_v0 = vmax.f32 %v3651_v3, %v5563_v39  ;;  %v3940_v15 = vmax.f32 %v3876_v45, %v3908_v29  ;;  %v3815_v57 = vld [vmem:[#allocation3 + $0xc8] sm:$0xff]  ;;  %v4066_v48 = vmax.f32 %v4002_v38, %v4034_v24  ;;  %v4037_v11 = vld [vmem:[#allocation3 + $0xb4] sm:$0xff] }
 0x297   : > { %v3816_v27 = vld [vmem:[#allocation3 + $0xd8] sm:$0xff]  ;;  %v4091_v34 = vpack.c.bf16 %v4065_v13, %v4064_v12  ;;  %v3846_v10 = vld [vmem:[#allocation3 + $0xc1] sm:$0xff]  ;;  %v3847_v40 = vld [vmem:[#allocation3 + $0xc9] sm:$0xff]  ;;  %v4005_v18 = vmax.f32 %v3941_v20, %v3973_v31 }
 0x298   : > { %v4067_v62 = vmax.f32 %v4003_v19, %v4035_v36  ;;  %v3972_v37 = vld [vmem:[#allocation3 + $0xab] sm:$0xff]  ;;  %v3878_v1 = vmax.f32 %v3814_v14, %v3846_v10  ;;  %v3879_v50 = vmax.f32 %v3815_v57, %v3847_v40  ;;  %3795 = vst.msk [vmem:[#allocation3 + $0x168] sm:$0xff] %vm909_vm2, %v3747_v0  ;;  %v3910_v41 = vld [vmem:[#allocation3 + $0xc2] sm:$0xff]  ;;  %v3848_v33 = vld [vmem:[#allocation3 + $0xd9] sm:$0xff] }
 0x299   : > { %v4036_v61 = vld [vmem:[#allocation3 + $0xac] sm:$0xff]  ;;  %5150 = vmatmul.mubr.msk.bf16.gmra.mrb[24].mxu1 %vm909_vm2, %v4091_v34  ;;  %v4004_v16 = vmax.f32 %v3940_v15, %v3972_v37  ;;  %v3817_v42 = vld [vmem:[#allocation3 + $0xe0] sm:$0xff]  ;;  %v4069_v52 = vmax.f32 %v4005_v18, %v4037_v11  ;;  %v3880_v43 = vmax.f32 %v3816_v27, %v3848_v33  ;;  %v3819_v21 = vld [vmem:[#allocation3 + $0xf8] sm:$0xff] }
 0x29a   : > { %v3911_v4 = vld [vmem:[#allocation3 + $0xca] sm:$0xff]  ;;  %v4092_v25 = vpack.c.bf16 %v4067_v62, %v4066_v48  ;;  %v3942_v9 = vmax.f32 %v3878_v1, %v3910_v41  ;;  %v3849_v63 = vld [vmem:[#allocation3 + $0xe1] sm:$0xff]  ;;  %v3851_v14 = vld [vmem:[#allocation3 + $0xf9] sm:$0xff] }
 0x29b   : > { %v3818_v30 = vld [vmem:[#allocation3 + $0xf0] sm:$0xff]  ;;  %v3943_v59 = vmax.f32 %v3879_v50, %v3911_v4  ;;  %v4068_v5 = vmax.f32 %v4004_v16, %v4036_v61  ;;  %v3974_v56 = vld [vmem:[#allocation3 + $0xc3] sm:$0xff]  ;;  %v3881_v35 = vmax.f32 %v3817_v42, %v3849_v63  ;;  %v3912_v58 = vld [vmem:[#allocation3 + $0xda] sm:$0xff]  ;;  %v3883_v53 = vmax.f32 %v3819_v21, %v3851_v14 }
 0x29c   : > { %v3975_v6 = vld [vmem:[#allocation3 + $0xcb] sm:$0xff]  ;;  %5153 = vmatprep.mubr.msk.bf16.mxu1 %vm909_vm2, %v4092_v25  ;;  %v4006_v32 = vmax.f32 %v3942_v9, %v3974_v56  ;;  %v3913_v2 = vld [vmem:[#allocation3 + $0xe2] sm:$0xff]  ;;  %v3944_v17 = vmax.f32 %v3880_v43, %v3912_v58  ;;  %v3915_v23 = vld [vmem:[#allocation3 + $0xfa] sm:$0xff] }
 0x29d   : > { %v4038_v55 = vld [vmem:[#allocation3 + $0xc4] sm:$0xff]  ;;  %v4007_v51 = vmax.f32 %v3943_v59, %v3975_v6  ;;  %v4039_v26 = vld [vmem:[#allocation3 + $0xcc] sm:$0xff]  ;;  %v3945_v47 = vmax.f32 %v3881_v35, %v3913_v2  ;;  %v3976_v7 = vld [vmem:[#allocation3 + $0xdb] sm:$0xff]  ;;  %v4093_v44 = vpack.c.bf16 %v4069_v52, %v4068_v5  ;;  %v3947_v19 = vmax.f32 %v3883_v53, %v3915_v23 }
 0x29e   : > { %v3850_v22 = vld [vmem:[#allocation3 + $0xf1] sm:$0xff]  ;;  %v4070_v3 = vmax.f32 %v4006_v32, %v4038_v55  ;;  %v3977_v49 = vld [vmem:[#allocation3 + $0xe3] sm:$0xff]  ;;  %v4008_v12 = vmax.f32 %v3944_v17, %v3976_v7  ;;  %v3979_v0 = vld [vmem:[#allocation3 + $0xfb] sm:$0xff] }
 0x29f   : > { %v4071_v60 = vmax.f32 %v4007_v51, %v4039_v26  ;;  %v3882_v28 = vmax.f32 %v3818_v30, %v3850_v22  ;;  %v4009_v13 = vmax.f32 %v3945_v47, %v3977_v49  ;;  %v3914_v8 = vld [vmem:[#allocation3 + $0xf2] sm:$0xff]  ;;  %v4040_v45 = vld [vmem:[#allocation3 + $0xdc] sm:$0xff]  ;;  %v4041_v46 = vld [vmem:[#allocation3 + $0xe4] sm:$0xff]  ;;  %v4011_v57 = vmax.f32 %v3947_v19, %v3979_v0 }
 0x2a0   : > { %v3820_v36 = vld [vmem:[#allocation3 + $0x108] sm:$0xff]  ;;  %v3821_v29 = vld [vmem:[#allocation3 + $0x110] sm:$0xff]  ;;  %v4043_v40 = vld [vmem:[#allocation3 + $0xfc] sm:$0xff]  ;;  %v4072_v37 = vmax.f32 %v4008_v12, %v4040_v45 }
 0x2a1   : > { %v4094_v24 = vpack.c.bf16 %v4071_v60, %v4070_v3  ;;  %v3946_v38 = vmax.f32 %v3882_v28, %v3914_v8  ;;  %v3852_v54 = vld [vmem:[#allocation3 + $0x109] sm:$0xff]  ;;  %5154 = vmatmul.mubr.msk.bf16.gmra.mrb[28].mxu1 %vm909_vm2, %v4093_v44  ;;  %v3978_v39 = vld [vmem:[#allocation3 + $0xf3] sm:$0xff]  ;;  %v4073_v31 = vmax.f32 %v4009_v13, %v4041_v46  ;;  %v3822_v50 = vld [vmem:[#allocation3 + $0x120] sm:$0xff]  ;;  %v4075_v11 = vmax.f32 %v4011_v57, %v4043_v40 }
 0x2a2   : > { %v3823_v27 = vld [vmem:[#allocation3 + $0x128] sm:$0xff]  ;;  %v3853_v34 = vld [vmem:[#allocation3 + $0x111] sm:$0xff]  ;;  %v3884_v15 = vmax.f32 %v3820_v36, %v3852_v54  ;;  %v3825_v25 = vld [vmem:[#allocation3 + $0x140] sm:$0xff] }
 0x2a3   : > { %5157 = vmatprep.mubr.msk.bf16.mxu1 %vm909_vm2, %v4094_v24  ;;  %v4010_v20 = vmax.f32 %v3946_v38, %v3978_v39  ;;  %v4042_v10 = vld [vmem:[#allocation3 + $0xf4] sm:$0xff]  ;;  %v3885_v48 = vmax.f32 %v3821_v29, %v3853_v34  ;;  %v3916_v62 = vld [vmem:[#allocation3 + $0x10a] sm:$0xff]  ;;  %v3854_v16 = vld [vmem:[#allocation3 + $0x121] sm:$0xff]  ;;  %v4095_v55 = vpack.c.bf16 %v4073_v31, %v4072_v37 }
 0x2a4   : > { %v3917_v61 = vld [vmem:[#allocation3 + $0x112] sm:$0xff]  ;;  %v3948_v1 = vmax.f32 %v3884_v15, %v3916_v62  ;;  %v3855_v4 = vld [vmem:[#allocation3 + $0x129] sm:$0xff]  ;;  %v3886_v30 = vmax.f32 %v3822_v50, %v3854_v16  ;;  %v3857_v51 = vld [vmem:[#allocation3 + $0x141] sm:$0xff] }
 0x2a5   : > { %v4074_v18 = vmax.f32 %v4010_v20, %v4042_v10  ;;  %v3949_v41 = vmax.f32 %v3885_v48, %v3917_v61  ;;  %v3980_v9 = vld [vmem:[#allocation3 + $0x10b] sm:$0xff]  ;;  %v3981_v59 = vld [vmem:[#allocation3 + $0x113] sm:$0xff]  ;;  %v3887_v42 = vmax.f32 %v3823_v27, %v3855_v4  ;;  %v3918_v33 = vld [vmem:[#allocation3 + $0x122] sm:$0xff]  ;;  %v3889_v21 = vmax.f32 %v3825_v25, %v3857_v51 }
 0x2a6   : > { %v4012_v63 = vmax.f32 %v3948_v1, %v3980_v9  ;;  %v3919_v5 = vld [vmem:[#allocation3 + $0x12a] sm:$0xff]  ;;  %v3950_v52 = vmax.f32 %v3886_v30, %v3918_v33  ;;  %v3824_v56 = vld [vmem:[#allocation3 + $0x138] sm:$0xff]  ;;  %v3921_v12 = vld [vmem:[#allocation3 + $0x142] sm:$0xff] }
 0x2a7   : > { %v3856_v6 = vld [vmem:[#allocation3 + $0x139] sm:$0xff]  ;;  %v4013_v43 = vmax.f32 %v3949_v41, %v3981_v59  ;;  %v3951_v35 = vmax.f32 %v3887_v42, %v3919_v5  ;;  %v3982_v32 = vld [vmem:[#allocation3 + $0x123] sm:$0xff]  ;;  %v4096_v58 = vpack.c.bf16 %v4075_v11, %v4074_v18  ;;  %v4044_v2 = vld [vmem:[#allocation3 + $0x10c] sm:$0xff]  ;;  %v3953_v38 = vmax.f32 %v3889_v21, %v3921_v12 }
 0x2a8   : > { %v3888_v26 = vmax.f32 %v3824_v56, %v3856_v6  ;;  %v3983_v17 = vld [vmem:[#allocation3 + $0x12b] sm:$0xff]  ;;  %v4014_v47 = vmax.f32 %v3950_v52, %v3982_v32  ;;  %v3827_v22 = vld [vmem:[#allocation3 + $0x158] sm:$0xff]  ;;  %v4076_v53 = vmax.f32 %v4012_v63, %v4044_v2  ;;  %v3985_v57 = vld [vmem:[#allocation3 + $0x143] sm:$0xff] }
 0x2a9   : > { %5158 = vmatmul.mubr.msk.bf16.gmra.mrb[0].mxu1 %vm909_vm2, %v4095_v55  ;;  %v4045_v14 = vld [vmem:[#allocation3 + $0x114] sm:$0xff]  ;;  %v4015_v3 = vmax.f32 %v3951_v35, %v3983_v17  ;;  %v4046_v24 = vld [vmem:[#allocation3 + $0x124] sm:$0xff]  ;;  %v4047_v45 = vld [vmem:[#allocation3 + $0x12c] sm:$0xff]  ;;  %v4017_v62 = vmax.f32 %v3953_v38, %v3985_v57 }
 0x2aa   : > { %v3826_v60 = vld [vmem:[#allocation3 + $0x150] sm:$0xff]  ;;  %5161 = vmatprep.mubr.msk.bf16.mxu1 %vm909_vm2, %v4096_v58  ;;  %v3920_v44 = vld [vmem:[#allocation3 + $0x13a] sm:$0xff]  ;;  %v4077_v23 = vmax.f32 %v4013_v43, %v4045_v14  ;;  %v4078_v29 = vmax.f32 %v4014_v47, %v4046_v24  ;;  %v3828_v0 = vld [vmem:[#allocation3 + $0x168] sm:$0xff] }
 0x2ab   : > { %v3858_v7 = vld [vmem:[#allocation3 + $0x151] sm:$0xff]  ;;  %v3859_v13 = vld [vmem:[#allocation3 + $0x159] sm:$0xff]  ;;  %v3952_v46 = vmax.f32 %v3888_v26, %v3920_v44  ;;  %v4079_v54 = vmax.f32 %v4015_v3, %v4047_v45  ;;  %v3860_v34 = vld [vmem:[#allocation3 + $0x169] sm:$0xff] }
 0x2ac   : > { %v3829_v49 = vld [vmem:[#allocation3 + $0x170] sm:$0xff]  ;;  %v3890_v8 = vmax.f32 %v3826_v60, %v3858_v7  ;;  %v3891_v19 = vmax.f32 %v3827_v22, %v3859_v13  ;;  %v3923_v27 = vld [vmem:[#allocation3 + $0x15a] sm:$0xff]  ;;  %v4097_v40 = vpack.c.bf16 %v4077_v23, %v4076_v53  ;;  %v3892_v61 = vmax.f32 %v3828_v0, %v3860_v34  ;;  %v4049_v41 = vld [vmem:[#allocation3 + $0x144] sm:$0xff] }
 0x2ad   : > { %v3861_v28 = vld [vmem:[#allocation3 + $0x171] sm:$0xff]  ;;  %v3984_v20 = vld [vmem:[#allocation3 + $0x13b] sm:$0xff]  ;;  %v4098_v1 = vpack.c.bf16 %v4079_v54, %v4078_v29  ;;  %v4081_v25 = vmax.f32 %v4017_v62, %v4049_v41 }
 0x2ae   : > { %v3922_v36 = vld [vmem:[#allocation3 + $0x152] sm:$0xff]  ;;  %v3955_v15 = vmax.f32 %v3891_v19, %v3923_v27  ;;  %v3893_v10 = vmax.f32 %v3829_v49, %v3861_v28  ;;  %v4016_v48 = vmax.f32 %v3952_v46, %v3984_v20  ;;  %v3987_v31 = vld [vmem:[#allocation3 + $0x15b] sm:$0xff]  ;;  %v3924_v4 = vld [vmem:[#allocation3 + $0x16a] sm:$0xff] }
 0x2af   : > { %v3954_v39 = vmax.f32 %v3890_v8, %v3922_v36  ;;  %v3986_v37 = vld [vmem:[#allocation3 + $0x153] sm:$0xff]  ;;  %v4048_v11 = vld [vmem:[#allocation3 + $0x13c] sm:$0xff]  ;;  %v3956_v42 = vmax.f32 %v3892_v61, %v3924_v4  ;;  %v3988_v52 = vld [vmem:[#allocation3 + $0x16b] sm:$0xff] }
 0x2b0   : > { %v4019_v16 = vmax.f32 %v3955_v15, %v3987_v31  ;;  %v3925_v18 = vld [vmem:[#allocation3 + $0x172] sm:$0xff]  ;;  %v4080_v30 = vmax.f32 %v4016_v48, %v4048_v11  ;;  %v4051_v59 = vld [vmem:[#allocation3 + $0x15c] sm:$0xff] }
 0x2b1   : > { %v4018_v50 = vmax.f32 %v3954_v39, %v3986_v37  ;;  %5162 = vmatmul.mubr.msk.bf16.gmra.mrb[4].mxu1 %vm909_vm2, %v4097_v40  ;;  %v4050_v9 = vld [vmem:[#allocation3 + $0x154] sm:$0xff]  ;;  %v3957_v33 = vmax.f32 %v3893_v10, %v3925_v18  ;;  %v4020_v55 = vmax.f32 %v3956_v42, %v3988_v52  ;;  %v4052_v32 = vld [vmem:[#allocation3 + $0x16c] sm:$0xff]  ;;  %v8066_v48 = vld [vmem:[%s8366_s5] ss:$0 sm:$0xff] }
 0x2b2   : > { %5165 = vmatprep.mubr.msk.bf16.mxu1 %vm909_vm2, %v4098_v1  ;;  %v4083_v5 = vmax.f32 %v4019_v16, %v4051_v59  ;;  %v3989_v56 = vld [vmem:[#allocation3 + $0x173] sm:$0xff]  ;;  %v4099_v6 = vpack.c.bf16 %v4081_v25, %v4080_v30  ;;  %v8071_v31 = vld [vmem:[%s8367_s6] ss:$0 sm:$0xff] }
 0x2b3   : > { %v4082_v63 = vmax.f32 %v4018_v50, %v4050_v9  ;;  %v4021_v43 = vmax.f32 %v3957_v33, %v3989_v56  ;;  %v4053_v51 = vld [vmem:[#allocation3 + $0x174] sm:$0xff]  ;;  %v4084_v26 = vmax.f32 %v4020_v55, %v4052_v32 }
 0x2b5   : > { %v4100_v35 = vpack.c.bf16 %v4083_v5, %v4082_v63  ;;  %v4085_v58 = vmax.f32 %v4021_v43, %v4053_v51 }
 0x2b7   : > { %v4101_v2 = vpack.c.bf16 %v4085_v58, %v4084_v26 }
 0x2b9   : > { %5166 = vmatmul.mubr.msk.bf16.gmra.mrb[8].mxu1 %vm909_vm2, %v4099_v6 }
 0x2ba   : > { %5169 = vmatprep.mubr.msk.bf16.mxu1 %vm909_vm2, %v4100_v35 }
 0x2c1   : > { %5170 = vmatmul.mubr.msk.bf16.gmra.mrb[12].mxu1 %vm909_vm2, %v4101_v2  ;;  %v8017_v17 = vpop.f32.mrb[48].mxu0 }
 0x2c2   : > { %v8019_v47 = vpop.f32.mrb[49].mxu0 }
 0x2c3   : > { %v8021_v21 = vpop.f32.mrb[50].mxu0 }
 0x2c4   : > { %v8023_v22 = vpop.f32.mrb[51].mxu0 }
 0x2cf   : > { %v8025_v14 = vpop.f32.mrb[52].mxu0 }
 0x2d0   : > { %v8027_v3 = vpop.f32.mrb[53].mxu0 }
 0x2d1   : > { %v8029_v60 = vpop.f32.mrb[54].mxu0 }
 0x2d2   : > { %v8031_v7 = vpop.f32.mrb[55].mxu0 }
 0x2d9   : > { %v8033_v49 = vpop.f32.mrb[56].mxu0 }
 0x2da   : > { %v8035_v28 = vpop.f32.mrb[57].mxu0 }
 0x2db   : > { %v8037_v53 = vpop.f32.mrb[58].mxu0 }
 0x2dc   : > { %v8039_v44 = vpop.f32.mrb[59].mxu0 }
 0x2ef   : > { %v8041_v12 = vpop.f32.mrb[60].mxu0 }
 0x2f0   : > { %v8043_v13 = vpop.f32.mrb[61].mxu0 }
 0x2f1   : > { %v8045_v8 = vpop.f32.mrb[62].mxu0 }
 0x2f2   : > { %v8047_v23 = vpop.f32.mrb[63].mxu0 }
 0x311   : > { %v5075_v24 = vpop.f32.mrb[32].mxu0 }
 0x312   : > { %v2097_v45 = vpop.f32.mrb[33].mxu0 }
 0x313   : > { %v5076_v46 = vpop.f32.mrb[34].mxu0 }
 0x314   : > { %v2100_v38 = vpop.f32.mrb[35].mxu0 }
 0x319   : > { %v5079_v19 = vpop.f32.mrb[36].mxu0 }
 0x31a   : > { %v2113_v36 = vpop.f32.mrb[37].mxu0 }
 0x31b   : > { %v5080_v29 = vpop.f32.mrb[38].mxu0 }
 0x31c   : > { %v2116_v54 = vpop.f32.mrb[39].mxu0 }
 0x334   : > { %v5083_v27 = vpop.f32.mrb[40].mxu0 }
 0x335   : > { %v8049_v39 = vpop.f32.mrb[41].mxu0 }
 0x336   : > { %v8051_v0 = vpop.f32.mrb[42].mxu0 }
 0x337   : > { %v8053_v34 = vpop.f32.mrb[43].mxu0 }
 0x33c   : > { %v8055_v15 = vpop.f32.mrb[44].mxu0 }
 0x33d   : > { %v8057_v20 = vpop.f32.mrb[45].mxu0 }
 0x33e   : > { %v8059_v57 = vpop.f32.mrb[46].mxu0 }
 0x33f   : > { %v8061_v10 = vpop.f32.mrb[47].mxu0 }
 0x34f   : > { %v5143_v40 = vpop.f32.mrb[16].mxu1 }
 0x350   : > { %v5175_v62 = vadd.f32 %v5143_v40, %v5075_v24  ;;  %v4189_v37 = vpop.f32.mrb[17].mxu1 }
 0x351   : > { %v5176_v61 = vadd.f32 %v4189_v37, %v2097_v45  ;;  %v5144_v1 = vpop.f32.mrb[18].mxu1 }
 0x352   : > { %v4357_v50 = vmul.f32 %v5175_v62, %v8066_v48  ;;  %v5177_v16 = vadd.f32 %v5144_v1, %v5076_v46  ;;  %v4192_v18 = vpop.f32.mrb[19].mxu1 }
 0x353   : > { %v4355_v11 = vmul.f32 %v5176_v61, %v8066_v48  ;;  %v5178_v41 = vadd.f32 %v4192_v18, %v2100_v38 }
 0x354   : > { %v8076_v4 = vadd.f32 %v8071_v31, %v4357_v50  ;;  %v4358_v30 = vmul.f32 %v5177_v16, %v8066_v48 }
 0x355   : > { %v8080_v25 = vadd.f32 %v8071_v31, %v4355_v11  ;;  %v4356_v9 = vmul.f32 %v5178_v41, %v8066_v48 }
 0x356   : > { %v4884_v59 = vmul.f32 -1.442695, %v8076_v4  ;;  %v8085_v42 = vadd.f32 %v8071_v31, %v4358_v30 }
 0x357   : > { %v4882_v33 = vmul.f32 -1.442695, %v8080_v25  ;;  %v8089_v63 = vadd.f32 %v8071_v31, %v4356_v9  ;;  %v5147_v5 = vpop.f32.mrb[20].mxu1 }
 0x358   : > { %5430 = vpow2.f32 %v4884_v59  ;;  %v4885_v52 = vmul.f32 -1.442695, %v8085_v42  ;;  %v5179_v56 = vadd.f32 %v5147_v5, %v5079_v19  ;;  %v4205_v6 = vpop.f32.mrb[21].mxu1 }
 0x359   : > { %5432 = vpow2.f32 %v4882_v33  ;;  %v4883_v55 = vmul.f32 -1.442695, %v8089_v63  ;;  %v5180_v43 = vadd.f32 %v4205_v6, %v2113_v36  ;;  %v5148_v35 = vpop.f32.mrb[22].mxu1 }
 0x35a   : > { %5434 = vpow2.f32 %v4885_v52  ;;  %v4361_v32 = vmul.f32 %v5179_v56, %v8066_v48  ;;  %v5181_v51 = vadd.f32 %v5148_v35, %v5080_v29  ;;  %v4208_v26 = vpop.f32.mrb[23].mxu1 }
 0x35b   : > { %5436 = vpow2.f32 %v4883_v55  ;;  %v4359_v58 = vmul.f32 %v5180_v43, %v8066_v48  ;;  %v5182_v2 = vadd.f32 %v4208_v26, %v2116_v54 }
 0x35c   : > { %v8096_v24 = vadd.f32 %v8071_v31, %v4361_v32  ;;  %v4362_v45 = vmul.f32 %v5181_v51, %v8066_v48 }
 0x35d   : > { %v8100_v46 = vadd.f32 %v8071_v31, %v4359_v58  ;;  %v4360_v38 = vmul.f32 %v5182_v2, %v8066_v48 }
 0x35e   : > { %v4888_v19 = vmul.f32 -1.442695, %v8096_v24  ;;  %v8105_v36 = vadd.f32 %v8071_v31, %v4362_v45 }
 0x35f   : > { %v4886_v29 = vmul.f32 -1.442695, %v8100_v46  ;;  %v8109_v40 = vadd.f32 %v8071_v31, %v4360_v38 }
 0x360   : > { %5438 = vpow2.f32 %v4888_v19  ;;  %v4889_v54 = vmul.f32 -1.442695, %v8105_v36 }
 0x361   : > { %5440 = vpow2.f32 %v4886_v29  ;;  %v4887_v62 = vmul.f32 -1.442695, %v8109_v40 }
 0x362   : > { %v5431_v37 = vpop.eup %5430  ;;  %5442 = vpow2.f32 %v4889_v54 }
 0x363   : > { %v5433_v1 = vpop.eup %5432  ;;  %v4524_v50 = vadd.f32 1.0, %v5431_v37  ;;  %5444 = vpow2.f32 %v4887_v62 }
 0x364   : > { %v5435_v11 = vpop.eup %5434  ;;  %v4522_v41 = vadd.f32 1.0, %v5433_v1 }
 0x365   : > { %v5437_v59 = vpop.eup %5436  ;;  %5446 = vrcp.f32 %v4524_v50  ;;  %v4525_v33 = vadd.f32 1.0, %v5435_v11 }
 0x366   : > { %5448 = vrcp.f32 %v4522_v41  ;;  %v4523_v6 = vadd.f32 1.0, %v5437_v59 }
 0x367   : > { %5450 = vrcp.f32 %v4525_v33 }
 0x368   : > { %5452 = vrcp.f32 %v4523_v6 }
 0x36a   : > { %v5439_v26 = vpop.eup %5438 }
 0x36b   : > { %v5441_v45 = vpop.eup %5440  ;;  %v4528_v38 = vadd.f32 1.0, %v5439_v26 }
 0x36c   : > { %v5151_v61 = vpop.f32.mrb[24].mxu1  ;;  %v5443_v62 = vpop.eup %5442  ;;  %v4526_v37 = vadd.f32 1.0, %v5441_v45 }
 0x36d   : > { %v5183_v16 = vadd.f32 %v5151_v61, %v5083_v27  ;;  %v4221_v18 = vpop.f32.mrb[25].mxu1 }
 0x36e   : > { %v5184_v30 = vadd.f32 %v4221_v18, %v8049_v39  ;;  %v5152_v9 = vpop.f32.mrb[26].mxu1  ;;  %v4529_v18 = vadd.f32 1.0, %v5443_v62 }
 0x36f   : > { %v4365_v5 = vmul.f32 %v5183_v16, %v8066_v48  ;;  %v5185_v52 = vadd.f32 %v5152_v9, %v8051_v0  ;;  %v4224_v56 = vpop.f32.mrb[27].mxu1  ;;  %v5445_v16 = vpop.eup %5444 }
 0x370   : > { %v4363_v55 = vmul.f32 %v5184_v30, %v8066_v48  ;;  %v5186_v27 = vadd.f32 %v4224_v56, %v8053_v34  ;;  %v5447_v33 = vpop.eup %5446 }
 0x371   : > { %v8119_v43 = vadd.f32 %v8071_v31, %v4365_v5  ;;  %v4366_v39 = vmul.f32 %v5185_v52, %v8066_v48  ;;  %v5449_v5 = vpop.eup %5448  ;;  %v4620_v52 = vmul.f32 %v5447_v33, %v8076_v4 }
 0x372   : > { %v8123_v35 = vadd.f32 %v8071_v31, %v4363_v55  ;;  %v4364_v0 = vmul.f32 %v5186_v27, %v8066_v48  ;;  %v5451_v6 = vpop.eup %5450  ;;  %v4618_v55 = vmul.f32 %v5449_v5, %v8080_v25 }
 0x373   : > { %v4892_v32 = vmul.f32 -1.442695, %v8119_v43  ;;  %v8128_v51 = vadd.f32 %v8071_v31, %v4366_v39  ;;  %4653 = vst.msk [vmem:[%s8146_s29 + $0x10] sm:$0xff] %vm4650_vm5, %v4620_v52  ;;  %v4621_v4 = vmul.f32 %v5451_v6, %v8085_v42 }
 0x374   : > { %v4890_v34 = vmul.f32 -1.442695, %v8123_v35  ;;  %v8132_v58 = vadd.f32 %v8071_v31, %v4364_v0  ;;  %v5155_v2 = vpop.f32.mrb[28].mxu1  ;;  %v5453_v0 = vpop.eup %5452  ;;  %4651 = vst.msk [vmem:[%s8146_s29] sm:$0xff] %vm4650_vm5, %v4618_v55 }
 0x375   : > { %5454 = vpow2.f32 %v4892_v32  ;;  %v4893_v19 = vmul.f32 -1.442695, %v8128_v51  ;;  %v5187_v29 = vadd.f32 %v5155_v2, %v8055_v15  ;;  %v4237_v54 = vpop.f32.mrb[29].mxu1  ;;  %v4527_v15 = vadd.f32 1.0, %v5445_v16  ;;  %4654 = vst.msk [vmem:[%s8146_s29 + $0x18] sm:$0xff] %vm4650_vm5, %v4621_v4 }
 0x376   : > { %5456 = vpow2.f32 %v4890_v34  ;;  %v4891_v61 = vmul.f32 -1.442695, %v8132_v58  ;;  %v5188_v1 = vadd.f32 %v4237_v54, %v8057_v20  ;;  %v5156_v50 = vpop.f32.mrb[30].mxu1  ;;  %v4619_v34 = vmul.f32 %v5453_v0, %v8089_v63 }
 0x377   : > { %5458 = vrcp.f32 %v4528_v38  ;;  %v4369_v11 = vmul.f32 %v5187_v29, %v8066_v48  ;;  %v5189_v41 = vadd.f32 %v5156_v50, %v8059_v57  ;;  %v4240_v30 = vpop.f32.mrb[31].mxu1 }
 0x378   : > { %5460 = vrcp.f32 %v4526_v37  ;;  %v4367_v9 = vmul.f32 %v5188_v1, %v8066_v48  ;;  %v5190_v59 = vadd.f32 %v4240_v30, %v8061_v10  ;;  %4652 = vst.msk [vmem:[%s8146_s29 + $0x8] sm:$0xff] %vm4650_vm5, %v4619_v34 }
 0x379   : > { %5462 = vrcp.f32 %v4529_v18  ;;  %v8149_v20 = vadd.f32 %v8071_v31, %v4369_v11  ;;  %v4370_v57 = vmul.f32 %v5189_v41, %v8066_v48 }
 0x37a   : > { %5464 = vrcp.f32 %v4527_v15  ;;  %v8154_v10 = vadd.f32 %v8071_v31, %v4367_v9  ;;  %v4368_v56 = vmul.f32 %v5190_v59, %v8066_v48 }
 0x37b   : > { %5466 = vpow2.f32 %v4893_v19  ;;  %v4896_v27 = vmul.f32 -1.442695, %v8149_v20  ;;  %v8160_v39 = vadd.f32 %v8071_v31, %v4370_v57 }
 0x37c   : > { %5468 = vpow2.f32 %v4891_v61  ;;  %v4894_v32 = vmul.f32 -1.442695, %v8154_v10  ;;  %v8167_v26 = vadd.f32 %v8071_v31, %v4368_v56  ;;  %v5159_v25 = vpop.f32.mrb[0].mxu1 }
 0x37d   : > { %5470 = vpow2.f32 %v4896_v27  ;;  %v4897_v2 = vmul.f32 -1.442695, %v8160_v39  ;;  %v5191_v45 = vadd.f32 %v5159_v25, %v8017_v17  ;;  %v4253_v38 = vpop.f32.mrb[1].mxu1 }
 0x37e   : > { %5472 = vpow2.f32 %v4894_v32  ;;  %v4895_v42 = vmul.f32 -1.442695, %v8167_v26  ;;  %v5192_v19 = vadd.f32 %v4253_v38, %v8019_v47  ;;  %v5160_v29 = vpop.f32.mrb[2].mxu1 }
 0x37f   : > { %v5455_v54 = vpop.eup %5454  ;;  %5474 = vpow2.f32 %v4897_v2  ;;  %v4373_v63 = vmul.f32 %v5191_v45, %v8066_v48  ;;  %v5193_v62 = vadd.f32 %v5160_v29, %v8021_v21  ;;  %v4256_v37 = vpop.f32.mrb[3].mxu1 }
 0x380   : > { %v5457_v61 = vpop.eup %5456  ;;  %v4532_v17 = vadd.f32 1.0, %v5455_v54  ;;  %5476 = vpow2.f32 %v4895_v42  ;;  %v4371_v1 = vmul.f32 %v5192_v19, %v8066_v48  ;;  %v5194_v50 = vadd.f32 %v4256_v37, %v8023_v22 }
 0x381   : > { %v5459_v16 = vpop.eup %5458  ;;  %v4530_v47 = vadd.f32 1.0, %v5457_v61  ;;  %v8185_v18 = vadd.f32 %v8071_v31, %v4373_v63  ;;  %v4374_v11 = vmul.f32 %v5193_v62, %v8066_v48 }
 0x382   : > { %v5461_v41 = vpop.eup %5460  ;;  %v4624_v30 = vmul.f32 %v5459_v16, %v8096_v24  ;;  %5478 = vrcp.f32 %v4532_v17  ;;  %v8190_v21 = vadd.f32 %v8071_v31, %v4371_v1  ;;  %v4372_v15 = vmul.f32 %v5194_v50, %v8066_v48 }
 0x383   : > { %v5463_v9 = vpop.eup %5462  ;;  %v4622_v22 = vmul.f32 %v5461_v41, %v8100_v46  ;;  %5480 = vrcp.f32 %v4530_v47  ;;  %v4900_v59 = vmul.f32 -1.442695, %v8185_v18  ;;  %v8196_v33 = vadd.f32 %v8071_v31, %v4374_v11 }
 0x384   : > { %v5465_v57 = vpop.eup %5464  ;;  %4657 = vst.msk [vmem:[%s8146_s29 + $0x30] sm:$0xff] %vm4650_vm5, %v4624_v30  ;;  %v4625_v24 = vmul.f32 %v5463_v9, %v8105_v36  ;;  %v4898_v5 = vmul.f32 -1.442695, %v8190_v21  ;;  %v8203_v52 = vadd.f32 %v8071_v31, %v4372_v15  ;;  %v5163_v56 = vpop.f32.mrb[4].mxu1 }
 0x385   : > { %v5467_v46 = vpop.eup %5466  ;;  %4655 = vst.msk [vmem:[%s8146_s29 + $0x20] sm:$0xff] %vm4650_vm5, %v4622_v22  ;;  %v4623_v6 = vmul.f32 %v5465_v57, %v8109_v40  ;;  %5482 = vpow2.f32 %v4900_v59  ;;  %v4901_v55 = vmul.f32 -1.442695, %v8196_v33  ;;  %v5195_v27 = vadd.f32 %v5163_v56, %v8025_v14  ;;  %v4269_v0 = vpop.f32.mrb[5].mxu1 }
 0x386   : > { %v5469_v4 = vpop.eup %5468  ;;  %4658 = vst.msk [vmem:[%s8146_s29 + $0x38] sm:$0xff] %vm4650_vm5, %v4625_v24  ;;  %v4533_v36 = vadd.f32 1.0, %v5467_v46  ;;  %5484 = vpow2.f32 %v4898_v5  ;;  %v4899_v32 = vmul.f32 -1.442695, %v8203_v52  ;;  %v5196_v25 = vadd.f32 %v4269_v0, %v8027_v3  ;;  %v5164_v34 = vpop.f32.mrb[6].mxu1 }
 0x387   : > { %v5471_v2 = vpop.eup %5470  ;;  %4656 = vst.msk [vmem:[%s8146_s29 + $0x28] sm:$0xff] %vm4650_vm5, %v4623_v6  ;;  %v4531_v40 = vadd.f32 1.0, %v5469_v4  ;;  %5486 = vpow2.f32 %v4901_v55  ;;  %v4377_v45 = vmul.f32 %v5195_v27, %v8066_v48  ;;  %v5197_v14 = vadd.f32 %v5164_v34, %v8029_v60  ;;  %v4272_v38 = vpop.f32.mrb[7].mxu1 }
 0x388   : > { %v5473_v42 = vpop.eup %5472  ;;  %5488 = vrcp.f32 %v4533_v36  ;;  %v4536_v19 = vadd.f32 1.0, %v5471_v2  ;;  %v4375_v29 = vmul.f32 %v5196_v25, %v8066_v48  ;;  %v5198_v54 = vadd.f32 %v4272_v38, %v8031_v7 }
 0x389   : > { %v5475_v63 = vpop.eup %5474  ;;  %5490 = vrcp.f32 %v4531_v40  ;;  %v4534_v3 = vadd.f32 1.0, %v5473_v42  ;;  %v8221_v62 = vadd.f32 %v8071_v31, %v4377_v45  ;;  %v4378_v37 = vmul.f32 %v5197_v14, %v8066_v48 }
 0x38a   : > { %v5477_v61 = vpop.eup %5476  ;;  %5492 = vrcp.f32 %v4536_v19  ;;  %v4537_v17 = vadd.f32 1.0, %v5475_v63  ;;  %v8225_v60 = vadd.f32 %v8071_v31, %v4375_v29  ;;  %v4376_v1 = vmul.f32 %v5198_v54, %v8066_v48 }
 0x38b   : > { %5494 = vrcp.f32 %v4534_v3  ;;  %v4535_v50 = vadd.f32 1.0, %v5477_v61  ;;  %v4904_v7 = vmul.f32 -1.442695, %v8221_v62  ;;  %v8230_v16 = vadd.f32 %v8071_v31, %v4378_v37 }
 0x38c   : > { %v5479_v47 = vpop.eup %5478  ;;  %5496 = vrcp.f32 %v4537_v17  ;;  %v4902_v11 = vmul.f32 -1.442695, %v8225_v60  ;;  %v8234_v41 = vadd.f32 %v8071_v31, %v4376_v1  ;;  %v5167_v30 = vpop.f32.mrb[8].mxu1 }
 0x38d   : > { %v5481_v15 = vpop.eup %5480  ;;  %v4628_v9 = vmul.f32 %v5479_v47, %v8119_v43  ;;  %5498 = vrcp.f32 %v4535_v50  ;;  %v4905_v22 = vmul.f32 -1.442695, %v8230_v16  ;;  %v5199_v59 = vadd.f32 %v5167_v30, %v8033_v49  ;;  %v4285_v57 = vpop.f32.mrb[9].mxu1 }
 0x38e   : > { %v4626_v24 = vmul.f32 %v5481_v15, %v8123_v35  ;;  %5500 = vpow2.f32 %v4899_v32  ;;  %v5200_v5 = vadd.f32 %v4285_v57, %v8035_v28  ;;  %v5168_v56 = vpop.f32.mrb[10].mxu1  ;;  %v4903_v6 = vmul.f32 -1.442695, %v8234_v41 }
 0x38f   : > { %v5483_v46 = vpop.eup %5482  ;;  %4661 = vst.msk [vmem:[%s8146_s29 + $0x50] sm:$0xff] %vm4650_vm5, %v4628_v9  ;;  %5502 = vpow2.f32 %v4904_v7  ;;  %v4381_v43 = vmul.f32 %v5199_v59, %v8066_v48  ;;  %v5201_v55 = vadd.f32 %v5168_v56, %v8037_v53  ;;  %v4288_v27 = vpop.f32.mrb[11].mxu1 }
 0x390   : > { %v5485_v0 = vpop.eup %5484  ;;  %4659 = vst.msk [vmem:[%s8146_s29 + $0x40] sm:$0xff] %vm4650_vm5, %v4626_v24  ;;  %v4540_v49 = vadd.f32 1.0, %v5483_v46  ;;  %5504 = vpow2.f32 %v4902_v11  ;;  %v4379_v35 = vmul.f32 %v5200_v5, %v8066_v48  ;;  %v5202_v28 = vadd.f32 %v4288_v27, %v8039_v44 }
 0x391   : > { %v5487_v4 = vpop.eup %5486  ;;  %v4538_v36 = vadd.f32 1.0, %v5485_v0  ;;  %5506 = vpow2.f32 %v4905_v22  ;;  %v8251_v32 = vadd.f32 %v8071_v31, %v4381_v43  ;;  %v4382_v25 = vmul.f32 %v5201_v55, %v8066_v48 }
 0x392   : > { %v5489_v34 = vpop.eup %5488  ;;  %5508 = vrcp.f32 %v4540_v49  ;;  %v4541_v53 = vadd.f32 1.0, %v5487_v4  ;;  %v8255_v2 = vadd.f32 %v8071_v31, %v4379_v35  ;;  %v4380_v40 = vmul.f32 %v5202_v28, %v8066_v48 }
 0x393   : > { %v5491_v45 = vpop.eup %5490  ;;  %v4629_v44 = vmul.f32 %v5489_v34, %v8128_v51  ;;  %5510 = vrcp.f32 %v4538_v36  ;;  %v4908_v14 = vmul.f32 -1.442695, %v8251_v32  ;;  %v8261_v38 = vadd.f32 %v8071_v31, %v4382_v25 }
 0x394   : > { %v5493_v42 = vpop.eup %5492  ;;  %v4627_v19 = vmul.f32 %v5491_v45, %v8132_v58  ;;  %5512 = vrcp.f32 %v4541_v53  ;;  %v4906_v29 = vmul.f32 -1.442695, %v8255_v2  ;;  %v8266_v54 = vadd.f32 %v8071_v31, %v4380_v40  ;;  %v5171_v63 = vpop.f32.mrb[12].mxu1 }
 0x395   : > { %v5495_v3 = vpop.eup %5494  ;;  %4662 = vst.msk [vmem:[%s8146_s29 + $0x58] sm:$0xff] %vm4650_vm5, %v4629_v44  ;;  %v4632_v51 = vmul.f32 %v5493_v42, %v8149_v20  ;;  %5514 = vpow2.f32 %v4903_v6  ;;  %v4909_v37 = vmul.f32 -1.442695, %v8261_v38  ;;  %v5203_v61 = vadd.f32 %v5171_v63, %v8041_v12  ;;  %v4301_v17 = vpop.f32.mrb[13].mxu1 }
 0x396   : > { %v5497_v58 = vpop.eup %5496  ;;  %4660 = vst.msk [vmem:[%s8146_s29 + $0x48] sm:$0xff] %vm4650_vm5, %v4627_v19  ;;  %v4630_v1 = vmul.f32 %v5495_v3, %v8154_v10  ;;  %5516 = vpow2.f32 %v4908_v14  ;;  %v4907_v50 = vmul.f32 -1.442695, %v8266_v54  ;;  %v5204_v7 = vadd.f32 %v4301_v17, %v8043_v13  ;;  %v5172_v47 = vpop.f32.mrb[14].mxu1 }
 0x397   : > { %v5499_v20 = vpop.eup %5498  ;;  %4665 = vst.msk [vmem:[%s8146_s29 + $0x70] sm:$0xff] %vm4650_vm5, %v4632_v51  ;;  %v4633_v11 = vmul.f32 %v5497_v58, %v8160_v39  ;;  %5518 = vpow2.f32 %v4906_v29  ;;  %v4385_v12 = vmul.f32 %v5203_v61, %v8066_v48  ;;  %v5205_v30 = vadd.f32 %v5172_v47, %v8045_v8  ;;  %v4304_v15 = vpop.f32.mrb[15].mxu1 }
 0x398   : > { %v5501_v10 = vpop.eup %5500  ;;  %4663 = vst.msk [vmem:[%s8146_s29 + $0x60] sm:$0xff] %vm4650_vm5, %v4630_v1  ;;  %v4631_v9 = vmul.f32 %v5499_v20, %v8167_v26  ;;  %5520 = vpow2.f32 %v4909_v37  ;;  %v4383_v13 = vmul.f32 %v5204_v7, %v8066_v48  ;;  %v5206_v22 = vadd.f32 %v4304_v15, %v8047_v23 }
 0x399   : > { %v5503_v59 = vpop.eup %5502  ;;  %4666 = vst.msk [vmem:[%s8146_s29 + $0x78] sm:$0xff] %vm4650_vm5, %v4633_v11  ;;  %v4539_v39 = vadd.f32 1.0, %v5501_v10  ;;  %5522 = vpow2.f32 %v4907_v50  ;;  %v8291_v57 = vadd.f32 %v8071_v31, %v4385_v12  ;;  %v4386_v8 = vmul.f32 %v5205_v30, %v8066_v48 }
 0x39a   : > { %v5505_v24 = vpop.eup %5504  ;;  %4664 = vst.msk [vmem:[%s8146_s29 + $0x68] sm:$0xff] %vm4650_vm5, %v4631_v9  ;;  %v4544_v5 = vadd.f32 1.0, %v5503_v59  ;;  %v8297_v26 = vadd.f32 %v8071_v31, %v4383_v13  ;;  %v4384_v56 = vmul.f32 %v5206_v22, %v8066_v48 }
 0x39b   : > { %v5507_v23 = vpop.eup %5506  ;;  %5524 = vrcp.f32 %v4539_v39  ;;  %v4542_v46 = vadd.f32 1.0, %v5505_v24  ;;  %v4912_v6 = vmul.f32 -1.442695, %v8291_v57  ;;  %v8302_v43 = vadd.f32 %v8071_v31, %v4386_v8 }
 0x39c   : > { %v5509_v55 = vpop.eup %5508  ;;  %5526 = vrcp.f32 %v4544_v5  ;;  %v4545_v27 = vadd.f32 1.0, %v5507_v23  ;;  %v4910_v0 = vmul.f32 -1.442695, %v8297_v26  ;;  %v8306_v49 = vadd.f32 %v8071_v31, %v4384_v56 }
 0x39d   : > { %v5511_v35 = vpop.eup %5510  ;;  %v4636_v48 = vmul.f32 %v5509_v55, %v8185_v18  ;;  %5528 = vrcp.f32 %v4542_v46  ;;  %v4913_v28 = vmul.f32 -1.442695, %v8302_v43 }
 0x39e   : > { %v5513_v4 = vpop.eup %5512  ;;  %v4634_v36 = vmul.f32 %v5511_v35, %v8190_v21  ;;  %5530 = vrcp.f32 %v4545_v27 }
 0x39f   : > { %v5515_v25 = vpop.eup %5514  ;;  %4669 = vst.msk [vmem:[%s8146_s29 + $0x90] sm:$0xff] %vm4650_vm5, %v4636_v48  ;;  %v4637_v34 = vmul.f32 %v5513_v4, %v8196_v33  ;;  %5532 = vpow2.f32 %v4912_v6  ;;  %v4911_v33 = vmul.f32 -1.442695, %v8306_v49 }
 0x3a0   : > { %v5517_v53 = vpop.eup %5516  ;;  %4667 = vst.msk [vmem:[%s8146_s29 + $0x80] sm:$0xff] %vm4650_vm5, %v4634_v36  ;;  %v4543_v31 = vadd.f32 1.0, %v5515_v25  ;;  %5534 = vpow2.f32 %v4910_v0 }
 0x3a1   : > { %v5519_v40 = vpop.eup %5518  ;;  %4670 = vst.msk [vmem:[%s8146_s29 + $0x98] sm:$0xff] %vm4650_vm5, %v4637_v34  ;;  %v4548_v18 = vadd.f32 1.0, %v5517_v53  ;;  %5536 = vpow2.f32 %v4913_v28 }
 0x3a2   : > { %v5521_v45 = vpop.eup %5520  ;;  %5538 = vrcp.f32 %v4543_v31  ;;  %v4546_v21 = vadd.f32 1.0, %v5519_v40 }
 0x3a3   : > { %v5523_v44 = vpop.eup %5522  ;;  %5540 = vrcp.f32 %v4548_v18  ;;  %v4549_v14 = vadd.f32 1.0, %v5521_v45 }
 0x3a4   : > { %5542 = vrcp.f32 %v4546_v21  ;;  %v4547_v42 = vadd.f32 1.0, %v5523_v44 }
 0x3a5   : > { %v5525_v19 = vpop.eup %5524  ;;  %5544 = vrcp.f32 %v4549_v14 }
 0x3a6   : > { %v5527_v29 = vpop.eup %5526  ;;  %v4635_v63 = vmul.f32 %v5525_v19, %v8203_v52  ;;  %5546 = vrcp.f32 %v4547_v42 }
 0x3a7   : > { %v5529_v3 = vpop.eup %5528  ;;  %v4640_v51 = vmul.f32 %v5527_v29, %v8221_v62  ;;  %5548 = vpow2.f32 %v4911_v33 }
 0x3a8   : > { %v5531_v37 = vpop.eup %5530  ;;  %4668 = vst.msk [vmem:[%s8146_s29 + $0x88] sm:$0xff] %vm4650_vm5, %v4635_v63  ;;  %v4638_v61 = vmul.f32 %v5529_v3, %v8225_v60 }
 0x3a9   : > { %v5533_v17 = vpop.eup %5532  ;;  %4673 = vst.msk [vmem:[%s8146_s29 + $0xb0] sm:$0xff] %vm4650_vm5, %v4640_v51  ;;  %v4641_v58 = vmul.f32 %v5531_v37, %v8230_v16 }
 0x3aa   : > { %v5535_v1 = vpop.eup %5534  ;;  %4671 = vst.msk [vmem:[%s8146_s29 + $0xa0] sm:$0xff] %vm4650_vm5, %v4638_v61  ;;  %v4552_v52 = vadd.f32 1.0, %v5533_v17 }
 0x3ab   : > { %v5537_v50 = vpop.eup %5536  ;;  %4674 = vst.msk [vmem:[%s8146_s29 + $0xb8] sm:$0xff] %vm4650_vm5, %v4641_v58  ;;  %v4550_v62 = vadd.f32 1.0, %v5535_v1 }
 0x3ac   : > { %v5539_v7 = vpop.eup %5538  ;;  %5550 = vrcp.f32 %v4552_v52  ;;  %v4553_v47 = vadd.f32 1.0, %v5537_v50 }
 0x3ad   : > { %v5541_v60 = vpop.eup %5540  ;;  %v4639_v20 = vmul.f32 %v5539_v7, %v8234_v41  ;;  %5552 = vrcp.f32 %v4550_v62 }
 0x3ae   : > { %v5543_v16 = vpop.eup %5542  ;;  %v4644_v11 = vmul.f32 %v5541_v60, %v8251_v32  ;;  %5554 = vrcp.f32 %v4553_v47 }
 0x3af   : > { %v5545_v12 = vpop.eup %5544  ;;  %4672 = vst.msk [vmem:[%s8146_s29 + $0xa8] sm:$0xff] %vm4650_vm5, %v4639_v20  ;;  %v4642_v30 = vmul.f32 %v5543_v16, %v8255_v2 }
 0x3b0   : > { %v5547_v15 = vpop.eup %5546  ;;  %4677 = vst.msk [vmem:[%s8146_s29 + $0xd0] sm:$0xff] %vm4650_vm5, %v4644_v11  ;;  %v4645_v10 = vmul.f32 %v5545_v12, %v8261_v38 }
 0x3b1   : > { %v5549_v41 = vpop.eup %5548  ;;  %4675 = vst.msk [vmem:[%s8146_s29 + $0xc0] sm:$0xff] %vm4650_vm5, %v4642_v30  ;;  %v4643_v9 = vmul.f32 %v5547_v15, %v8266_v54 }
 0x3b2   : > { %4678 = vst.msk [vmem:[%s8146_s29 + $0xd8] sm:$0xff] %vm4650_vm5, %v4645_v10  ;;  %v4551_v32 = vadd.f32 1.0, %v5549_v41 }
 0x3b3   : > { %4676 = vst.msk [vmem:[%s8146_s29 + $0xc8] sm:$0xff] %vm4650_vm5, %v4643_v9 }
 0x3b4   : > { %5556 = vrcp.f32 %v4551_v32 }
 0x3b6   : > { %v5551_v2 = vpop.eup %5550 }
 0x3b7   : > { %v5553_v13 = vpop.eup %5552  ;;  %v4648_v22 = vmul.f32 %v5551_v2, %v8291_v57 }
 0x3b8   : > { %v5555_v59 = vpop.eup %5554  ;;  %v4646_v38 = vmul.f32 %v5553_v13, %v8297_v26 }
 0x3b9   : > { %4681 = vst.msk [vmem:[%s8146_s29 + $0xf0] sm:$0xff] %vm4650_vm5, %v4648_v22  ;;  %v4649_v39 = vmul.f32 %v5555_v59, %v8302_v43 }
 0x3ba   : > { %4679 = vst.msk [vmem:[%s8146_s29 + $0xe0] sm:$0xff] %vm4650_vm5, %v4646_v38 }
 0x3bb   : > { %4682 = vst.msk [vmem:[%s8146_s29 + $0xf8] sm:$0xff] %vm4650_vm5, %v4649_v39 }
 0x3be   : > { %v5557_v54 = vpop.eup %5556 }
 0x3bf   : > { %v4647_v8 = vmul.f32 %v5557_v54, %v8306_v49 }
 0x3c1   : > { %4680 = vst.msk [vmem:[%s8146_s29 + $0xe8] sm:$0xff] %vm4650_vm5, %v4647_v8 }
 0x3c2 PF: > { %s17_s24 = sadd.s32 1, %s5570_s24  }
 0x3c3   : > { %p14_p4 = scmp.ge.s32.totalorder %s17_s24, 4  }
 0x3c5   :  { %16 = sbr.rel (!%p14_p4) target bundleno = 1 (0x1), region = 86 }

</bundles_post_ra>
